<compile_context>
chip_gen: v6e
topology: v6e:2x2x1
jax: 0.10.0
libtpu: 0.0.40
codegen_flags: <defaults>
</compile_context>

<pallas_src>
import functools

import jax
import jax.numpy as jnp
from jax.experimental import pallas as pl
from jax.experimental.pallas import tpu as pltpu

EPS = 1e-5
NEG_SLOPE = 0.2


# ----------------------------- tile selection -------------------------------

_TILE_CFG = None


def _tile_config():
    """(tm_max, tk_max, vmem_limit_bytes), gated on physical VMEM size.

    v5e/v6e (128 MiB VMEM): TM=1024, 64 MiB scoped limit.
    v7x (64 MiB VMEM) / unknown: TM=512, 32 MiB, rely on K tiling.
    """
    global _TILE_CFG
    if _TILE_CFG is None:
        vmem_bytes = 64 * 1024 * 1024
        try:
            vmem_bytes = int(pltpu.get_tpu_info().vmem_capacity_bytes)
        except Exception:
            pass
        if vmem_bytes >= 100 * 1024 * 1024:
            _TILE_CFG = (1024, 2048, 64 * 1024 * 1024)
        else:
            _TILE_CFG = (512, 2048, 32 * 1024 * 1024)
    return _TILE_CFG


def _round_up(x, m):
    return ((x + m - 1) // m) * m


def _apply_act(v, act):
    if act == "leaky":
        return jnp.where(v >= 0, v, NEG_SLOPE * v)
    if act == "sigmoid":
        # EUP exp + approx reciprocal (otherwise-idle EUP slot).
        return pl.reciprocal(1.0 + jnp.exp(-v), approx=True)
    return v


# ----------------------------- Pallas kernels -------------------------------

def _conv_act_kernel(x_ref, w_ref, b_ref, o_ref, acc_ref, *, act):
    """bf16 (TM,TK)@(TK,C) matmul accumulated over the K grid axis in a f32
    VMEM scratch, then bias + activation fused into the final K step."""
    k = pl.program_id(1)

    @pl.when(k == 0)
    def _():
        acc_ref[...] = jnp.zeros_like(acc_ref)

    acc_ref[...] += jnp.dot(x_ref[...], w_ref[...],
                            preferred_element_type=jnp.float32)

    @pl.when(k == pl.num_programs(1) - 1)
    def _():
        y = acc_ref[...] + b_ref[...]
        o_ref[...] = _apply_act(y, act).astype(o_ref.dtype)


def _conv_stats_kernel(x_ref, w_ref, y_ref, sum_ref, sq_ref, acc_ref):
    """Bias-free conv matmul (K-tiled, f32 acc) + per-M-tile BN stat partials.

    Stats are computed from the f32 accumulator before the bf16 downcast.
    Zero-padded M rows are all-zero patch rows and there is no bias, so they
    contribute exactly 0 to the statistics (no masking required)."""
    k = pl.program_id(1)

    @pl.when(k == 0)
    def _():
        acc_ref[...] = jnp.zeros_like(acc_ref)

    acc_ref[...] += jnp.dot(x_ref[...], w_ref[...],
                            preferred_element_type=jnp.float32)

    @pl.when(k == pl.num_programs(1) - 1)
    def _():
        y = acc_ref[...]
        y_ref[...] = y.astype(y_ref.dtype)
        sum_ref[...] = jnp.sum(y, axis=0, keepdims=True)[None]
        sq_ref[...] = jnp.sum(y * y, axis=0, keepdims=True)[None]


# ------------------------------ glue helpers --------------------------------

def _extract_patches(x, scale, shift, tm_max, tk_max, k=3, s=2, p=2):
    """Channels-last (N,D,H,W,C) -> bf16 (Mp, Kp) im2col slab.

    If scale/shift are given, the previous layer's BN affine + leaky_relu are
    applied elementwise inside this same XLA fusion (no standalone HBM pass).
    Row (M) and contraction (K) padding are folded into the same fusion."""
    n, d, h, w, c = x.shape
    xf = x.astype(jnp.float32)
    if scale is not None:
        xf = xf * scale + shift                       # (C,) broadcasts
        xf = jnp.where(xf >= 0, xf, NEG_SLOPE * xf)   # fused leaky_relu
    xb = xf.astype(jnp.bfloat16)
    xp = jnp.pad(xb, ((0, 0), (p, p), (p, p), (p, p), (0, 0)))

    do = (d + 2 * p - k) // s + 1
    ho = (h + 2 * p - k) // s + 1
    wo = (w + 2 * p - k) // s + 1
    taps = []
    for kd in range(k):
        for kh in range(k):
            for kw in range(k):
                taps.append(xp[:,
                               kd:kd + s * (do - 1) + 1:s,
                               kh:kh + s * (ho - 1) + 1:s,
                               kw:kw + s * (wo - 1) + 1:s, :])
    pat = jnp.stack(taps, axis=4)                     # (N,Do,Ho,Wo,27,C)

    m = n * do * ho * wo
    kdim = k ** 3 * c
    pat = pat.reshape(m, kdim)

    # M tile: multiple of 16 (bf16 packs two rows per sublane).
    tm = min(tm_max, _round_up(m, 16))
    mp = _round_up(m, tm)
    # K: lane-dense multiple of 128; tile with tk<=tk_max for large layers.
    kp = _round_up(kdim, 128)
    tk = kp if kp <= tk_max else tk_max
    kp = _round_up(kp, tk)
    pat = jnp.pad(pat, ((0, mp - m), (0, kp - kdim)))
    return pat, m, mp, tm, kp, tk, (n, do, ho, wo)


def _conv_weights(w, kp, coutp, b=None):
    """(Cout,Cin,3,3,3) -> bf16 (Kp, Coutp) matching the (kd,kh,kw,cin) tap
    ordering of _extract_patches; zero-padded K rows / Cout columns."""
    cout, cin = w.shape[0], w.shape[1]
    kdim = 27 * cin
    wm = w.transpose(2, 3, 4, 1, 0).reshape(kdim, cout).astype(jnp.bfloat16)
    wm = jnp.pad(wm, ((0, kp - kdim), (0, coutp - cout)))
    if b is None:
        return wm
    bv = jnp.pad(b.astype(jnp.float32), (0, coutp - cout)).reshape(1, coutp)
    return wm, bv


# --------------------------- Pallas-backed layers ----------------------------

def conv3d_act(x, scale_in, shift_in, w, b, act, out_dtype, cout_pad,
               tm_max, tk_max, vmem_limit):
    """Conv3d(k3,s2,p2) + bias + activation, with the producer's BN affine +
    leaky (if any) folded into the patch-extraction fusion."""
    pat, m, mp, tm, kp, tk, dims = _extract_patches(
        x, scale_in, shift_in, tm_max, tk_max)
    cout = w.shape[0]
    coutp = cout if cout_pad is None else max(cout, cout_pad)
    wm, bv = _conv_weights(w, kp, coutp, b)
    m_steps, k_steps = mp // tm, kp // tk

    cost = pl.CostEstimate(
        flops=2 * mp * kp * coutp,
        transcendentals=mp * coutp if act == "sigmoid" else 0,
        bytes_accessed=mp * kp * 2 + kp * coutp * 2 + coutp * 4
        + mp * coutp * jnp.dtype(out_dtype).itemsize)

    out = pl.pallas_call(
        functools.partial(_conv_act_kernel, act=act),
        out_shape=jax.ShapeDtypeStruct((mp, coutp), out_dtype),
        grid=(m_steps, k_steps),
        in_specs=[
            pl.BlockSpec((tm, tk), lambda i, k: (i, k)),
            pl.BlockSpec((tk, coutp), lambda i, k: (k, 0)),
            pl.BlockSpec((1, coutp), lambda i, k: (0, 0)),
        ],
        out_specs=pl.BlockSpec((tm, coutp), lambda i, k: (i, 0)),
        scratch_shapes=[pltpu.VMEM((tm, coutp), jnp.float32)],
        compiler_params=pltpu.CompilerParams(
            dimension_semantics=("parallel", "arbitrary"),
            vmem_limit_bytes=vmem_limit),
        cost_estimate=cost,
    )(pat, wm, bv)

    n, do, ho, wo = dims
    return out[:m, :cout].reshape(n, do, ho, wo, cout)


def conv3d_bn(x, scale_in, shift_in, w, gamma, beta, tm_max, tk_max,
              vmem_limit):
    """Bias-free Conv3d + per-tile BN batch stats in one pallas_call.

    Returns the raw conv output (bf16, channels-last) plus per-channel
    (scale, shift); the affine + leaky_relu is applied by the consumer's
    patch-extraction fusion.  The conv bias is a mathematical no-op under
    BatchNorm (the batch mean absorbs it) and is therefore dropped."""
    pat, m, mp, tm, kp, tk, dims = _extract_patches(
        x, scale_in, shift_in, tm_max, tk_max)
    cout = w.shape[0]
    wm = _conv_weights(w, kp, cout)
    m_steps, k_steps = mp // tm, kp // tk

    cost = pl.CostEstimate(
        flops=2 * mp * kp * cout,
        transcendentals=0,
        bytes_accessed=mp * kp * 2 + kp * cout * 2 + mp * cout * 2)

    y, sums_p, sqs_p = pl.pallas_call(
        _conv_stats_kernel,
        out_shape=(jax.ShapeDtypeStruct((mp, cout), jnp.bfloat16),
                   jax.ShapeDtypeStruct((m_steps, 1, cout), jnp.float32),
                   jax.ShapeDtypeStruct((m_steps, 1, cout), jnp.float32)),
        grid=(m_steps, k_steps),
        in_specs=[
            pl.BlockSpec((tm, tk), lambda i, k: (i, k)),
            pl.BlockSpec((tk, cout), lambda i, k: (k, 0)),
        ],
        out_specs=(pl.BlockSpec((tm, cout), lambda i, k: (i, 0)),
                   pl.BlockSpec((1, 1, cout), lambda i, k: (i, 0, 0)),
                   pl.BlockSpec((1, 1, cout), lambda i, k: (i, 0, 0))),
        scratch_shapes=[pltpu.VMEM((tm, cout), jnp.float32)],
        compiler_params=pltpu.CompilerParams(
            dimension_semantics=("parallel", "arbitrary"),
            vmem_limit_bytes=vmem_limit),
        cost_estimate=cost,
    )(pat, wm)

    # Tiny (C,)-sized BN statistics math in plain JAX (training-mode BN:
    # batch mean, biased variance).
    sums = jnp.sum(sums_p, axis=(0, 1))
    sqs = jnp.sum(sqs_p, axis=(0, 1))
    mean = sums / m
    # TODO(synk): single-pass E[x^2]-E[x]^2 in f32; switch to a two-pass /
    #             Welford update if activation magnitudes grow enough to
    #             cause cancellation.
    var = jnp.maximum(sqs / m - mean * mean, 0.0)
    inv = gamma / jnp.sqrt(var + EPS)
    scale = inv.astype(jnp.float32)
    shift = (beta - mean * inv).astype(jnp.float32)

    n, do, ho, wo = dims
    return y[:m].reshape(n, do, ho, wo, cout), scale, shift


# ------------------------------ full forward ---------------------------------

def turbnetd_forward(p, x1, x2):
    tm_max, tk_max, vmem_limit = _tile_config()

    # NCDHW inputs -> channels-last once at the boundary.
    x = jnp.concatenate([x1, x2], axis=1).transpose(0, 2, 3, 4, 1)

    # c0 (+ the leaky_relu feeding c1, fused in-kernel).
    h = conv3d_act(x, None, None, p["c0_w"], p["c0_b"], "leaky",
                   jnp.bfloat16, None, tm_max, tk_max, vmem_limit)

    # c1..c3: bias-free conv + batch stats; BN affine + leaky folded into the
    # next layer's patch extraction (c1_b/c2_b/c3_b are no-ops under BN).
    y, s, t = conv3d_bn(h, None, None, p["c1_w"], p["bn1_g"], p["bn1_b"],
                        tm_max, tk_max, vmem_limit)
    y, s, t = conv3d_bn(y, s, t, p["c2_w"], p["bn2_g"], p["bn2_b"],
                        tm_max, tk_max, vmem_limit)
    y, s, t = conv3d_bn(y, s, t, p["c3_w"], p["bn3_g"], p["bn3_b"],
                        tm_max, tk_max, vmem_limit)

    # c4 + sigmoid; Cout=1 padded to 128 lanes in-kernel, sliced in XLA.
    out = conv3d_act(y, s, t, p["c4_w"], p["c4_b"], "sigmoid",
                     jnp.float32, 128, tm_max, tk_max, vmem_limit)

    return out.transpose(0, 4, 1, 2, 3)   # back to NCDHW (N, 1, Do, Ho, Wo)


# ------------------------------- param init ----------------------------------

def init_params(key, in_channels1, in_channels2, ch):
    def conv_init(k, cout, cin):
        kw, kb = jax.random.split(k)
        fan_in = cin * 27
        w = jax.random.normal(kw, (cout, cin, 3, 3, 3), jnp.float32) / jnp.sqrt(fan_in)
        b = 0.01 * jax.random.normal(kb, (cout,), jnp.float32)
        return w, b

    keys = jax.random.split(key, 5)
    p = {}
    p["c0_w"], p["c0_b"] = conv_init(keys[0], ch, in_channels1 + in_channels2)
    p["c1_w"], p["c1_b"] = conv_init(keys[1], ch * 2, ch)
    p["c2_w"], p["c2_b"] = conv_init(keys[2], ch * 4, ch * 2)
    p["c3_w"], p["c3_b"] = conv_init(keys[3], ch * 8, ch * 4)
    p["c4_w"], p["c4_b"] = conv_init(keys[4], 1, ch * 8)
    p["bn1_g"] = jnp.ones((ch * 2,), jnp.float32)
    p["bn1_b"] = jnp.zeros((ch * 2,), jnp.float32)
    p["bn2_g"] = jnp.ones((ch * 4,), jnp.float32)
    p["bn2_b"] = jnp.zeros((ch * 4,), jnp.float32)
    p["bn3_g"] = jnp.ones((ch * 8,), jnp.float32)
    p["bn3_b"] = jnp.zeros((ch * 8,), jnp.float32)
    return p


if __name__ == "__main__":
    key = jax.random.PRNGKey(0)
    k1, k2, kp = jax.random.split(key, 3)

    N, C1, C2, S, CH = 2, 2, 2, 16, 8
    x1 = jax.random.normal(k1, (N, C1, S, S, S), jnp.float32)
    x2 = jax.random.normal(k2, (N, C2, S, S, S), jnp.float32)
    params = init_params(kp, C1, C2, CH)

    out = jax.jit(turbnetd_forward)(params, x1, x2)
    out = jax.block_until_ready(out)

    # spatial 16 -> 9 -> 6 -> 4 -> 3 -> 3 under (k=3, s=2, p=2)
    assert out.shape == (N, 1, 3, 3, 3), out.shape
    assert bool(jnp.all(jnp.isfinite(out)))
    # sigmoid range (small slack for the approx-reciprocal sigmoid)
    assert bool(jnp.all((out > -1e-3) & (out < 1.0 + 1e-3)))
    print("KERNEL_OK")
</pallas_src>

<mosaic_0001>
module attributes {stable_mosaic.version = 11 : i64} {
  func.func @_conv_act_kernel(%arg0: i32, %arg1: i32, %arg2: memref<512x128xbf16, #tpu.memory_space<vmem>>, %arg3: memref<128x8xbf16, #tpu.memory_space<vmem>>, %arg4: memref<1x8xf32, #tpu.memory_space<vmem>>, %arg5: memref<512x8xbf16, #tpu.memory_space<vmem>>, %arg6: memref<512x8xf32, #tpu.memory_space<vmem>>) attributes {dimension_semantics = [#tpu.dimension_semantics<parallel>, #tpu.dimension_semantics<arbitrary>], iteration_bounds = array<i64: 3, 1>, scalar_prefetch = 0 : i64, scratch_operands = 1 : i64, tpu.core_type = #tpu.core_type<tc>, window_params = [{transform_indices = @transform_0, window_bounds = array<i64: 512, 128>}, {transform_indices = @transform_1, window_bounds = array<i64: 128, 8>}, {pipeline_mode = #tpu.pipeline_mode<synchronous>, transform_indices = @transform_2, window_bounds = array<i64: 1, 8>}, {transform_indices = @transform_3, window_bounds = array<i64: 512, 8>}]} {
    %c0_i32 = arith.constant 0 : i32
    %0 = arith.cmpi eq, %arg1, %c0_i32 : i32
    %1 = arith.extui %0 : i1 to i32
    %c0_i32_0 = arith.constant 0 : i32
    %2 = arith.cmpi ne, %1, %c0_i32_0 : i32
    scf.if %2 {
      %cst_10 = arith.constant 0.000000e+00 : f32
      %12 = vector.broadcast %cst_10 : f32 to vector<512x8xf32>
      %c0_11 = arith.constant 0 : index
      %c0_12 = arith.constant 0 : index
      %13 = vector.load %arg6[%c0_11, %c0_12] : memref<512x8xf32, #tpu.memory_space<vmem>>, vector<512x8xf32>
      tpu.vector_store %arg6[%c0_11, %c0_12], %12 {strides = array<i32>} : memref<512x8xf32, #tpu.memory_space<vmem>>, vector<512x8xf32>,
    } else {
    }
    %c0 = arith.constant 0 : index
    %c0_1 = arith.constant 0 : index
    %3 = vector.load %arg6[%c0, %c0_1] : memref<512x8xf32, #tpu.memory_space<vmem>>, vector<512x8xf32>
    %c0_2 = arith.constant 0 : index
    %c0_3 = arith.constant 0 : index
    %4 = vector.load %arg2[%c0_2, %c0_3] : memref<512x128xbf16, #tpu.memory_space<vmem>>, vector<512x128xbf16>
    %c0_4 = arith.constant 0 : index
    %c0_5 = arith.constant 0 : index
    %5 = vector.load %arg3[%c0_4, %c0_5] : memref<128x8xbf16, #tpu.memory_space<vmem>>, vector<128x8xbf16>
    %cst = arith.constant dense<0.000000e+00> : vector<512x8xf32>
    %6 = tpu.matmul %4, %5, %cst {dimension_numbers = #tpu.dot_dimension_numbers<[1], [0], [0], [1], [0, 0, 1, 1], [], []>} : vector<512x128xbf16>, vector<128x8xbf16>, vector<512x8xf32> -> vector<512x8xf32>
    %7 = arith.addf %3, %6 : vector<512x8xf32>
    %c0_6 = arith.constant 0 : index
    %c0_7 = arith.constant 0 : index
    %8 = vector.load %arg6[%c0_6, %c0_7] : memref<512x8xf32, #tpu.memory_space<vmem>>, vector<512x8xf32>
    tpu.vector_store %arg6[%c0_6, %c0_7], %7 {strides = array<i32>} : memref<512x8xf32, #tpu.memory_space<vmem>>, vector<512x8xf32>,
    %c0_i32_8 = arith.constant 0 : i32
    %9 = arith.cmpi eq, %arg1, %c0_i32_8 : i32
    %10 = arith.extui %9 : i1 to i32
    %c0_i32_9 = arith.constant 0 : i32
    %11 = arith.cmpi ne, %10, %c0_i32_9 : i32
    scf.if %11 {
      %c0_10 = arith.constant 0 : index
      %c0_11 = arith.constant 0 : index
      %12 = vector.load %arg6[%c0_10, %c0_11] : memref<512x8xf32, #tpu.memory_space<vmem>>, vector<512x8xf32>
      %c0_12 = arith.constant 0 : index
      %c0_13 = arith.constant 0 : index
      %13 = vector.load %arg4[%c0_12, %c0_13] : memref<1x8xf32, #tpu.memory_space<vmem>>, vector<1x8xf32>
      %14 = vector.broadcast %13 : vector<1x8xf32> to vector<512x8xf32>
      %15 = arith.addf %12, %14 : vector<512x8xf32>
      %cst_14 = arith.constant 0.000000e+00 : f32
      %16 = vector.broadcast %cst_14 : f32 to vector<512x8xf32>
      %17 = arith.cmpf oge, %15, %16 : vector<512x8xf32>
      %cst_15 = arith.constant 2.000000e-01 : f32
      %18 = vector.broadcast %cst_15 : f32 to vector<512x8xf32>
      %19 = arith.mulf %18, %15 : vector<512x8xf32>
      %20 = arith.select %17, %15, %19 : vector<512x8xi1>, vector<512x8xf32>
      %21 = arith.truncf %20 : vector<512x8xf32> to vector<512x8xbf16>
      %c0_16 = arith.constant 0 : index
      %c0_17 = arith.constant 0 : index
      %22 = vector.load %arg5[%c0_16, %c0_17] : memref<512x8xbf16, #tpu.memory_space<vmem>>, vector<512x8xbf16>
      tpu.vector_store %arg5[%c0_16, %c0_17], %21 {strides = array<i32>} : memref<512x8xbf16, #tpu.memory_space<vmem>>, vector<512x8xbf16>,
    } else {
    }
    return
  }
  func.func @transform_0(%arg0: i32, %arg1: i32) -> (i32, i32) {
    %c0_i32 = arith.constant 0 : i32
    return %arg0, %arg1 : i32, i32
  }
  func.func @transform_1(%arg0: i32, %arg1: i32) -> (i32, i32) {
    %c0_i32 = arith.constant 0 : i32
    %c0_i32_0 = arith.constant 0 : i32
    return %arg1, %c0_i32 : i32, i32
  }
  func.func @transform_2(%arg0: i32, %arg1: i32) -> (i32, i32) {
    %c0_i32 = arith.constant 0 : i32
    %c0_i32_0 = arith.constant 0 : i32
    %c0_i32_1 = arith.constant 0 : i32
    return %c0_i32, %c0_i32_0 : i32, i32
  }
  func.func @transform_3(%arg0: i32, %arg1: i32) -> (i32, i32) {
    %c0_i32 = arith.constant 0 : i32
    %c0_i32_0 = arith.constant 0 : i32
    return %arg0, %c0_i32 : i32, i32
  }
}

module attributes {stable_mosaic.version = 11 : i64} {
  func.func @_conv_stats_kernel(%arg0: i32, %arg1: i32, %arg2: memref<432x256xbf16, #tpu.memory_space<vmem>>, %arg3: memref<256x16xbf16, #tpu.memory_space<vmem>>, %arg4: memref<432x16xbf16, #tpu.memory_space<vmem>>, %arg5: memref<1x1x16xf32, #tpu.memory_space<vmem>>, %arg6: memref<1x1x16xf32, #tpu.memory_space<vmem>>, %arg7: memref<432x16xf32, #tpu.memory_space<vmem>>) attributes {dimension_semantics = [#tpu.dimension_semantics<parallel>, #tpu.dimension_semantics<arbitrary>], iteration_bounds = array<i64: 1, 1>, scalar_prefetch = 0 : i64, scratch_operands = 1 : i64, tpu.core_type = #tpu.core_type<tc>, window_params = [{transform_indices = @transform_0, window_bounds = array<i64: 432, 256>}, {transform_indices = @transform_1, window_bounds = array<i64: 256, 16>}, {transform_indices = @transform_2, window_bounds = array<i64: 432, 16>}, {transform_indices = @transform_3, window_bounds = array<i64: 1, 1, 16>}, {transform_indices = @transform_4, window_bounds = array<i64: 1, 1, 16>}]} {
    %c0_i32 = arith.constant 0 : i32
    %0 = arith.cmpi eq, %arg1, %c0_i32 : i32
    %1 = arith.extui %0 : i1 to i32
    %c0_i32_0 = arith.constant 0 : i32
    %2 = arith.cmpi ne, %1, %c0_i32_0 : i32
    scf.if %2 {
      %cst_10 = arith.constant 0.000000e+00 : f32
      %12 = vector.broadcast %cst_10 : f32 to vector<432x16xf32>
      %c0_11 = arith.constant 0 : index
      %c0_12 = arith.constant 0 : index
      %13 = vector.load %arg7[%c0_11, %c0_12] : memref<432x16xf32, #tpu.memory_space<vmem>>, vector<432x16xf32>
      tpu.vector_store %arg7[%c0_11, %c0_12], %12 {strides = array<i32>} : memref<432x16xf32, #tpu.memory_space<vmem>>, vector<432x16xf32>,
    } else {
    }
    %c0 = arith.constant 0 : index
    %c0_1 = arith.constant 0 : index
    %3 = vector.load %arg7[%c0, %c0_1] : memref<432x16xf32, #tpu.memory_space<vmem>>, vector<432x16xf32>
    %c0_2 = arith.constant 0 : index
    %c0_3 = arith.constant 0 : index
    %4 = vector.load %arg2[%c0_2, %c0_3] : memref<432x256xbf16, #tpu.memory_space<vmem>>, vector<432x256xbf16>
    %c0_4 = arith.constant 0 : index
    %c0_5 = arith.constant 0 : index
    %5 = vector.load %arg3[%c0_4, %c0_5] : memref<256x16xbf16, #tpu.memory_space<vmem>>, vector<256x16xbf16>
    %cst = arith.constant dense<0.000000e+00> : vector<432x16xf32>
    %6 = tpu.matmul %4, %5, %cst {dimension_numbers = #tpu.dot_dimension_numbers<[1], [0], [0], [1], [0, 0, 1, 1], [], []>} : vector<432x256xbf16>, vector<256x16xbf16>, vector<432x16xf32> -> vector<432x16xf32>
    %7 = arith.addf %3, %6 : vector<432x16xf32>
    %c0_6 = arith.constant 0 : index
    %c0_7 = arith.constant 0 : index
    %8 = vector.load %arg7[%c0_6, %c0_7] : memref<432x16xf32, #tpu.memory_space<vmem>>, vector<432x16xf32>
    tpu.vector_store %arg7[%c0_6, %c0_7], %7 {strides = array<i32>} : memref<432x16xf32, #tpu.memory_space<vmem>>, vector<432x16xf32>,
    %c0_i32_8 = arith.constant 0 : i32
    %9 = arith.cmpi eq, %arg1, %c0_i32_8 : i32
    %10 = arith.extui %9 : i1 to i32
    %c0_i32_9 = arith.constant 0 : i32
    %11 = arith.cmpi ne, %10, %c0_i32_9 : i32
    scf.if %11 {
      %c0_10 = arith.constant 0 : index
      %c0_11 = arith.constant 0 : index
      %12 = vector.load %arg7[%c0_10, %c0_11] : memref<432x16xf32, #tpu.memory_space<vmem>>, vector<432x16xf32>
      %13 = arith.truncf %12 : vector<432x16xf32> to vector<432x16xbf16>
      %c0_12 = arith.constant 0 : index
      %c0_13 = arith.constant 0 : index
      %14 = vector.load %arg4[%c0_12, %c0_13] : memref<432x16xbf16, #tpu.memory_space<vmem>>, vector<432x16xbf16>
      tpu.vector_store %arg4[%c0_12, %c0_13], %13 {strides = array<i32>} : memref<432x16xbf16, #tpu.memory_space<vmem>>, vector<432x16xbf16>,
      %cst_14 = arith.constant dense<0.000000e+00> : vector<16xf32>
      %15 = vector.multi_reduction <add>, %12, %cst_14 [0] : vector<432x16xf32> to vector<16xf32>
      %16 = vector.shape_cast %15 : vector<16xf32> to vector<1x16xf32>
      %17 = vector.shape_cast %16 : vector<1x16xf32> to vector<1x1x16xf32>
      %c0_15 = arith.constant 0 : index
      %c0_16 = arith.constant 0 : index
      %c0_17 = arith.constant 0 : index
      %18 = vector.load %arg5[%c0_15, %c0_16, %c0_17] : memref<1x1x16xf32, #tpu.memory_space<vmem>>, vector<1x1x16xf32>
      tpu.vector_store %arg5[%c0_15, %c0_16, %c0_17], %17 {strides = array<i32>} : memref<1x1x16xf32, #tpu.memory_space<vmem>>, vector<1x1x16xf32>,
      %19 = arith.mulf %12, %12 : vector<432x16xf32>
      %cst_18 = arith.constant dense<0.000000e+00> : vector<16xf32>
      %20 = vector.multi_reduction <add>, %19, %cst_18 [0] : vector<432x16xf32> to vector<16xf32>
      %21 = vector.shape_cast %20 : vector<16xf32> to vector<1x16xf32>
      %22 = vector.shape_cast %21 : vector<1x16xf32> to vector<1x1x16xf32>
      %c0_19 = arith.constant 0 : index
      %c0_20 = arith.constant 0 : index
      %c0_21 = arith.constant 0 : index
      %23 = vector.load %arg6[%c0_19, %c0_20, %c0_21] : memref<1x1x16xf32, #tpu.memory_space<vmem>>, vector<1x1x16xf32>
      tpu.vector_store %arg6[%c0_19, %c0_20, %c0_21], %22 {strides = array<i32>} : memref<1x1x16xf32, #tpu.memory_space<vmem>>, vector<1x1x16xf32>,
    } else {
    }
    return
  }
  func.func @transform_0(%arg0: i32, %arg1: i32) -> (i32, i32) {
    %c0_i32 = arith.constant 0 : i32
    return %arg0, %arg1 : i32, i32
  }
  func.func @transform_1(%arg0: i32, %arg1: i32) -> (i32, i32) {
    %c0_i32 = arith.constant 0 : i32
    %c0_i32_0 = arith.constant 0 : i32
    return %arg1, %c0_i32 : i32, i32
  }
  func.func @transform_2(%arg0: i32, %arg1: i32) -> (i32, i32) {
    %c0_i32 = arith.constant 0 : i32
    %c0_i32_0 = arith.constant 0 : i32
    return %arg0, %c0_i32 : i32, i32
  }
  func.func @transform_3(%arg0: i32, %arg1: i32) -> (i32, i32, i32) {
    %c0_i32 = arith.constant 0 : i32
    %c0_i32_0 = arith.constant 0 : i32
    %c0_i32_1 = arith.constant 0 : i32
    return %arg0, %c0_i32, %c0_i32_0 : i32, i32, i32
  }
  func.func @transform_4(%arg0: i32, %arg1: i32) -> (i32, i32, i32) {
    %c0_i32 = arith.constant 0 : i32
    %c0_i32_0 = arith.constant 0 : i32
    %c0_i32_1 = arith.constant 0 : i32
    return %arg0, %c0_i32, %c0_i32_0 : i32, i32, i32
  }
}

module attributes {stable_mosaic.version = 11 : i64} {
  func.func @_conv_stats_kernel(%arg0: i32, %arg1: i32, %arg2: memref<128x512xbf16, #tpu.memory_space<vmem>>, %arg3: memref<512x32xbf16, #tpu.memory_space<vmem>>, %arg4: memref<128x32xbf16, #tpu.memory_space<vmem>>, %arg5: memref<1x1x32xf32, #tpu.memory_space<vmem>>, %arg6: memref<1x1x32xf32, #tpu.memory_space<vmem>>, %arg7: memref<128x32xf32, #tpu.memory_space<vmem>>) attributes {dimension_semantics = [#tpu.dimension_semantics<parallel>, #tpu.dimension_semantics<arbitrary>], iteration_bounds = array<i64: 1, 1>, scalar_prefetch = 0 : i64, scratch_operands = 1 : i64, tpu.core_type = #tpu.core_type<tc>, window_params = [{transform_indices = @transform_0, window_bounds = array<i64: 128, 512>}, {transform_indices = @transform_1, window_bounds = array<i64: 512, 32>}, {transform_indices = @transform_2, window_bounds = array<i64: 128, 32>}, {transform_indices = @transform_3, window_bounds = array<i64: 1, 1, 32>}, {transform_indices = @transform_4, window_bounds = array<i64: 1, 1, 32>}]} {
    %c0_i32 = arith.constant 0 : i32
    %0 = arith.cmpi eq, %arg1, %c0_i32 : i32
    %1 = arith.extui %0 : i1 to i32
    %c0_i32_0 = arith.constant 0 : i32
    %2 = arith.cmpi ne, %1, %c0_i32_0 : i32
    scf.if %2 {
      %cst_10 = arith.constant 0.000000e+00 : f32
      %12 = vector.broadcast %cst_10 : f32 to vector<128x32xf32>
      %c0_11 = arith.constant 0 : index
      %c0_12 = arith.constant 0 : index
      %13 = vector.load %arg7[%c0_11, %c0_12] : memref<128x32xf32, #tpu.memory_space<vmem>>, vector<128x32xf32>
      tpu.vector_store %arg7[%c0_11, %c0_12], %12 {strides = array<i32>} : memref<128x32xf32, #tpu.memory_space<vmem>>, vector<128x32xf32>,
    } else {
    }
    %c0 = arith.constant 0 : index
    %c0_1 = arith.constant 0 : index
    %3 = vector.load %arg7[%c0, %c0_1] : memref<128x32xf32, #tpu.memory_space<vmem>>, vector<128x32xf32>
    %c0_2 = arith.constant 0 : index
    %c0_3 = arith.constant 0 : index
    %4 = vector.load %arg2[%c0_2, %c0_3] : memref<128x512xbf16, #tpu.memory_space<vmem>>, vector<128x512xbf16>
    %c0_4 = arith.constant 0 : index
    %c0_5 = arith.constant 0 : index
    %5 = vector.load %arg3[%c0_4, %c0_5] : memref<512x32xbf16, #tpu.memory_space<vmem>>, vector<512x32xbf16>
    %cst = arith.constant dense<0.000000e+00> : vector<128x32xf32>
    %6 = tpu.matmul %4, %5, %cst {dimension_numbers = #tpu.dot_dimension_numbers<[1], [0], [0], [1], [0, 0, 1, 1], [], []>} : vector<128x512xbf16>, vector<512x32xbf16>, vector<128x32xf32> -> vector<128x32xf32>
    %7 = arith.addf %3, %6 : vector<128x32xf32>
    %c0_6 = arith.constant 0 : index
    %c0_7 = arith.constant 0 : index
    %8 = vector.load %arg7[%c0_6, %c0_7] : memref<128x32xf32, #tpu.memory_space<vmem>>, vector<128x32xf32>
    tpu.vector_store %arg7[%c0_6, %c0_7], %7 {strides = array<i32>} : memref<128x32xf32, #tpu.memory_space<vmem>>, vector<128x32xf32>,
    %c0_i32_8 = arith.constant 0 : i32
    %9 = arith.cmpi eq, %arg1, %c0_i32_8 : i32
    %10 = arith.extui %9 : i1 to i32
    %c0_i32_9 = arith.constant 0 : i32
    %11 = arith.cmpi ne, %10, %c0_i32_9 : i32
    scf.if %11 {
      %c0_10 = arith.constant 0 : index
      %c0_11 = arith.constant 0 : index
      %12 = vector.load %arg7[%c0_10, %c0_11] : memref<128x32xf32, #tpu.memory_space<vmem>>, vector<128x32xf32>
      %13 = arith.truncf %12 : vector<128x32xf32> to vector<128x32xbf16>
      %c0_12 = arith.constant 0 : index
      %c0_13 = arith.constant 0 : index
      %14 = vector.load %arg4[%c0_12, %c0_13] : memref<128x32xbf16, #tpu.memory_space<vmem>>, vector<128x32xbf16>
      tpu.vector_store %arg4[%c0_12, %c0_13], %13 {strides = array<i32>} : memref<128x32xbf16, #tpu.memory_space<vmem>>, vector<128x32xbf16>,
      %cst_14 = arith.constant dense<0.000000e+00> : vector<32xf32>
      %15 = vector.multi_reduction <add>, %12, %cst_14 [0] : vector<128x32xf32> to vector<32xf32>
      %16 = vector.shape_cast %15 : vector<32xf32> to vector<1x32xf32>
      %17 = vector.shape_cast %16 : vector<1x32xf32> to vector<1x1x32xf32>
      %c0_15 = arith.constant 0 : index
      %c0_16 = arith.constant 0 : index
      %c0_17 = arith.constant 0 : index
      %18 = vector.load %arg5[%c0_15, %c0_16, %c0_17] : memref<1x1x32xf32, #tpu.memory_space<vmem>>, vector<1x1x32xf32>
      tpu.vector_store %arg5[%c0_15, %c0_16, %c0_17], %17 {strides = array<i32>} : memref<1x1x32xf32, #tpu.memory_space<vmem>>, vector<1x1x32xf32>,
      %19 = arith.mulf %12, %12 : vector<128x32xf32>
      %cst_18 = arith.constant dense<0.000000e+00> : vector<32xf32>
      %20 = vector.multi_reduction <add>, %19, %cst_18 [0] : vector<128x32xf32> to vector<32xf32>
      %21 = vector.shape_cast %20 : vector<32xf32> to vector<1x32xf32>
      %22 = vector.shape_cast %21 : vector<1x32xf32> to vector<1x1x32xf32>
      %c0_19 = arith.constant 0 : index
      %c0_20 = arith.constant 0 : index
      %c0_21 = arith.constant 0 : index
      %23 = vector.load %arg6[%c0_19, %c0_20, %c0_21] : memref<1x1x32xf32, #tpu.memory_space<vmem>>, vector<1x1x32xf32>
      tpu.vector_store %arg6[%c0_19, %c0_20, %c0_21], %22 {strides = array<i32>} : memref<1x1x32xf32, #tpu.memory_space<vmem>>, vector<1x1x32xf32>,
    } else {
    }
    return
  }
  func.func @transform_0(%arg0: i32, %arg1: i32) -> (i32, i32) {
    %c0_i32 = arith.constant 0 : i32
    return %arg0, %arg1 : i32, i32
  }
  func.func @transform_1(%arg0: i32, %arg1: i32) -> (i32, i32) {
    %c0_i32 = arith.constant 0 : i32
    %c0_i32_0 = arith.constant 0 : i32
    return %arg1, %c0_i32 : i32, i32
  }
  func.func @transform_2(%arg0: i32, %arg1: i32) -> (i32, i32) {
    %c0_i32 = arith.constant 0 : i32
    %c0_i32_0 = arith.constant 0 : i32
    return %arg0, %c0_i32 : i32, i32
  }
  func.func @transform_3(%arg0: i32, %arg1: i32) -> (i32, i32, i32) {
    %c0_i32 = arith.constant 0 : i32
    %c0_i32_0 = arith.constant 0 : i32
    %c0_i32_1 = arith.constant 0 : i32
    return %arg0, %c0_i32, %c0_i32_0 : i32, i32, i32
  }
  func.func @transform_4(%arg0: i32, %arg1: i32) -> (i32, i32, i32) {
    %c0_i32 = arith.constant 0 : i32
    %c0_i32_0 = arith.constant 0 : i32
    %c0_i32_1 = arith.constant 0 : i32
    return %arg0, %c0_i32, %c0_i32_0 : i32, i32, i32
  }
}

module attributes {stable_mosaic.version = 11 : i64} {
  func.func @_conv_stats_kernel(%arg0: i32, %arg1: i32, %arg2: memref<64x896xbf16, #tpu.memory_space<vmem>>, %arg3: memref<896x64xbf16, #tpu.memory_space<vmem>>, %arg4: memref<64x64xbf16, #tpu.memory_space<vmem>>, %arg5: memref<1x1x64xf32, #tpu.memory_space<vmem>>, %arg6: memref<1x1x64xf32, #tpu.memory_space<vmem>>, %arg7: memref<64x64xf32, #tpu.memory_space<vmem>>) attributes {dimension_semantics = [#tpu.dimension_semantics<parallel>, #tpu.dimension_semantics<arbitrary>], iteration_bounds = array<i64: 1, 1>, scalar_prefetch = 0 : i64, scratch_operands = 1 : i64, tpu.core_type = #tpu.core_type<tc>, window_params = [{transform_indices = @transform_0, window_bounds = array<i64: 64, 896>}, {transform_indices = @transform_1, window_bounds = array<i64: 896, 64>}, {transform_indices = @transform_2, window_bounds = array<i64: 64, 64>}, {transform_indices = @transform_3, window_bounds = array<i64: 1, 1, 64>}, {transform_indices = @transform_4, window_bounds = array<i64: 1, 1, 64>}]} {
    %c0_i32 = arith.constant 0 : i32
    %0 = arith.cmpi eq, %arg1, %c0_i32 : i32
    %1 = arith.extui %0 : i1 to i32
    %c0_i32_0 = arith.constant 0 : i32
    %2 = arith.cmpi ne, %1, %c0_i32_0 : i32
    scf.if %2 {
      %cst_10 = arith.constant 0.000000e+00 : f32
      %12 = vector.broadcast %cst_10 : f32 to vector<64x64xf32>
      %c0_11 = arith.constant 0 : index
      %c0_12 = arith.constant 0 : index
      %13 = vector.load %arg7[%c0_11, %c0_12] : memref<64x64xf32, #tpu.memory_space<vmem>>, vector<64x64xf32>
      tpu.vector_store %arg7[%c0_11, %c0_12], %12 {strides = array<i32>} : memref<64x64xf32, #tpu.memory_space<vmem>>, vector<64x64xf32>,
    } else {
    }
    %c0 = arith.constant 0 : index
    %c0_1 = arith.constant 0 : index
    %3 = vector.load %arg7[%c0, %c0_1] : memref<64x64xf32, #tpu.memory_space<vmem>>, vector<64x64xf32>
    %c0_2 = arith.constant 0 : index
    %c0_3 = arith.constant 0 : index
    %4 = vector.load %arg2[%c0_2, %c0_3] : memref<64x896xbf16, #tpu.memory_space<vmem>>, vector<64x896xbf16>
    %c0_4 = arith.constant 0 : index
    %c0_5 = arith.constant 0 : index
    %5 = vector.load %arg3[%c0_4, %c0_5] : memref<896x64xbf16, #tpu.memory_space<vmem>>, vector<896x64xbf16>
    %cst = arith.constant dense<0.000000e+00> : vector<64x64xf32>
    %6 = tpu.matmul %4, %5, %cst {dimension_numbers = #tpu.dot_dimension_numbers<[1], [0], [0], [1], [0, 0, 1, 1], [], []>} : vector<64x896xbf16>, vector<896x64xbf16>, vector<64x64xf32> -> vector<64x64xf32>
    %7 = arith.addf %3, %6 : vector<64x64xf32>
    %c0_6 = arith.constant 0 : index
    %c0_7 = arith.constant 0 : index
    %8 = vector.load %arg7[%c0_6, %c0_7] : memref<64x64xf32, #tpu.memory_space<vmem>>, vector<64x64xf32>
    tpu.vector_store %arg7[%c0_6, %c0_7], %7 {strides = array<i32>} : memref<64x64xf32, #tpu.memory_space<vmem>>, vector<64x64xf32>,
    %c0_i32_8 = arith.constant 0 : i32
    %9 = arith.cmpi eq, %arg1, %c0_i32_8 : i32
    %10 = arith.extui %9 : i1 to i32
    %c0_i32_9 = arith.constant 0 : i32
    %11 = arith.cmpi ne, %10, %c0_i32_9 : i32
    scf.if %11 {
      %c0_10 = arith.constant 0 : index
      %c0_11 = arith.constant 0 : index
      %12 = vector.load %arg7[%c0_10, %c0_11] : memref<64x64xf32, #tpu.memory_space<vmem>>, vector<64x64xf32>
      %13 = arith.truncf %12 : vector<64x64xf32> to vector<64x64xbf16>
      %c0_12 = arith.constant 0 : index
      %c0_13 = arith.constant 0 : index
      %14 = vector.load %arg4[%c0_12, %c0_13] : memref<64x64xbf16, #tpu.memory_space<vmem>>, vector<64x64xbf16>
      tpu.vector_store %arg4[%c0_12, %c0_13], %13 {strides = array<i32>} : memref<64x64xbf16, #tpu.memory_space<vmem>>, vector<64x64xbf16>,
      %cst_14 = arith.constant dense<0.000000e+00> : vector<64xf32>
      %15 = vector.multi_reduction <add>, %12, %cst_14 [0] : vector<64x64xf32> to vector<64xf32>
      %16 = vector.shape_cast %15 : vector<64xf32> to vector<1x64xf32>
      %17 = vector.shape_cast %16 : vector<1x64xf32> to vector<1x1x64xf32>
      %c0_15 = arith.constant 0 : index
      %c0_16 = arith.constant 0 : index
      %c0_17 = arith.constant 0 : index
      %18 = vector.load %arg5[%c0_15, %c0_16, %c0_17] : memref<1x1x64xf32, #tpu.memory_space<vmem>>, vector<1x1x64xf32>
      tpu.vector_store %arg5[%c0_15, %c0_16, %c0_17], %17 {strides = array<i32>} : memref<1x1x64xf32, #tpu.memory_space<vmem>>, vector<1x1x64xf32>,
      %19 = arith.mulf %12, %12 : vector<64x64xf32>
      %cst_18 = arith.constant dense<0.000000e+00> : vector<64xf32>
      %20 = vector.multi_reduction <add>, %19, %cst_18 [0] : vector<64x64xf32> to vector<64xf32>
      %21 = vector.shape_cast %20 : vector<64xf32> to vector<1x64xf32>
      %22 = vector.shape_cast %21 : vector<1x64xf32> to vector<1x1x64xf32>
      %c0_19 = arith.constant 0 : index
      %c0_20 = arith.constant 0 : index
      %c0_21 = arith.constant 0 : index
      %23 = vector.load %arg6[%c0_19, %c0_20, %c0_21] : memref<1x1x64xf32, #tpu.memory_space<vmem>>, vector<1x1x64xf32>
      tpu.vector_store %arg6[%c0_19, %c0_20, %c0_21], %22 {strides = array<i32>} : memref<1x1x64xf32, #tpu.memory_space<vmem>>, vector<1x1x64xf32>,
    } else {
    }
    return
  }
  func.func @transform_0(%arg0: i32, %arg1: i32) -> (i32, i32) {
    %c0_i32 = arith.constant 0 : i32
    return %arg0, %arg1 : i32, i32
  }
  func.func @transform_1(%arg0: i32, %arg1: i32) -> (i32, i32) {
    %c0_i32 = arith.constant 0 : i32
    %c0_i32_0 = arith.constant 0 : i32
    return %arg1, %c0_i32 : i32, i32
  }
  func.func @transform_2(%arg0: i32, %arg1: i32) -> (i32, i32) {
    %c0_i32 = arith.constant 0 : i32
    %c0_i32_0 = arith.constant 0 : i32
    return %arg0, %c0_i32 : i32, i32
  }
  func.func @transform_3(%arg0: i32, %arg1: i32) -> (i32, i32, i32) {
    %c0_i32 = arith.constant 0 : i32
    %c0_i32_0 = arith.constant 0 : i32
    %c0_i32_1 = arith.constant 0 : i32
    return %arg0, %c0_i32, %c0_i32_0 : i32, i32, i32
  }
  func.func @transform_4(%arg0: i32, %arg1: i32) -> (i32, i32, i32) {
    %c0_i32 = arith.constant 0 : i32
    %c0_i32_0 = arith.constant 0 : i32
    %c0_i32_1 = arith.constant 0 : i32
    return %arg0, %c0_i32, %c0_i32_0 : i32, i32, i32
  }
}

module attributes {stable_mosaic.version = 11 : i64} {
  func.func @_conv_act_kernel(%arg0: i32, %arg1: i32, %arg2: memref<64x1792xbf16, #tpu.memory_space<vmem>>, %arg3: memref<1792x128xbf16, #tpu.memory_space<vmem>>, %arg4: memref<1x128xf32, #tpu.memory_space<vmem>>, %arg5: memref<64x128xf32, #tpu.memory_space<vmem>>, %arg6: memref<64x128xf32, #tpu.memory_space<vmem>>) attributes {dimension_semantics = [#tpu.dimension_semantics<parallel>, #tpu.dimension_semantics<arbitrary>], iteration_bounds = array<i64: 1, 1>, scalar_prefetch = 0 : i64, scratch_operands = 1 : i64, tpu.core_type = #tpu.core_type<tc>, window_params = [{transform_indices = @transform_0, window_bounds = array<i64: 64, 1792>}, {transform_indices = @transform_1, window_bounds = array<i64: 1792, 128>}, {pipeline_mode = #tpu.pipeline_mode<synchronous>, transform_indices = @transform_2, window_bounds = array<i64: 1, 128>}, {transform_indices = @transform_3, window_bounds = array<i64: 64, 128>}]} {
    %c0_i32 = arith.constant 0 : i32
    %0 = arith.cmpi eq, %arg1, %c0_i32 : i32
    %1 = arith.extui %0 : i1 to i32
    %c0_i32_0 = arith.constant 0 : i32
    %2 = arith.cmpi ne, %1, %c0_i32_0 : i32
    scf.if %2 {
      %cst_10 = arith.constant 0.000000e+00 : f32
      %12 = vector.broadcast %cst_10 : f32 to vector<64x128xf32>
      %c0_11 = arith.constant 0 : index
      %c0_12 = arith.constant 0 : index
      %13 = vector.load %arg6[%c0_11, %c0_12] : memref<64x128xf32, #tpu.memory_space<vmem>>, vector<64x128xf32>
      tpu.vector_store %arg6[%c0_11, %c0_12], %12 {strides = array<i32>} : memref<64x128xf32, #tpu.memory_space<vmem>>, vector<64x128xf32>,
    } else {
    }
    %c0 = arith.constant 0 : index
    %c0_1 = arith.constant 0 : index
    %3 = vector.load %arg6[%c0, %c0_1] : memref<64x128xf32, #tpu.memory_space<vmem>>, vector<64x128xf32>
    %c0_2 = arith.constant 0 : index
    %c0_3 = arith.constant 0 : index
    %4 = vector.load %arg2[%c0_2, %c0_3] : memref<64x1792xbf16, #tpu.memory_space<vmem>>, vector<64x1792xbf16>
    %c0_4 = arith.constant 0 : index
    %c0_5 = arith.constant 0 : index
    %5 = vector.load %arg3[%c0_4, %c0_5] : memref<1792x128xbf16, #tpu.memory_space<vmem>>, vector<1792x128xbf16>
    %cst = arith.constant dense<0.000000e+00> : vector<64x128xf32>
    %6 = tpu.matmul %4, %5, %cst {dimension_numbers = #tpu.dot_dimension_numbers<[1], [0], [0], [1], [0, 0, 1, 1], [], []>} : vector<64x1792xbf16>, vector<1792x128xbf16>, vector<64x128xf32> -> vector<64x128xf32>
    %7 = arith.addf %3, %6 : vector<64x128xf32>
    %c0_6 = arith.constant 0 : index
    %c0_7 = arith.constant 0 : index
    %8 = vector.load %arg6[%c0_6, %c0_7] : memref<64x128xf32, #tpu.memory_space<vmem>>, vector<64x128xf32>
    tpu.vector_store %arg6[%c0_6, %c0_7], %7 {strides = array<i32>} : memref<64x128xf32, #tpu.memory_space<vmem>>, vector<64x128xf32>,
    %c0_i32_8 = arith.constant 0 : i32
    %9 = arith.cmpi eq, %arg1, %c0_i32_8 : i32
    %10 = arith.extui %9 : i1 to i32
    %c0_i32_9 = arith.constant 0 : i32
    %11 = arith.cmpi ne, %10, %c0_i32_9 : i32
    scf.if %11 {
      %c0_10 = arith.constant 0 : index
      %c0_11 = arith.constant 0 : index
      %12 = vector.load %arg6[%c0_10, %c0_11] : memref<64x128xf32, #tpu.memory_space<vmem>>, vector<64x128xf32>
      %c0_12 = arith.constant 0 : index
      %c0_13 = arith.constant 0 : index
      %13 = vector.load %arg4[%c0_12, %c0_13] : memref<1x128xf32, #tpu.memory_space<vmem>>, vector<1x128xf32>
      %14 = vector.broadcast %13 : vector<1x128xf32> to vector<64x128xf32>
      %15 = arith.addf %12, %14 : vector<64x128xf32>
      %cst_14 = arith.constant 0.000000e+00 : f32
      %16 = vector.broadcast %cst_14 : f32 to vector<64x128xf32>
      %17 = arith.subf %16, %15 : vector<64x128xf32>
      %18 = math.exp %17 : vector<64x128xf32>
      %cst_15 = arith.constant 1.000000e+00 : f32
      %19 = vector.broadcast %cst_15 : f32 to vector<64x128xf32>
      %20 = arith.addf %19, %18 : vector<64x128xf32>
      %21 = tpu.reciprocal %20 {approx = true} : vector<64x128xf32> -> vector<64x128xf32>
      %c0_16 = arith.constant 0 : index
      %c0_17 = arith.constant 0 : index
      %22 = vector.load %arg5[%c0_16, %c0_17] : memref<64x128xf32, #tpu.memory_space<vmem>>, vector<64x128xf32>
      tpu.vector_store %arg5[%c0_16, %c0_17], %21 {strides = array<i32>} : memref<64x128xf32, #tpu.memory_space<vmem>>, vector<64x128xf32>,
    } else {
    }
    return
  }
  func.func @transform_0(%arg0: i32, %arg1: i32) -> (i32, i32) {
    %c0_i32 = arith.constant 0 : i32
    return %arg0, %arg1 : i32, i32
  }
  func.func @transform_1(%arg0: i32, %arg1: i32) -> (i32, i32) {
    %c0_i32 = arith.constant 0 : i32
    %c0_i32_0 = arith.constant 0 : i32
    return %arg1, %c0_i32 : i32, i32
  }
  func.func @transform_2(%arg0: i32, %arg1: i32) -> (i32, i32) {
    %c0_i32 = arith.constant 0 : i32
    %c0_i32_0 = arith.constant 0 : i32
    %c0_i32_1 = arith.constant 0 : i32
    return %c0_i32, %c0_i32_0 : i32, i32
  }
  func.func @transform_3(%arg0: i32, %arg1: i32) -> (i32, i32) {
    %c0_i32 = arith.constant 0 : i32
    %c0_i32_0 = arith.constant 0 : i32
    return %arg0, %c0_i32 : i32, i32
  }
}

</mosaic_0001>

<bundles_post_ra>
// kernel: turbnetd_forward.5
= control target key start
LH: loop header
LB: loop body
LE: loop exit
PB: predicated region body
PF: predicated region fallthrough
CT: control target
= control target key end

     0   :  { %s2253_s12 = smov 0   ;;  %s2255_s13 = smov 0   ;;  %s2868_s0 = inlined_call_operand.vmem [shape: bf16[1536,128], index: 0, kind: input, shape index: {}]   ;;  %s2869_s1 = inlined_call_operand.vmem [shape: bf16[128,8], index: 1, kind: input, shape index: {}]   ;;  %s2870_s2 = inlined_call_operand.vmem [shape: f32[1,8], index: 2, kind: input, shape index: {}]   ;;  %s2871_s3 = inlined_call_operand.vmem [shape: bf16[1536,8], index: 3, kind: output, shape index: {}]  }
   0x1   :  { %s2257_s14 = smov 0  }
   0x2 LB: > { %s25_s15 = sadd.s32 1, %s2226_s13  ;;  %p1830_p0 = scmp.ge.s32.totalorder %s2230_s14, 1  ;;  %s2230_s14 = sphi %s2257_s14, %s13_s14   ;;  %s2226_s13 = sphi %s2255_s13, %s2873_s13   ;;  %s2222_s12 = sphi %s2253_s12, %s2872_s12  }
   0x3   : > { %p27_p1 = scmp.ge.s32.totalorder %s25_s15, 3  ;;  %p166_p2 = scmp.lt.s32.totalorder %s2230_s14, 4 }
   0x5   : > { %s2875_s15 = smov (%p27_p1, %s25_s15), 0  ;;  %p167_p3 = pnand %p1830_p0, %p166_p2 }
   0x6   : > { %s1831_s18 = sshll.u32 (!%p167_p3), %s2222_s12, 6 }
   0x7   : > { %170 = sbr.rel (%p167_p3) target bundleno = 354 (0x162), region = 32  ;;  %p199_p4 = scmp.lt.s32.totalorder (!%p167_p3), %s1831_s18, 191 }
   0xc   : > { %v2167_v0 = vld [vmem:[%s2869_s1 + $0x38] sm:$0xff]   ;;  %v2277_v1 = vld [vmem:[%s2869_s1 + $0x30] sm:$0xff]   ;;  %vm224_vm0 = vcmask 64512   ;;  %s2877_s18 = smov (!%p199_p4, %s1831_s18), 191  ;;  %v2286_v2 = vld [vmem:[%s2869_s1 + $0x28] sm:$0xff]   ;;  %v2232_v3 = vmov 0.0  }
   0xd   : > { %2046 = vmatprep.subr.bf16.mxu0 %v2167_v0  ;;  %2126 = vmatprep.subr.bf16.mxu1 %v2167_v0  ;;  %s1832_s23 = sshll.u32 %s2877_s18, 2  ;;  %227 = vst.msk [vmem:[#allocation2 + $0x10] sm:$0xff] %vm224_vm0, %v2232_v3  ;;  %225 = vst.msk [vmem:[#allocation2] sm:$0xff] %vm224_vm0, %v2232_v3  ;;  %v2170_v4 = vld [vmem:[%s2869_s1 + $0x20] sm:$0xff]   ;;  %v2171_v7 = vld [vmem:[%s2869_s1 + $0x18] sm:$0xff]   ;;  %vm1677_vm1 = vcmask 60416  }
   0xe   : > { %2047 = vmatpush3.bf16.msra.mxu0 %v2167_v0  ;;  %2134 = vmatpush3.bf16.msra.mxu1 %v2167_v0  ;;  %226 = vst.msk [vmem:[#allocation2 + $0x8] sm:$0xff] %vm224_vm0, %v2232_v3  ;;  %228 = vst.msk [vmem:[#allocation2 + $0x18] sm:$0xff] %vm224_vm0, %v2232_v3  ;;  %s2422_s26 = scalar_lea.vmem %s2868_s0, %s1832_s23  ;;  %v2172_v8 = vld [vmem:[%s2869_s1 + $0x10] sm:$0xff]   ;;  %v2173_v9 = vld [vmem:[%s2869_s1 + $0x8] sm:$0xff]   ;;  %s2503_s17 = scalar_lea.vmem %s2871_s3, %s1832_s23 }
   0xf   : > { %2048 = vmatprep.subr.bf16.mxu0 %v2277_v1  ;;  %2127 = vmatprep.subr.bf16.mxu1 %v2277_v1  ;;  %229 = vst.msk [vmem:[#allocation2 + $0x20] sm:$0xff] %vm224_vm0, %v2232_v3  ;;  %230 = vst.msk [vmem:[#allocation2 + $0x28] sm:$0xff] %vm224_vm0, %v2232_v3  ;;  %v2175_v5 = vld [vmem:[%s2422_s26] sm:$0xff]   ;;  %v2177_v11 = vld [vmem:[%s2422_s26 + $0x8] sm:$0xff]  }
  0x10   : > { %231 = vst.msk [vmem:[#allocation2 + $0x30] sm:$0xff] %vm224_vm0, %v2232_v3  ;;  %232 = vst.msk [vmem:[#allocation2 + $0x38] sm:$0xff] %vm224_vm0, %v2232_v3  ;;  %v2176_v6 = vld [vmem:[%s2422_s26 + $0x80] sm:$0xff]   ;;  %2062 = vmatprep.mubr.bf16.mxu0 %v2175_v5  ;;  %v2178_v12 = vld [vmem:[%s2422_s26 + $0x88] sm:$0xff]  }
  0x11   : > { %233 = vst.msk [vmem:[#allocation2 + $0x40] sm:$0xff] %vm224_vm0, %v2232_v3  ;;  %234 = vst.msk [vmem:[#allocation2 + $0x48] sm:$0xff] %vm224_vm0, %v2232_v3  ;;  %2094 = vmatprep.mubr.bf16.mxu1 %v2176_v6  ;;  %v2174_v10 = vld [vmem:[%s2869_s1] sm:$0xff]   ;;  %v2179_v13 = vld [vmem:[%s2422_s26 + $0x10] sm:$0xff]  }
  0x12   : > { %235 = vst.msk [vmem:[#allocation2 + $0x50] sm:$0xff] %vm224_vm0, %v2232_v3  ;;  %236 = vst.msk [vmem:[#allocation2 + $0x58] sm:$0xff] %vm224_vm0, %v2232_v3  ;;  %2049 = vmatpush3.bf16.msra.mxu0 %v2277_v1  ;;  %2135 = vmatpush3.bf16.msra.mxu1 %v2277_v1  ;;  %v2180_v14 = vld [vmem:[%s2422_s26 + $0x90] sm:$0xff]   ;;  %v2181_v15 = vld [vmem:[%s2422_s26 + $0x18] sm:$0xff]  }
  0x13   : > { %237 = vst.msk [vmem:[#allocation2 + $0x60] sm:$0xff] %vm224_vm0, %v2232_v3  ;;  %238 = vst.msk [vmem:[#allocation2 + $0x68] sm:$0xff] %vm224_vm0, %v2232_v3  ;;  %2050 = vmatprep.subr.bf16.mxu0 %v2286_v2  ;;  %2128 = vmatprep.subr.bf16.mxu1 %v2286_v2  ;;  %v2182_v16 = vld [vmem:[%s2422_s26 + $0x98] sm:$0xff]   ;;  %v2183_v17 = vld [vmem:[%s2422_s26 + $0x20] sm:$0xff]  }
  0x14   : > { %239 = vst.msk [vmem:[#allocation2 + $0x70] sm:$0xff] %vm224_vm0, %v2232_v3  ;;  %240 = vst.msk [vmem:[#allocation2 + $0x78] sm:$0xff] %vm224_vm0, %v2232_v3  ;;  %v2184_v18 = vld [vmem:[%s2422_s26 + $0xa0] sm:$0xff]   ;;  %v2185_v19 = vld [vmem:[%s2422_s26 + $0x28] sm:$0xff]  }
  0x15   : > { %241 = vst.msk [vmem:[#allocation2 + $0x80] sm:$0xff] %vm224_vm0, %v2232_v3  ;;  %242 = vst.msk [vmem:[#allocation2 + $0x88] sm:$0xff] %vm224_vm0, %v2232_v3  ;;  %v2186_v20 = vld [vmem:[%s2422_s26 + $0xa8] sm:$0xff]   ;;  %v2187_v21 = vld [vmem:[%s2422_s26 + $0x30] sm:$0xff]  }
  0x16   : > { %243 = vst.msk [vmem:[#allocation2 + $0x90] sm:$0xff] %vm224_vm0, %v2232_v3  ;;  %244 = vst.msk [vmem:[#allocation2 + $0x98] sm:$0xff] %vm224_vm0, %v2232_v3  ;;  %2051 = vmatpush3.bf16.msra.mxu0 %v2286_v2  ;;  %2136 = vmatpush3.bf16.msra.mxu1 %v2286_v2  ;;  %v2188_v22 = vld [vmem:[%s2422_s26 + $0xb0] sm:$0xff]   ;;  %v2189_v23 = vld [vmem:[%s2422_s26 + $0x38] sm:$0xff]  }
  0x17   : > { %245 = vst.msk [vmem:[#allocation2 + $0xa0] sm:$0xff] %vm224_vm0, %v2232_v3  ;;  %246 = vst.msk [vmem:[#allocation2 + $0xa8] sm:$0xff] %vm224_vm0, %v2232_v3  ;;  %2052 = vmatprep.subr.bf16.mxu0 %v2170_v4  ;;  %2129 = vmatprep.subr.bf16.mxu1 %v2170_v4  ;;  %v2190_v24 = vld [vmem:[%s2422_s26 + $0xb8] sm:$0xff]   ;;  %v2191_v25 = vld [vmem:[%s2422_s26 + $0x40] sm:$0xff]  }
  0x18   : > { %247 = vst.msk [vmem:[#allocation2 + $0xb0] sm:$0xff] %vm224_vm0, %v2232_v3  ;;  %248 = vst.msk [vmem:[#allocation2 + $0xb8] sm:$0xff] %vm224_vm0, %v2232_v3  ;;  %v2192_v26 = vld [vmem:[%s2422_s26 + $0xc0] sm:$0xff]   ;;  %v2193_v27 = vld [vmem:[%s2422_s26 + $0x48] sm:$0xff]  }
  0x19   : > { %249 = vst.msk [vmem:[#allocation2 + $0xc0] sm:$0xff] %vm224_vm0, %v2232_v3  ;;  %250 = vst.msk [vmem:[#allocation2 + $0xc8] sm:$0xff] %vm224_vm0, %v2232_v3  ;;  %v2194_v28 = vld [vmem:[%s2422_s26 + $0xc8] sm:$0xff]   ;;  %v2195_v29 = vld [vmem:[%s2422_s26 + $0x50] sm:$0xff]  }
  0x1a   : > { %251 = vst.msk [vmem:[#allocation2 + $0xd0] sm:$0xff] %vm224_vm0, %v2232_v3  ;;  %252 = vst.msk [vmem:[#allocation2 + $0xd8] sm:$0xff] %vm224_vm0, %v2232_v3  ;;  %2053 = vmatpush3.bf16.msra.mxu0 %v2170_v4  ;;  %2137 = vmatpush3.bf16.msra.mxu1 %v2170_v4  ;;  %v2196_v30 = vld [vmem:[%s2422_s26 + $0xd0] sm:$0xff]   ;;  %v2197_v31 = vld [vmem:[%s2422_s26 + $0x58] sm:$0xff]  }
  0x1b   : > { %253 = vst.msk [vmem:[#allocation2 + $0xe0] sm:$0xff] %vm224_vm0, %v2232_v3  ;;  %254 = vst.msk [vmem:[#allocation2 + $0xe8] sm:$0xff] %vm224_vm0, %v2232_v3  ;;  %2054 = vmatprep.subr.bf16.mxu0 %v2171_v7  ;;  %2130 = vmatprep.subr.bf16.mxu1 %v2171_v7  ;;  %v2198_v32 = vld [vmem:[%s2422_s26 + $0xd8] sm:$0xff]   ;;  %v2199_v33 = vld [vmem:[%s2422_s26 + $0x60] sm:$0xff]  }
  0x1c   : > { %255 = vst.msk [vmem:[#allocation2 + $0xf0] sm:$0xff] %vm224_vm0, %v2232_v3  ;;  %256 = vst.msk [vmem:[#allocation2 + $0xf8] sm:$0xff] %vm224_vm0, %v2232_v3  ;;  %v2200_v34 = vld [vmem:[%s2422_s26 + $0xe0] sm:$0xff]   ;;  %v2201_v35 = vld [vmem:[%s2422_s26 + $0x68] sm:$0xff]  }
  0x1d   : > { %257 = vst.msk [vmem:[#allocation2 + $0x100] sm:$0xff] %vm224_vm0, %v2232_v3  ;;  %258 = vst.msk [vmem:[#allocation2 + $0x108] sm:$0xff] %vm224_vm0, %v2232_v3  ;;  %v2202_v36 = vld [vmem:[%s2422_s26 + $0xe8] sm:$0xff]   ;;  %v2203_v37 = vld [vmem:[%s2422_s26 + $0x70] sm:$0xff]  }
  0x1e   : > { %259 = vst.msk [vmem:[#allocation2 + $0x110] sm:$0xff] %vm224_vm0, %v2232_v3  ;;  %260 = vst.msk [vmem:[#allocation2 + $0x118] sm:$0xff] %vm224_vm0, %v2232_v3  ;;  %2055 = vmatpush3.bf16.msra.mxu0 %v2171_v7  ;;  %2138 = vmatpush3.bf16.msra.mxu1 %v2171_v7  ;;  %v2204_v38 = vld [vmem:[%s2422_s26 + $0xf0] sm:$0xff]   ;;  %v2205_v39 = vld [vmem:[%s2422_s26 + $0x78] sm:$0xff]  }
  0x1f   : > { %261 = vst.msk [vmem:[#allocation2 + $0x120] sm:$0xff] %vm224_vm0, %v2232_v3  ;;  %262 = vst.msk [vmem:[#allocation2 + $0x128] sm:$0xff] %vm224_vm0, %v2232_v3  ;;  %2056 = vmatprep.subr.bf16.mxu0 %v2172_v8  ;;  %2131 = vmatprep.subr.bf16.mxu1 %v2172_v8  ;;  %v2206_v40 = vld [vmem:[%s2422_s26 + $0xf8] sm:$0xff]   ;;  %v291_v41 = vld [vmem:[#allocation2 + $0x10] sm:$0xff] }
  0x20   : > { %263 = vst.msk [vmem:[#allocation2 + $0x130] sm:$0xff] %vm224_vm0, %v2232_v3  ;;  %264 = vst.msk [vmem:[#allocation2 + $0x138] sm:$0xff] %vm224_vm0, %v2232_v3  ;;  %v289_v45 = vld [vmem:[#allocation2] sm:$0xff]  ;;  %v292_v51 = vld [vmem:[#allocation2 + $0x18] sm:$0xff] }
  0x21   : > { %265 = vst.msk [vmem:[#allocation2 + $0x140] sm:$0xff] %vm224_vm0, %v2232_v3  ;;  %266 = vst.msk [vmem:[#allocation2 + $0x148] sm:$0xff] %vm224_vm0, %v2232_v3  ;;  %v290_v57 = vld [vmem:[#allocation2 + $0x8] sm:$0xff]  ;;  %v295_v63 = vld [vmem:[#allocation2 + $0x30] sm:$0xff] }
  0x22   : > { %267 = vst.msk [vmem:[#allocation2 + $0x150] sm:$0xff] %vm224_vm0, %v2232_v3  ;;  %268 = vst.msk [vmem:[#allocation2 + $0x158] sm:$0xff] %vm224_vm0, %v2232_v3  ;;  %2057 = vmatpush3.bf16.msra.mxu0 %v2172_v8  ;;  %2139 = vmatpush3.bf16.msra.mxu1 %v2172_v8  ;;  %v293_v6 = vld [vmem:[#allocation2 + $0x20] sm:$0xff] }
  0x23   : > { %269 = vst.msk [vmem:[#allocation2 + $0x160] sm:$0xff] %vm224_vm0, %v2232_v3  ;;  %270 = vst.msk [vmem:[#allocation2 + $0x168] sm:$0xff] %vm224_vm0, %v2232_v3  ;;  %2058 = vmatprep.subr.bf16.mxu0 %v2173_v9  ;;  %2132 = vmatprep.subr.bf16.mxu1 %v2173_v9 }
  0x24   : > { %271 = vst.msk [vmem:[#allocation2 + $0x170] sm:$0xff] %vm224_vm0, %v2232_v3  ;;  %272 = vst.msk [vmem:[#allocation2 + $0x178] sm:$0xff] %vm224_vm0, %v2232_v3  ;;  %v321_v46 = vld [vmem:[#allocation2 + $0x100] sm:$0xff]  ;;  %v322_v58 = vld [vmem:[#allocation2 + $0x108] sm:$0xff] }
  0x25   : > { %273 = vst.msk [vmem:[#allocation2 + $0x180] sm:$0xff] %vm224_vm0, %v2232_v3  ;;  %274 = vst.msk [vmem:[#allocation2 + $0x188] sm:$0xff] %vm224_vm0, %v2232_v3  ;;  %v323_v42 = vld [vmem:[#allocation2 + $0x110] sm:$0xff]  ;;  %v324_v52 = vld [vmem:[#allocation2 + $0x118] sm:$0xff] }
  0x26   : > { %275 = vst.msk [vmem:[#allocation2 + $0x190] sm:$0xff] %vm224_vm0, %v2232_v3  ;;  %276 = vst.msk [vmem:[#allocation2 + $0x198] sm:$0xff] %vm224_vm0, %v2232_v3  ;;  %2059 = vmatpush3.bf16.msra.mxu0 %v2173_v9  ;;  %2140 = vmatpush3.bf16.msra.mxu1 %v2173_v9  ;;  %v325_v7 = vld [vmem:[#allocation2 + $0x120] sm:$0xff] }
  0x27   : > { %277 = vst.msk [vmem:[#allocation2 + $0x1a0] sm:$0xff] %vm224_vm0, %v2232_v3  ;;  %278 = vst.msk [vmem:[#allocation2 + $0x1a8] sm:$0xff] %vm224_vm0, %v2232_v3  ;;  %2060 = vmatprep.subr.bf16.mxu0 %v2174_v10  ;;  %2133 = vmatprep.subr.bf16.mxu1 %v2174_v10  ;;  %v327_v0 = vld [vmem:[#allocation2 + $0x130] sm:$0xff] }
  0x28   : > { %279 = vst.msk [vmem:[#allocation2 + $0x1b0] sm:$0xff] %vm224_vm0, %v2232_v3  ;;  %280 = vst.msk [vmem:[#allocation2 + $0x1b8] sm:$0xff] %vm224_vm0, %v2232_v3 }
  0x29   : > { %281 = vst.msk [vmem:[#allocation2 + $0x1c0] sm:$0xff] %vm224_vm0, %v2232_v3  ;;  %282 = vst.msk [vmem:[#allocation2 + $0x1c8] sm:$0xff] %vm224_vm0, %v2232_v3 }
  0x2a   : > { %283 = vst.msk [vmem:[#allocation2 + $0x1d0] sm:$0xff] %vm224_vm0, %v2232_v3  ;;  %284 = vst.msk [vmem:[#allocation2 + $0x1d8] sm:$0xff] %vm224_vm0, %v2232_v3  ;;  %2061 = vmatpush3.bf16.msra.mxu0 %v2174_v10  ;;  %2141 = vmatpush3.bf16.msra.mxu1 %v2174_v10 }
  0x2b   : > { %285 = vst.msk [vmem:[#allocation2 + $0x1e0] sm:$0xff] %vm224_vm0, %v2232_v3  ;;  %286 = vst.msk [vmem:[#allocation2 + $0x1e8] sm:$0xff] %vm224_vm0, %v2232_v3 }
  0x2c   : > { %287 = vst.msk [vmem:[#allocation2 + $0x1f0] sm:$0xff] %vm224_vm0, %v2232_v3  ;;  %288 = vst.msk [vmem:[#allocation2 + $0x1f8] sm:$0xff] %vm224_vm0, %v2232_v3  ;;  %v2486_v3 = vld [vmem:[%s2870_s2] ss:$0 sm:$0xff] }
  0x2d   : > { %2063 = vmatmul.mubr.bf16.vlgmr.msra.gmra.mxu0 %v2177_v11  ;;  %2095 = vmatmul.mubr.bf16.vlgmr.msra.gmra.mxu1 %v2178_v12 }
  0x2e   : > { %2066 = vmatprep.mubr.bf16.mxu0 %v2179_v13  ;;  %2098 = vmatprep.mubr.bf16.mxu1 %v2180_v14 }
  0x35   : > { %2067 = vmatmul.mubr.bf16.gmra.mxu0 %v2181_v15  ;;  %2099 = vmatmul.mubr.bf16.gmra.mxu1 %v2182_v16 }
  0x36   : > { %2070 = vmatprep.mubr.bf16.mxu0 %v2183_v17  ;;  %2102 = vmatprep.mubr.bf16.mxu1 %v2184_v18  ;;  %v296_v18 = vld [vmem:[#allocation2 + $0x38] sm:$0xff] }
  0x3d   : > { %2071 = vmatmul.mubr.bf16.gmra.mxu0 %v2185_v19  ;;  %2103 = vmatmul.mubr.bf16.gmra.mxu1 %v2186_v20  ;;  %v328_v19 = vld [vmem:[#allocation2 + $0x138] sm:$0xff] }
  0x3e   : > { %2074 = vmatprep.mubr.bf16.mxu0 %v2187_v21  ;;  %2106 = vmatprep.mubr.bf16.mxu1 %v2188_v22 }
  0x45   : > { %2075 = vmatmul.mubr.bf16.gmra.mxu0 %v2189_v23  ;;  %2107 = vmatmul.mubr.bf16.gmra.mxu1 %v2190_v24 }
  0x46   : > { %2078 = vmatprep.mubr.bf16.mxu0 %v2191_v25  ;;  %2110 = vmatprep.mubr.bf16.mxu1 %v2192_v26 }
  0x4d   : > { %2079 = vmatmul.mubr.bf16.gmra.mxu0 %v2193_v27  ;;  %2111 = vmatmul.mubr.bf16.gmra.mxu1 %v2194_v28 }
  0x4e   : > { %2082 = vmatprep.mubr.bf16.mxu0 %v2195_v29  ;;  %2114 = vmatprep.mubr.bf16.mxu1 %v2196_v30 }
  0x55   : > { %2083 = vmatmul.mubr.bf16.gmra.mxu0 %v2197_v31  ;;  %2115 = vmatmul.mubr.bf16.gmra.mxu1 %v2198_v32 }
  0x56   : > { %2086 = vmatprep.mubr.bf16.mxu0 %v2199_v33  ;;  %2118 = vmatprep.mubr.bf16.mxu1 %v2200_v34 }
  0x5d   : > { %2087 = vmatmul.mubr.bf16.gmra.mxu0 %v2201_v35  ;;  %2119 = vmatmul.mubr.bf16.gmra.mxu1 %v2202_v36 }
  0x5e   : > { %2090 = vmatprep.mubr.bf16.mxu0 %v2203_v37  ;;  %2122 = vmatprep.mubr.bf16.mxu1 %v2204_v38 }
  0x65   : > { %2091 = vmatmul.mubr.bf16.gmra.mxu0 %v2205_v39  ;;  %2123 = vmatmul.mubr.bf16.gmra.mxu1 %v2206_v40 }
  0xed   : > { %v2064_v43 = vpop.f32.mrf.mxu0  ;;  %v2096_v44 = vpop.f32.mrf.mxu1 }
  0xee   : > { %v964_v47 = vadd.f32 %v2064_v43, %v291_v41  ;;  %v996_v48 = vadd.f32 %v2096_v44, %v323_v42 }
  0xef   : > { %v707_v49 = vpop.f32.mrf.mxu0  ;;  %v835_v50 = vpop.f32.mrf.mxu1 }
  0xf0   : > { %1029 = vst.msk [vmem:[#allocation2 + $0x10] sm:$0xff] %vm224_vm0, %v964_v47  ;;  %1061 = vst.msk [vmem:[#allocation2 + $0x110] sm:$0xff] %vm224_vm0, %v996_v48  ;;  %v962_v53 = vadd.f32 %v707_v49, %v289_v45  ;;  %v994_v54 = vadd.f32 %v835_v50, %v321_v46 }
  0xf1   : > { %v2065_v55 = vpop.f32.mrf.mxu0  ;;  %v2097_v56 = vpop.f32.mrf.mxu1 }
  0xf2   : > { %1027 = vst.msk [vmem:[#allocation2] sm:$0xff] %vm224_vm0, %v962_v53  ;;  %1059 = vst.msk [vmem:[#allocation2 + $0x100] sm:$0xff] %vm224_vm0, %v994_v54  ;;  %v965_v59 = vadd.f32 %v2065_v55, %v292_v51  ;;  %v997_v60 = vadd.f32 %v2097_v56, %v324_v52 }
  0xf3   : > { %v710_v61 = vpop.f32.mrf.mxu0  ;;  %v838_v62 = vpop.f32.mrf.mxu1 }
  0xf4   : > { %1030 = vst.msk [vmem:[#allocation2 + $0x18] sm:$0xff] %vm224_vm0, %v965_v59  ;;  %1062 = vst.msk [vmem:[#allocation2 + $0x118] sm:$0xff] %vm224_vm0, %v997_v60  ;;  %v963_v1 = vadd.f32 %v710_v61, %v290_v57  ;;  %v995_v2 = vadd.f32 %v838_v62, %v322_v58  ;;  %v294_v58 = vld [vmem:[#allocation2 + $0x28] sm:$0xff] }
  0xf5   : > { %v2068_v4 = vpop.f32.mrf.mxu0  ;;  %v2100_v5 = vpop.f32.mrf.mxu1 }
  0xf6   : > { %1028 = vst.msk [vmem:[#allocation2 + $0x8] sm:$0xff] %vm224_vm0, %v963_v1  ;;  %1060 = vst.msk [vmem:[#allocation2 + $0x108] sm:$0xff] %vm224_vm0, %v995_v2  ;;  %v968_v8 = vadd.f32 %v2068_v4, %v295_v63  ;;  %v1000_v9 = vadd.f32 %v2100_v5, %v327_v0  ;;  %v326_v0 = vld [vmem:[#allocation2 + $0x128] sm:$0xff] }
  0xf7   : > { %v1096_v10 = vld [vmem:[#allocation2 + $0x10] sm:$0xff]  ;;  %v723_v12 = vpop.f32.mrf.mxu0  ;;  %v851_v13 = vpop.f32.mrf.mxu1 }
  0xf8   : > { %v1128_v11 = vld [vmem:[#allocation2 + $0x110] sm:$0xff]  ;;  %v1167_v14 = vadd.f32 %v2486_v3, %v1096_v10  ;;  %1033 = vst.msk [vmem:[#allocation2 + $0x30] sm:$0xff] %vm224_vm0, %v968_v8  ;;  %1065 = vst.msk [vmem:[#allocation2 + $0x130] sm:$0xff] %vm224_vm0, %v1000_v9  ;;  %v966_v16 = vadd.f32 %v723_v12, %v293_v6  ;;  %v998_v17 = vadd.f32 %v851_v13, %v325_v7 }
  0xf9   : > { %v1199_v15 = vadd.f32 %v2486_v3, %v1128_v11  ;;  %v1094_v20 = vld [vmem:[#allocation2] sm:$0xff]  ;;  %v2069_v22 = vpop.f32.mrf.mxu0  ;;  %v2101_v23 = vpop.f32.mrf.mxu1 }
  0xfa   : > { %v1126_v21 = vld [vmem:[#allocation2 + $0x100] sm:$0xff]  ;;  %vm1231_vm2 = vcmp.ge.f32.partialorder %v1167_v14, 0.0  ;;  %v1295_v24 = vmul.f32 0.2, %v1167_v14  ;;  %1031 = vst.msk [vmem:[#allocation2 + $0x20] sm:$0xff] %vm224_vm0, %v966_v16  ;;  %1063 = vst.msk [vmem:[#allocation2 + $0x120] sm:$0xff] %vm224_vm0, %v998_v17  ;;  %v1165_v26 = vadd.f32 %v2486_v3, %v1094_v20  ;;  %v969_v30 = vadd.f32 %v2069_v22, %v296_v18 }
  0xfb   : > { %vm1263_vm3 = vcmp.ge.f32.partialorder %v1199_v15, 0.0  ;;  %v1327_v25 = vmul.f32 0.2, %v1199_v15  ;;  %v1197_v27 = vadd.f32 %v2486_v3, %v1126_v21  ;;  %v1097_v28 = vld [vmem:[#allocation2 + $0x18] sm:$0xff]  ;;  %v1001_v31 = vadd.f32 %v2101_v23, %v328_v19  ;;  %v726_v32 = vpop.f32.mrf.mxu0  ;;  %v854_v33 = vpop.f32.mrf.mxu1 }
  0xfc   : > { %v1129_v29 = vld [vmem:[#allocation2 + $0x118] sm:$0xff]  ;;  %v1359_v34 = vsel %vm1231_vm2, %v1167_v14, %v1295_v24  ;;  %v1168_v36 = vadd.f32 %v2486_v3, %v1097_v28  ;;  %vm1229_vm4 = vcmp.ge.f32.partialorder %v1165_v26, 0.0  ;;  %v1293_v40 = vmul.f32 0.2, %v1165_v26  ;;  %1034 = vst.msk [vmem:[#allocation2 + $0x38] sm:$0xff] %vm224_vm0, %v969_v30  ;;  %v331_v30 = vld [vmem:[#allocation2 + $0x150] sm:$0xff] }
  0xfd   : > { %v1391_v35 = vsel %vm1263_vm3, %v1199_v15, %v1327_v25  ;;  %v1200_v37 = vadd.f32 %v2486_v3, %v1129_v29  ;;  %v1944_v38 = vpack.c.bf16 %v1359_v34, %v1359_v34  ;;  %v1095_v41 = vld [vmem:[#allocation2 + $0x8] sm:$0xff]  ;;  %1066 = vst.msk [vmem:[#allocation2 + $0x138] sm:$0xff] %vm224_vm0, %v1001_v31  ;;  %v2509_v43 = vpop.f32.mrf.mxu0  ;;  %v2511_v44 = vpop.f32.mrf.mxu1  ;;  %vm1261_vm5 = vcmp.ge.f32.partialorder %v1197_v27, 0.0  ;;  %v299_v29 = vld [vmem:[#allocation2 + $0x50] sm:$0xff] }
  0xfe   : > { %v1976_v39 = vpack.c.bf16 %v1391_v35, %v1391_v35  ;;  %v1127_v42 = vld [vmem:[#allocation2 + $0x108] sm:$0xff]  ;;  %v1325_v45 = vmul.f32 0.2, %v1197_v27  ;;  %vm1232_vm6 = vcmp.ge.f32.partialorder %v1168_v36, 0.0  ;;  %v1296_v46 = vmul.f32 0.2, %v1168_v36 }
  0xff   : > { %1680 = vst.msk [vmem:[%s2503_s17 + $0x8] sm:$0xf] %vm1677_vm1, %v1944_v38  ;;  %v1357_v47 = vsel %vm1229_vm4, %v1165_v26, %v1293_v40  ;;  %vm1264_vm7 = vcmp.ge.f32.partialorder %v1200_v37, 0.0  ;;  %v1328_v48 = vmul.f32 0.2, %v1200_v37  ;;  %v1166_v49 = vadd.f32 %v2486_v3, %v1095_v41  ;;  %v2518_v50 = vpop.f32.mrf.mxu0  ;;  %v2520_v51 = vpop.f32.mrf.mxu1  ;;  %v1100_v56 = vld [vmem:[#allocation2 + $0x30] sm:$0xff] }
 0x100   : > { %1712 = vst.msk [vmem:[%s2503_s17 + $0x88] sm:$0xf] %vm1677_vm1, %v1976_v39  ;;  %v1942_v52 = vpack.c.bf16 %v1357_v47, %v1357_v47  ;;  %v1389_v53 = vsel %vm1261_vm5, %v1197_v27, %v1325_v45  ;;  %v1360_v54 = vsel %vm1232_vm6, %v1168_v36, %v1296_v46  ;;  %v1198_v55 = vadd.f32 %v2486_v3, %v1127_v42  ;;  %v1132_v57 = vld [vmem:[#allocation2 + $0x130] sm:$0xff]  ;;  %v329_v38 = vld [vmem:[#allocation2 + $0x140] sm:$0xff]  ;;  %v300_v39 = vld [vmem:[#allocation2 + $0x58] sm:$0xff] }
 0x101   : > { %v1974_v59 = vpack.c.bf16 %v1389_v53, %v1389_v53  ;;  %v1945_v60 = vpack.c.bf16 %v1360_v54, %v1360_v54  ;;  %v1392_v61 = vsel %vm1264_vm7, %v1200_v37, %v1328_v48  ;;  %vm1230_vm8 = vcmp.ge.f32.partialorder %v1166_v49, 0.0  ;;  %v1098_v62 = vld [vmem:[#allocation2 + $0x20] sm:$0xff]  ;;  %v2523_v1 = vpop.f32.mrf.mxu0  ;;  %v2525_v2 = vpop.f32.mrf.mxu1  ;;  %v332_v45 = vld [vmem:[#allocation2 + $0x158] sm:$0xff]  ;;  %v298_v46 = vld [vmem:[#allocation2 + $0x48] sm:$0xff] }
 0x102   : > { %v1130_v63 = vld [vmem:[#allocation2 + $0x120] sm:$0xff]  ;;  %1678 = vst.msk [vmem:[%s2503_s17] sm:$0xf] %vm1677_vm1, %v1942_v52  ;;  %v1977_v4 = vpack.c.bf16 %v1392_v61, %v1392_v61  ;;  %v1294_v5 = vmul.f32 0.2, %v1166_v49  ;;  %vm1262_vm9 = vcmp.ge.f32.partialorder %v1198_v55, 0.0  ;;  %v1171_v7 = vadd.f32 %v2486_v3, %v1100_v56 }
 0x103   : > { %v1326_v6 = vmul.f32 0.2, %v1198_v55  ;;  %1710 = vst.msk [vmem:[%s2503_s17 + $0x80] sm:$0xf] %vm1677_vm1, %v1974_v59  ;;  %1681 = vst.msk [vmem:[%s2503_s17 + $0xc] sm:$0xf] %vm1677_vm1, %v1945_v60  ;;  %v1203_v8 = vadd.f32 %v2486_v3, %v1132_v57  ;;  %v1169_v9 = vadd.f32 %v2486_v3, %v1098_v62  ;;  %v1201_v10 = vadd.f32 %v2486_v3, %v1130_v63  ;;  %v2537_v11 = vpop.f32.mrf.mxu0  ;;  %v2539_v12 = vpop.f32.mrf.mxu1 }
 0x104   : > { %1713 = vst.msk [vmem:[%s2503_s17 + $0x8c] sm:$0xf] %vm1677_vm1, %v1977_v4  ;;  %v1358_v13 = vsel %vm1230_vm8, %v1166_v49, %v1294_v5  ;;  %v1101_v15 = vld [vmem:[#allocation2 + $0x38] sm:$0xff]  ;;  %v967_v16 = vadd.f32 %v726_v32, %v294_v58  ;;  %v999_v17 = vadd.f32 %v854_v33, %v326_v0  ;;  %vm1235_vm10 = vcmp.ge.f32.partialorder %v1171_v7, 0.0  ;;  %v297_v37 = vld [vmem:[#allocation2 + $0x40] sm:$0xff]  ;;  %v330_v47 = vld [vmem:[#allocation2 + $0x148] sm:$0xff] }
 0x105   : > { %v1390_v14 = vsel %vm1262_vm9, %v1198_v55, %v1326_v6  ;;  %v1943_v18 = vpack.c.bf16 %v1358_v13, %v1358_v13  ;;  %v1299_v20 = vmul.f32 0.2, %v1171_v7  ;;  %v1133_v21 = vld [vmem:[#allocation2 + $0x138] sm:$0xff]  ;;  %v2544_v22 = vpop.f32.mrf.mxu0  ;;  %v2546_v23 = vpop.f32.mrf.mxu1  ;;  %vm1267_vm11 = vcmp.ge.f32.partialorder %v1203_v8, 0.0  ;;  %v303_v55 = vld [vmem:[#allocation2 + $0x70] sm:$0xff]  ;;  %v301_v61 = vld [vmem:[#allocation2 + $0x60] sm:$0xff] }
 0x106   : > { %v1975_v19 = vpack.c.bf16 %v1390_v14, %v1390_v14  ;;  %v1331_v24 = vmul.f32 0.2, %v1203_v8  ;;  %vm1233_vm12 = vcmp.ge.f32.partialorder %v1169_v9, 0.0  ;;  %v1297_v25 = vmul.f32 0.2, %v1169_v9  ;;  %1032 = vst.msk [vmem:[#allocation2 + $0x28] sm:$0xff] %vm224_vm0, %v967_v16 }
 0x107   : > { %1064 = vst.msk [vmem:[#allocation2 + $0x128] sm:$0xff] %vm224_vm0, %v999_v17  ;;  %v1363_v26 = vsel %vm1235_vm10, %v1171_v7, %v1299_v20  ;;  %vm1265_vm13 = vcmp.ge.f32.partialorder %v1201_v10, 0.0  ;;  %v1329_v27 = vmul.f32 0.2, %v1201_v10  ;;  %v1172_v28 = vadd.f32 %v2486_v3, %v1101_v15  ;;  %v2555_v31 = vpop.f32.mrf.mxu0  ;;  %v2557_v32 = vpop.f32.mrf.mxu1  ;;  %v335_v60 = vld [vmem:[#allocation2 + $0x170] sm:$0xff]  ;;  %v333_v62 = vld [vmem:[#allocation2 + $0x160] sm:$0xff] }
 0x108   : > { %1679 = vst.msk [vmem:[%s2503_s17 + $0x4] sm:$0xf] %vm1677_vm1, %v1943_v18  ;;  %1711 = vst.msk [vmem:[%s2503_s17 + $0x84] sm:$0xf] %vm1677_vm1, %v1975_v19  ;;  %v1948_v33 = vpack.c.bf16 %v1363_v26, %v1363_v26  ;;  %v1395_v34 = vsel %vm1267_vm11, %v1203_v8, %v1331_v24  ;;  %v1361_v35 = vsel %vm1233_vm12, %v1169_v9, %v1297_v25  ;;  %v336_v7 = vld [vmem:[#allocation2 + $0x178] sm:$0xff]  ;;  %v334_v13 = vld [vmem:[#allocation2 + $0x168] sm:$0xff] }
 0x109   : > { %v1204_v36 = vadd.f32 %v2486_v3, %v1133_v21  ;;  %v1980_v40 = vpack.c.bf16 %v1395_v34, %v1395_v34  ;;  %v1946_v41 = vpack.c.bf16 %v1361_v35, %v1361_v35  ;;  %v1393_v42 = vsel %vm1265_vm13, %v1201_v10, %v1329_v27  ;;  %v2077_v48 = vpop.f32.mrf.mxu0  ;;  %v2109_v49 = vpop.f32.mrf.mxu1  ;;  %v307_v20 = vld [vmem:[#allocation2 + $0x90] sm:$0xff]  ;;  %v337_v27 = vld [vmem:[#allocation2 + $0x180] sm:$0xff] }
 0x10a   : > { %vm1236_vm14 = vcmp.ge.f32.partialorder %v1172_v28, 0.0  ;;  %1684 = vst.msk [vmem:[%s2503_s17 + $0x18] sm:$0xf] %vm1677_vm1, %v1948_v33  ;;  %v1978_v52 = vpack.c.bf16 %v1393_v42, %v1393_v42  ;;  %v1300_v53 = vmul.f32 0.2, %v1172_v28  ;;  %v972_v56 = vadd.f32 %v2509_v43, %v299_v29  ;;  %v339_v21 = vld [vmem:[#allocation2 + $0x190] sm:$0xff] }
 0x10b   : > { %vm1268_vm15 = vcmp.ge.f32.partialorder %v1204_v36, 0.0  ;;  %v1332_v54 = vmul.f32 0.2, %v1204_v36  ;;  %1716 = vst.msk [vmem:[%s2503_s17 + $0x98] sm:$0xf] %vm1677_vm1, %v1980_v40  ;;  %v1004_v57 = vadd.f32 %v2511_v44, %v331_v30  ;;  %v970_v58 = vadd.f32 %v2518_v50, %v297_v37  ;;  %v758_v63 = vpop.f32.mrf.mxu0  ;;  %v886_v0 = vpop.f32.mrf.mxu1  ;;  %v304_v44 = vld [vmem:[#allocation2 + $0x78] sm:$0xff] }
 0x10c   : > { %1682 = vst.msk [vmem:[%s2503_s17 + $0x10] sm:$0xf] %vm1677_vm1, %v1946_v41  ;;  %v1002_v59 = vadd.f32 %v2520_v51, %v329_v38  ;;  %1714 = vst.msk [vmem:[%s2503_s17 + $0x90] sm:$0xf] %vm1677_vm1, %v1978_v52  ;;  %v1364_v4 = vsel %vm1236_vm14, %v1172_v28, %v1300_v53  ;;  %v973_v6 = vadd.f32 %v2523_v1, %v300_v39  ;;  %v302_v50 = vld [vmem:[#allocation2 + $0x68] sm:$0xff]  ;;  %v308_v28 = vld [vmem:[#allocation2 + $0x98] sm:$0xff] }
 0x10d   : > { %v1396_v5 = vsel %vm1268_vm15, %v1204_v36, %v1332_v54  ;;  %v1005_v43 = vadd.f32 %v2525_v2, %v332_v45  ;;  %v1949_v8 = vpack.c.bf16 %v1364_v4, %v1364_v4  ;;  %v1099_v9 = vld [vmem:[#allocation2 + $0x28] sm:$0xff]  ;;  %1037 = vst.msk [vmem:[#allocation2 + $0x50] sm:$0xff] %vm224_vm0, %v972_v56  ;;  %1069 = vst.msk [vmem:[#allocation2 + $0x150] sm:$0xff] %vm224_vm0, %v1004_v57  ;;  %v2080_v14 = vpop.f32.mrf.mxu0  ;;  %v2112_v15 = vpop.f32.mrf.mxu1  ;;  %v340_v29 = vld [vmem:[#allocation2 + $0x198] sm:$0xff] }
 0x10e   : > { %v1981_v51 = vpack.c.bf16 %v1396_v5, %v1396_v5  ;;  %v1131_v10 = vld [vmem:[#allocation2 + $0x128] sm:$0xff]  ;;  %1035 = vst.msk [vmem:[#allocation2 + $0x40] sm:$0xff] %vm224_vm0, %v970_v58  ;;  %1067 = vst.msk [vmem:[#allocation2 + $0x140] sm:$0xff] %vm224_vm0, %v1002_v59  ;;  %v971_v1 = vadd.f32 %v2537_v11, %v298_v46  ;;  %v1003_v2 = vadd.f32 %v2539_v12, %v330_v47  ;;  %v305_v11 = vld [vmem:[#allocation2 + $0x80] sm:$0xff] }
 0x10f   : > { %v1170_v16 = vadd.f32 %v2486_v3, %v1099_v9  ;;  %v1202_v17 = vadd.f32 %v2486_v3, %v1131_v10  ;;  %1038 = vst.msk [vmem:[#allocation2 + $0x58] sm:$0xff] %vm224_vm0, %v973_v6  ;;  %1070 = vst.msk [vmem:[#allocation2 + $0x158] sm:$0xff] %vm224_vm0, %v1005_v43  ;;  %v976_v18 = vadd.f32 %v2544_v22, %v303_v55  ;;  %v771_v22 = vpop.f32.mrf.mxu0  ;;  %v306_v38 = vld [vmem:[#allocation2 + $0x88] sm:$0xff]  ;;  %v311_v54 = vld [vmem:[#allocation2 + $0xb0] sm:$0xff] }
 0x110   : > { %v1008_v19 = vadd.f32 %v2546_v23, %v335_v60  ;;  %1685 = vst.msk [vmem:[%s2503_s17 + $0x1c] sm:$0xf] %vm1677_vm1, %v1949_v8  ;;  %1717 = vst.msk [vmem:[%s2503_s17 + $0x9c] sm:$0xf] %vm1677_vm1, %v1981_v51  ;;  %v974_v12 = vadd.f32 %v2555_v31, %v301_v61  ;;  %v1006_v24 = vadd.f32 %v2557_v32, %v333_v62  ;;  %v899_v23 = vpop.f32.mrf.mxu1  ;;  %v338_v39 = vld [vmem:[#allocation2 + $0x188] sm:$0xff] }
 0x111   : > { %1036 = vst.msk [vmem:[#allocation2 + $0x48] sm:$0xff] %vm224_vm0, %v971_v1  ;;  %1068 = vst.msk [vmem:[#allocation2 + $0x148] sm:$0xff] %vm224_vm0, %v1003_v2  ;;  %v977_v25 = vadd.f32 %v2077_v48, %v304_v44  ;;  %v1009_v26 = vadd.f32 %v2109_v49, %v336_v7  ;;  %vm1234_vm2 = vcmp.ge.f32.partialorder %v1170_v16, 0.0  ;;  %v1298_v30 = vmul.f32 0.2, %v1170_v16  ;;  %v2081_v36 = vpop.f32.mrf.mxu0 }
 0x112   : > { %vm1266_vm3 = vcmp.ge.f32.partialorder %v1202_v17, 0.0  ;;  %v1330_v33 = vmul.f32 0.2, %v1202_v17  ;;  %1041 = vst.msk [vmem:[#allocation2 + $0x70] sm:$0xff] %vm224_vm0, %v976_v18  ;;  %1073 = vst.msk [vmem:[#allocation2 + $0x170] sm:$0xff] %vm224_vm0, %v1008_v19  ;;  %v975_v31 = vadd.f32 %v758_v63, %v302_v50  ;;  %v1007_v32 = vadd.f32 %v886_v0, %v334_v13  ;;  %v2113_v37 = vpop.f32.mrf.mxu1 }
 0x113   : > { %1039 = vst.msk [vmem:[#allocation2 + $0x60] sm:$0xff] %vm224_vm0, %v974_v12  ;;  %1071 = vst.msk [vmem:[#allocation2 + $0x160] sm:$0xff] %vm224_vm0, %v1006_v24  ;;  %v980_v34 = vadd.f32 %v2080_v14, %v307_v20  ;;  %v1012_v35 = vadd.f32 %v2112_v15, %v339_v21  ;;  %v1362_v40 = vsel %vm1234_vm2, %v1170_v16, %v1298_v30  ;;  %v774_v52 = vpop.f32.mrf.mxu0 }
 0x114   : > { %1042 = vst.msk [vmem:[#allocation2 + $0x78] sm:$0xff] %vm224_vm0, %v977_v25  ;;  %1074 = vst.msk [vmem:[#allocation2 + $0x178] sm:$0xff] %vm224_vm0, %v1009_v26  ;;  %v1394_v41 = vsel %vm1266_vm3, %v1202_v17, %v1330_v33  ;;  %v978_v42 = vadd.f32 %v771_v22, %v305_v11  ;;  %v1010_v45 = vadd.f32 %v899_v23, %v337_v27  ;;  %v902_v53 = vpop.f32.mrf.mxu1  ;;  %v1104_v55 = vld [vmem:[#allocation2 + $0x50] sm:$0xff] }
 0x115   : > { %v1947_v46 = vpack.c.bf16 %v1362_v40, %v1362_v40  ;;  %v1979_v47 = vpack.c.bf16 %v1394_v41, %v1394_v41  ;;  %1040 = vst.msk [vmem:[#allocation2 + $0x68] sm:$0xff] %vm224_vm0, %v975_v31  ;;  %1072 = vst.msk [vmem:[#allocation2 + $0x168] sm:$0xff] %vm224_vm0, %v1007_v32  ;;  %v981_v48 = vadd.f32 %v2081_v36, %v308_v28  ;;  %v1136_v56 = vld [vmem:[#allocation2 + $0x150] sm:$0xff]  ;;  %v1102_v57 = vld [vmem:[#allocation2 + $0x40] sm:$0xff]  ;;  %v2084_v5 = vpop.f32.mrf.mxu0 }
 0x116   : > { %1045 = vst.msk [vmem:[#allocation2 + $0x90] sm:$0xff] %vm224_vm0, %v980_v34  ;;  %1077 = vst.msk [vmem:[#allocation2 + $0x190] sm:$0xff] %vm224_vm0, %v1012_v35  ;;  %v1013_v49 = vadd.f32 %v2113_v37, %v340_v29  ;;  %v979_v58 = vadd.f32 %v774_v52, %v306_v38  ;;  %v1011_v59 = vadd.f32 %v902_v53, %v338_v39  ;;  %v1134_v63 = vld [vmem:[#allocation2 + $0x140] sm:$0xff]  ;;  %v1105_v0 = vld [vmem:[#allocation2 + $0x58] sm:$0xff]  ;;  %v2622_v6 = vpop.f32.mrf.mxu1 }
 0x117   : > { %1043 = vst.msk [vmem:[#allocation2 + $0x80] sm:$0xff] %vm224_vm0, %v978_v42  ;;  %1075 = vst.msk [vmem:[#allocation2 + $0x180] sm:$0xff] %vm224_vm0, %v1010_v45  ;;  %v1175_v60 = vadd.f32 %v2486_v3, %v1104_v55  ;;  %v1207_v61 = vadd.f32 %v2486_v3, %v1136_v56  ;;  %v1173_v62 = vadd.f32 %v2486_v3, %v1102_v57  ;;  %v1137_v4 = vld [vmem:[#allocation2 + $0x158] sm:$0xff]  ;;  %v2629_v9 = vpop.f32.mrf.mxu0 }
 0x118   : > { %1683 = vst.msk [vmem:[%s2503_s17 + $0x14] sm:$0xf] %vm1677_vm1, %v1947_v46  ;;  %1715 = vst.msk [vmem:[%s2503_s17 + $0x94] sm:$0xf] %vm1677_vm1, %v1979_v47  ;;  %v1205_v43 = vadd.f32 %v2486_v3, %v1134_v63  ;;  %v1176_v44 = vadd.f32 %v2486_v3, %v1105_v0  ;;  %v1208_v7 = vadd.f32 %v2486_v3, %v1137_v4  ;;  %v2631_v10 = vpop.f32.mrf.mxu1  ;;  %v1103_v16 = vld [vmem:[#allocation2 + $0x48] sm:$0xff] }
 0x119   : > { %1046 = vst.msk [vmem:[#allocation2 + $0x98] sm:$0xff] %vm224_vm0, %v981_v48  ;;  %1078 = vst.msk [vmem:[#allocation2 + $0x198] sm:$0xff] %vm224_vm0, %v1013_v49  ;;  %v984_v50 = vadd.f32 %v2084_v5, %v311_v54  ;;  %vm1239_vm4 = vcmp.ge.f32.partialorder %v1175_v60, 0.0  ;;  %v1303_v8 = vmul.f32 0.2, %v1175_v60  ;;  %vm1271_vm5 = vcmp.ge.f32.partialorder %v1207_v61, 0.0  ;;  %v2634_v19 = vpop.f32.mrf.mxu0 }
 0x11a   : > { %1044 = vst.msk [vmem:[#allocation2 + $0x88] sm:$0xff] %vm224_vm0, %v979_v58  ;;  %1076 = vst.msk [vmem:[#allocation2 + $0x188] sm:$0xff] %vm224_vm0, %v1011_v59  ;;  %v1335_v51 = vmul.f32 0.2, %v1207_v61  ;;  %vm1237_vm6 = vcmp.ge.f32.partialorder %v1173_v62, 0.0  ;;  %vm1269_vm7 = vcmp.ge.f32.partialorder %v1205_v43, 0.0  ;;  %v2636_v20 = vpop.f32.mrf.mxu1  ;;  %v1174_v32 = vadd.f32 %v2486_v3, %v1103_v16 }
 0x11b   : > { %v1301_v1 = vmul.f32 0.2, %v1173_v62  ;;  %v1333_v2 = vmul.f32 0.2, %v1205_v43  ;;  %1049 = vst.msk [vmem:[#allocation2 + $0xb0] sm:$0xff] %vm224_vm0, %v984_v50  ;;  %v1367_v13 = vsel %vm1239_vm4, %v1175_v60, %v1303_v8  ;;  %vm1240_vm8 = vcmp.ge.f32.partialorder %v1176_v44, 0.0  ;;  %v2640_v29 = vpop.f32.mrf.mxu0 }
 0x11c   : > { %v1399_v14 = vsel %vm1271_vm5, %v1207_v61, %v1335_v51  ;;  %v1304_v15 = vmul.f32 0.2, %v1176_v44  ;;  %v1135_v17 = vld [vmem:[#allocation2 + $0x148] sm:$0xff]  ;;  %v1108_v18 = vld [vmem:[#allocation2 + $0x70] sm:$0xff]  ;;  %v1952_v21 = vpack.c.bf16 %v1367_v13, %v1367_v13  ;;  %v1106_v26 = vld [vmem:[#allocation2 + $0x60] sm:$0xff]  ;;  %vm1272_vm9 = vcmp.ge.f32.partialorder %v1208_v7, 0.0  ;;  %v2642_v30 = vpop.f32.mrf.mxu1 }
 0x11d   : > { %v1984_v11 = vpack.c.bf16 %v1399_v14, %v1399_v14  ;;  %v1365_v12 = vsel %vm1237_vm6, %v1173_v62, %v1301_v1  ;;  %v1397_v24 = vsel %vm1269_vm7, %v1205_v43, %v1333_v2  ;;  %v1140_v25 = vld [vmem:[#allocation2 + $0x170] sm:$0xff]  ;;  %v1138_v22 = vld [vmem:[#allocation2 + $0x160] sm:$0xff]  ;;  %v1336_v31 = vmul.f32 0.2, %v1208_v7  ;;  %v2658_v39 = vpop.f32.mrf.mxu0  ;;  %v1109_v54 = vld [vmem:[#allocation2 + $0x78] sm:$0xff] }
 0x11e   : > { %v1950_v27 = vpack.c.bf16 %v1365_v12, %v1365_v12  ;;  %v1982_v23 = vpack.c.bf16 %v1397_v24, %v1397_v24  ;;  %v1368_v28 = vsel %vm1240_vm8, %v1176_v44, %v1304_v15  ;;  %1688 = vst.msk [vmem:[%s2503_s17 + $0x28] sm:$0xf] %vm1677_vm1, %v1952_v21  ;;  %v1206_v34 = vadd.f32 %v2486_v3, %v1135_v17  ;;  %v2660_v40 = vpop.f32.mrf.mxu1  ;;  %v1141_v59 = vld [vmem:[#allocation2 + $0x178] sm:$0xff]  ;;  %v1107_v60 = vld [vmem:[#allocation2 + $0x68] sm:$0xff]  ;;  %v1112_v4 = vld [vmem:[#allocation2 + $0x90] sm:$0xff] }
 0x11f   : > { %1720 = vst.msk [vmem:[%s2503_s17 + $0xa8] sm:$0xf] %vm1677_vm1, %v1984_v11  ;;  %v1953_v33 = vpack.c.bf16 %v1368_v28, %v1368_v28  ;;  %v1179_v35 = vadd.f32 %v2486_v3, %v1108_v18  ;;  %v1211_v36 = vadd.f32 %v2486_v3, %v1140_v25  ;;  %v1177_v37 = vadd.f32 %v2486_v3, %v1106_v26  ;;  %v2665_v48 = vpop.f32.mrf.mxu0  ;;  %v1139_v61 = vld [vmem:[#allocation2 + $0x168] sm:$0xff]  ;;  %v1144_v21 = vld [vmem:[#allocation2 + $0x190] sm:$0xff]  ;;  %v1110_v25 = vld [vmem:[#allocation2 + $0x80] sm:$0xff] }
 0x120   : > { %1686 = vst.msk [vmem:[%s2503_s17 + $0x20] sm:$0xf] %vm1677_vm1, %v1950_v27  ;;  %1718 = vst.msk [vmem:[%s2503_s17 + $0xa0] sm:$0xf] %vm1677_vm1, %v1982_v23  ;;  %v1209_v38 = vadd.f32 %v2486_v3, %v1138_v22  ;;  %v1400_v41 = vsel %vm1272_vm9, %v1208_v7, %v1336_v31  ;;  %vm1238_vm10 = vcmp.ge.f32.partialorder %v1174_v32, 0.0  ;;  %vm1270_vm11 = vcmp.ge.f32.partialorder %v1206_v34, 0.0  ;;  %v2667_v49 = vpop.f32.mrf.mxu1 }
 0x121   : > { %1689 = vst.msk [vmem:[%s2503_s17 + $0x2c] sm:$0xf] %vm1677_vm1, %v1953_v33  ;;  %v1302_v42 = vmul.f32 0.2, %v1174_v32  ;;  %v1985_v45 = vpack.c.bf16 %v1400_v41, %v1400_v41  ;;  %v1334_v46 = vmul.f32 0.2, %v1206_v34  ;;  %v1180_v7 = vadd.f32 %v2486_v3, %v1109_v54  ;;  %v2675_v50 = vpop.f32.mrf.mxu0 }
 0x122   : > { %vm1243_vm12 = vcmp.ge.f32.partialorder %v1179_v35, 0.0  ;;  %v1307_v47 = vmul.f32 0.2, %v1179_v35  ;;  %vm1275_vm13 = vcmp.ge.f32.partialorder %v1211_v36, 0.0  ;;  %v1339_v53 = vmul.f32 0.2, %v1211_v36  ;;  %v2677_v8 = vpop.f32.mrf.mxu1 }
 0x123   : > { %v1366_v52 = vsel %vm1238_vm10, %v1174_v32, %v1302_v42  ;;  %vm1241_vm14 = vcmp.ge.f32.partialorder %v1177_v37, 0.0  ;;  %1721 = vst.msk [vmem:[%s2503_s17 + $0xac] sm:$0xf] %vm1677_vm1, %v1985_v45  ;;  %v1398_v56 = vsel %vm1270_vm11, %v1206_v34, %v1334_v46  ;;  %v1305_v58 = vmul.f32 0.2, %v1177_v37  ;;  %v2692_v26 = vpop.f32.mrf.mxu0  ;;  %v1142_v33 = vld [vmem:[#allocation2 + $0x180] sm:$0xff] }
 0x124   : > { %v1951_v55 = vpack.c.bf16 %v1366_v52, %v1366_v52  ;;  %v1371_v57 = vsel %vm1243_vm12, %v1179_v35, %v1307_v47  ;;  %v1983_v62 = vpack.c.bf16 %v1398_v56, %v1398_v56  ;;  %v1403_v0 = vsel %vm1275_vm13, %v1211_v36, %v1339_v53  ;;  %v2694_v22 = vpop.f32.mrf.mxu1  ;;  %v1113_v36 = vld [vmem:[#allocation2 + $0x98] sm:$0xff]  ;;  %v1111_v46 = vld [vmem:[#allocation2 + $0x88] sm:$0xff] }
 0x125   : > { %v1956_v63 = vpack.c.bf16 %v1371_v57, %v1371_v57  ;;  %vm1273_vm15 = vcmp.ge.f32.partialorder %v1209_v38, 0.0  ;;  %v1988_v5 = vpack.c.bf16 %v1403_v0, %v1403_v0  ;;  %v1369_v43 = vsel %vm1241_vm14, %v1177_v37, %v1305_v58  ;;  %v1145_v37 = vld [vmem:[#allocation2 + $0x198] sm:$0xff]  ;;  %v2706_v54 = vpop.f32.mrf.mxu0 }
 0x126   : > { %1687 = vst.msk [vmem:[%s2503_s17 + $0x24] sm:$0xf] %vm1677_vm1, %v1951_v55  ;;  %v1337_v44 = vmul.f32 0.2, %v1209_v38  ;;  %1719 = vst.msk [vmem:[%s2503_s17 + $0xa4] sm:$0xf] %vm1677_vm1, %v1983_v62  ;;  %v1954_v51 = vpack.c.bf16 %v1369_v43, %v1369_v43  ;;  %v1212_v1 = vadd.f32 %v2486_v3, %v1141_v59  ;;  %v1178_v2 = vadd.f32 %v2486_v3, %v1107_v60  ;;  %v2708_v55 = vpop.f32.mrf.mxu1 }
 0x127   : > { %1692 = vst.msk [vmem:[%s2503_s17 + $0x38] sm:$0xf] %vm1677_vm1, %v1956_v63  ;;  %v1210_v13 = vadd.f32 %v2486_v3, %v1139_v61  ;;  %1724 = vst.msk [vmem:[%s2503_s17 + $0xb8] sm:$0xf] %vm1677_vm1, %v1988_v5  ;;  %vm1244_vm2 = vcmp.ge.f32.partialorder %v1180_v7, 0.0  ;;  %v1183_v16 = vadd.f32 %v2486_v3, %v1112_v4  ;;  %v1215_v35 = vadd.f32 %v2486_v3, %v1144_v21  ;;  %v1143_v4 = vld [vmem:[#allocation2 + $0x188] sm:$0xff] }
 0x128   : > { %v1401_v14 = vsel %vm1273_vm15, %v1209_v38, %v1337_v44  ;;  %v1308_v15 = vmul.f32 0.2, %v1180_v7  ;;  %1690 = vst.msk [vmem:[%s2503_s17 + $0x30] sm:$0xf] %vm1677_vm1, %v1954_v51  ;;  %vm1276_vm3 = vcmp.ge.f32.partialorder %v1212_v1, 0.0  ;;  %vm1242_vm4 = vcmp.ge.f32.partialorder %v1178_v2, 0.0 }
 0x129   : > { %v1986_v17 = vpack.c.bf16 %v1401_v14, %v1401_v14  ;;  %v1340_v18 = vmul.f32 0.2, %v1212_v1  ;;  %v1306_v12 = vmul.f32 0.2, %v1178_v2  ;;  %vm1274_vm5 = vcmp.ge.f32.partialorder %v1210_v13, 0.0  ;;  %v1116_v5 = vld [vmem:[#allocation2 + $0xb0] sm:$0xff] }
 0x12a   : > { %v1372_v11 = vsel %vm1244_vm2, %v1180_v7, %v1308_v15  ;;  %v1338_v24 = vmul.f32 0.2, %v1210_v13  ;;  %vm1247_vm6 = vcmp.ge.f32.partialorder %v1183_v16, 0.0  ;;  %v1311_v28 = vmul.f32 0.2, %v1183_v16  ;;  %v343_v51 = vld [vmem:[#allocation2 + $0x1b0] sm:$0xff] }
 0x12b   : > { %1722 = vst.msk [vmem:[%s2503_s17 + $0xb0] sm:$0xf] %vm1677_vm1, %v1986_v17  ;;  %v1957_v27 = vpack.c.bf16 %v1372_v11, %v1372_v11  ;;  %v1404_v23 = vsel %vm1276_vm3, %v1212_v1, %v1340_v18  ;;  %v1370_v32 = vsel %vm1242_vm4, %v1178_v2, %v1306_v12  ;;  %v1181_v45 = vadd.f32 %v2486_v3, %v1110_v25  ;;  %v309_v1 = vld [vmem:[#allocation2 + $0xa0] sm:$0xff]  ;;  %v2719_v2 = vpop.f32.mrf.mxu0  ;;  %v312_v18 = vld [vmem:[#allocation2 + $0xb8] sm:$0xff] }
 0x12c   : > { %v1989_v31 = vpack.c.bf16 %v1404_v23, %v1404_v23  ;;  %v1402_v34 = vsel %vm1274_vm5, %v1210_v13, %v1338_v24  ;;  %v1955_v38 = vpack.c.bf16 %v1370_v32, %v1370_v32  ;;  %v1375_v42 = vsel %vm1247_vm6, %v1183_v16, %v1311_v28  ;;  %v2721_v13 = vpop.f32.mrf.mxu1  ;;  %v341_v17 = vld [vmem:[#allocation2 + $0x1a0] sm:$0xff]  ;;  %v344_v25 = vld [vmem:[#allocation2 + $0x1b8] sm:$0xff]  ;;  %v342_v23 = vld [vmem:[#allocation2 + $0x1a8] sm:$0xff] }
 0x12d   : > { %1693 = vst.msk [vmem:[%s2503_s17 + $0x3c] sm:$0xf] %vm1677_vm1, %v1957_v27  ;;  %v1987_v41 = vpack.c.bf16 %v1402_v34, %v1402_v34  ;;  %v1960_v47 = vpack.c.bf16 %v1375_v42, %v1375_v42  ;;  %vm1279_vm7 = vcmp.ge.f32.partialorder %v1215_v35, 0.0  ;;  %v1343_v52 = vmul.f32 0.2, %v1215_v35  ;;  %v310_v27 = vld [vmem:[#allocation2 + $0xa8] sm:$0xff]  ;;  %v2093_v42 = vpop.f32.mrf.mxu0 }
 0x12e   : > { %1725 = vst.msk [vmem:[%s2503_s17 + $0xbc] sm:$0xf] %vm1677_vm1, %v1989_v31  ;;  %v1213_v53 = vadd.f32 %v2486_v3, %v1142_v33  ;;  %1691 = vst.msk [vmem:[%s2503_s17 + $0x34] sm:$0xf] %vm1677_vm1, %v1955_v38  ;;  %vm1245_vm8 = vcmp.ge.f32.partialorder %v1181_v45, 0.0  ;;  %v1184_v57 = vadd.f32 %v2486_v3, %v1113_v36  ;;  %v1216_v58 = vadd.f32 %v2486_v3, %v1145_v37  ;;  %v315_v34 = vld [vmem:[#allocation2 + $0xd0] sm:$0xff] }
 0x12f   : > { %1723 = vst.msk [vmem:[%s2503_s17 + $0xb4] sm:$0xf] %vm1677_vm1, %v1987_v41  ;;  %v1309_v56 = vmul.f32 0.2, %v1181_v45  ;;  %1696 = vst.msk [vmem:[%s2503_s17 + $0x48] sm:$0xf] %vm1677_vm1, %v1960_v47  ;;  %v1407_v59 = vsel %vm1279_vm7, %v1215_v35, %v1343_v52  ;;  %v1182_v61 = vadd.f32 %v2486_v3, %v1111_v46  ;;  %v1214_v12 = vadd.f32 %v2486_v3, %v1143_v4 }
 0x130   : > { %vm1277_vm9 = vcmp.ge.f32.partialorder %v1213_v53, 0.0  ;;  %v1341_v60 = vmul.f32 0.2, %v1213_v53  ;;  %v1992_v62 = vpack.c.bf16 %v1407_v59, %v1407_v59  ;;  %vm1248_vm10 = vcmp.ge.f32.partialorder %v1184_v57, 0.0  ;;  %v347_v35 = vld [vmem:[#allocation2 + $0x1d0] sm:$0xff]  ;;  %v313_v36 = vld [vmem:[#allocation2 + $0xc0] sm:$0xff] }
 0x131   : > { %v1373_v63 = vsel %vm1245_vm8, %v1181_v45, %v1309_v56  ;;  %v1312_v0 = vmul.f32 0.2, %v1184_v57  ;;  %vm1280_vm11 = vcmp.ge.f32.partialorder %v1216_v58, 0.0  ;;  %v1344_v7 = vmul.f32 0.2, %v1216_v58  ;;  %v345_v38 = vld [vmem:[#allocation2 + $0x1c0] sm:$0xff]  ;;  %v2125_v45 = vpop.f32.mrf.mxu1 }
 0x132   : > { %v1958_v43 = vpack.c.bf16 %v1373_v63, %v1373_v63  ;;  %v1405_v44 = vsel %vm1277_vm9, %v1213_v53, %v1341_v60  ;;  %1728 = vst.msk [vmem:[%s2503_s17 + $0xc8] sm:$0xf] %vm1677_vm1, %v1992_v62  ;;  %vm1246_vm12 = vcmp.ge.f32.partialorder %v1182_v61, 0.0  ;;  %v1310_v16 = vmul.f32 0.2, %v1182_v61  ;;  %v316_v41 = vld [vmem:[#allocation2 + $0xd8] sm:$0xff] }
 0x133   : > { %v1990_v14 = vpack.c.bf16 %v1405_v44, %v1405_v44  ;;  %v1376_v15 = vsel %vm1248_vm10, %v1184_v57, %v1312_v0  ;;  %v1408_v11 = vsel %vm1280_vm11, %v1216_v58, %v1344_v7  ;;  %v1187_v24 = vadd.f32 %v2486_v3, %v1116_v5  ;;  %v348_v52 = vld [vmem:[#allocation2 + $0x1d8] sm:$0xff]  ;;  %v314_v53 = vld [vmem:[#allocation2 + $0xc8] sm:$0xff]  ;;  %v351_v62 = vld [vmem:[#allocation2 + $0x1f0] sm:$0xff]  ;;  %v822_v7 = vpop.f32.mrf.mxu0 }
 0x134   : > { %1694 = vst.msk [vmem:[%s2503_s17 + $0x40] sm:$0xf] %vm1677_vm1, %v1958_v43  ;;  %v1961_v21 = vpack.c.bf16 %v1376_v15, %v1376_v15  ;;  %v1993_v28 = vpack.c.bf16 %v1408_v11, %v1408_v11  ;;  %v1374_v33 = vsel %vm1246_vm12, %v1182_v61, %v1310_v16  ;;  %v1016_v31 = vadd.f32 %v2622_v6, %v343_v51  ;;  %v346_v56 = vld [vmem:[#allocation2 + $0x1c8] sm:$0xff]  ;;  %v319_v61 = vld [vmem:[#allocation2 + $0xf0] sm:$0xff]  ;;  %v320_v0 = vld [vmem:[#allocation2 + $0xf8] sm:$0xff]  ;;  %v950_v51 = vpop.f32.mrf.mxu1 }
 0x135   : > { %1726 = vst.msk [vmem:[%s2503_s17 + $0xc0] sm:$0xf] %vm1677_vm1, %v1990_v14  ;;  %v982_v32 = vadd.f32 %v2629_v9, %v309_v1  ;;  %v1959_v37 = vpack.c.bf16 %v1374_v33, %v1374_v33  ;;  %vm1278_vm13 = vcmp.ge.f32.partialorder %v1214_v12, 0.0  ;;  %v1342_v3 = vmul.f32 0.2, %v1214_v12  ;;  %v318_v44 = vld [vmem:[#allocation2 + $0xe8] sm:$0xff] }
 0x136   : > { %1697 = vst.msk [vmem:[%s2503_s17 + $0x4c] sm:$0xf] %vm1677_vm1, %v1961_v21  ;;  %vm1251_vm14 = vcmp.ge.f32.partialorder %v1187_v24, 0.0  ;;  %1729 = vst.msk [vmem:[%s2503_s17 + $0xcc] sm:$0xf] %vm1677_vm1, %v1993_v28  ;;  %v1014_v6 = vadd.f32 %v2631_v10, %v341_v17  ;;  %v985_v9 = vadd.f32 %v2634_v19, %v312_v18  ;;  %v1017_v47 = vadd.f32 %v2636_v20, %v344_v25  ;;  %v317_v10 = vld [vmem:[#allocation2 + $0xe0] sm:$0xff] }
 0x137   : > { %v1315_v46 = vmul.f32 0.2, %v1187_v24  ;;  %1081 = vst.msk [vmem:[#allocation2 + $0x1b0] sm:$0xff] %vm224_vm0, %v1016_v31  ;;  %1047 = vst.msk [vmem:[#allocation2 + $0xa0] sm:$0xff] %vm224_vm0, %v982_v32  ;;  %v1406_v57 = vsel %vm1278_vm13, %v1214_v12, %v1342_v3  ;;  %v983_v58 = vadd.f32 %v2640_v29, %v310_v27  ;;  %v1015_v59 = vadd.f32 %v2642_v30, %v342_v23  ;;  %v349_v30 = vld [vmem:[#allocation2 + $0x1e0] sm:$0xff] }
 0x138   : > { %1695 = vst.msk [vmem:[%s2503_s17 + $0x44] sm:$0xf] %vm1677_vm1, %v1959_v37  ;;  %v988_v60 = vadd.f32 %v2658_v39, %v315_v34  ;;  %v1991_v63 = vpack.c.bf16 %v1406_v57, %v1406_v57  ;;  %v1020_v20 = vadd.f32 %v2660_v40, %v347_v35  ;;  %v986_v29 = vadd.f32 %v2665_v48, %v313_v36  ;;  %v352_v39 = vld [vmem:[#allocation2 + $0x1f8] sm:$0xff]  ;;  %v350_v48 = vld [vmem:[#allocation2 + $0x1e8] sm:$0xff] }
 0x139   : > { %v1379_v19 = vsel %vm1251_vm14, %v1187_v24, %v1315_v46  ;;  %1079 = vst.msk [vmem:[#allocation2 + $0x1a0] sm:$0xff] %vm224_vm0, %v1014_v6  ;;  %1050 = vst.msk [vmem:[#allocation2 + $0xb8] sm:$0xff] %vm224_vm0, %v985_v9  ;;  %v1018_v5 = vadd.f32 %v2667_v49, %v345_v38  ;;  %v989_v43 = vadd.f32 %v2675_v50, %v316_v41 }
 0x13a   : > { %1082 = vst.msk [vmem:[#allocation2 + $0x1b8] sm:$0xff] %vm224_vm0, %v1017_v47  ;;  %v1964_v4 = vpack.c.bf16 %v1379_v19, %v1379_v19  ;;  %1048 = vst.msk [vmem:[#allocation2 + $0xa8] sm:$0xff] %vm224_vm0, %v983_v58  ;;  %v1021_v40 = vadd.f32 %v2677_v8, %v348_v52  ;;  %v987_v1 = vadd.f32 %v2692_v26, %v314_v53 }
 0x13b   : > { %1080 = vst.msk [vmem:[#allocation2 + $0x1a8] sm:$0xff] %vm224_vm0, %v1015_v59  ;;  %1053 = vst.msk [vmem:[#allocation2 + $0xd0] sm:$0xff] %vm224_vm0, %v988_v60  ;;  %v1019_v14 = vadd.f32 %v2694_v22, %v346_v56  ;;  %v992_v49 = vadd.f32 %v2706_v54, %v319_v61  ;;  %v1024_v50 = vadd.f32 %v2708_v55, %v351_v62 }
 0x13c   : > { %1727 = vst.msk [vmem:[%s2503_s17 + $0xc4] sm:$0xf] %vm1677_vm1, %v1991_v63  ;;  %1700 = vst.msk [vmem:[%s2503_s17 + $0x58] sm:$0xf] %vm1677_vm1, %v1964_v4  ;;  %v990_v8 = vadd.f32 %v2719_v2, %v317_v10  ;;  %v1022_v15 = vadd.f32 %v2721_v13, %v349_v30  ;;  %v993_v16 = vadd.f32 %v2093_v42, %v320_v0  ;;  %v2786_v2 = vld [vmem:[%s2870_s2] ss:$0 sm:$0xff] }
 0x13d   : > { %1085 = vst.msk [vmem:[#allocation2 + $0x1d0] sm:$0xff] %vm224_vm0, %v1020_v20  ;;  %1051 = vst.msk [vmem:[#allocation2 + $0xc0] sm:$0xff] %vm224_vm0, %v986_v29  ;;  %v1025_v26 = vadd.f32 %v2125_v45, %v352_v39  ;;  %v991_v22 = vadd.f32 %v822_v7, %v318_v44  ;;  %v1023_v54 = vadd.f32 %v950_v51, %v350_v48 }
 0x13e   : > { %1083 = vst.msk [vmem:[#allocation2 + $0x1c0] sm:$0xff] %vm224_vm0, %v1018_v5  ;;  %1054 = vst.msk [vmem:[#allocation2 + $0xd8] sm:$0xff] %vm224_vm0, %v989_v43  ;;  %v1148_v55 = vld [vmem:[#allocation2 + $0x1b0] sm:$0xff]  ;;  %v1114_v17 = vld [vmem:[#allocation2 + $0xa0] sm:$0xff] }
 0x13f   : > { %1086 = vst.msk [vmem:[#allocation2 + $0x1d8] sm:$0xff] %vm224_vm0, %v1021_v40  ;;  %1052 = vst.msk [vmem:[#allocation2 + $0xc8] sm:$0xff] %vm224_vm0, %v987_v1  ;;  %v1219_v13 = vadd.f32 %v2786_v2, %v1148_v55  ;;  %v1185_v18 = vadd.f32 %v2786_v2, %v1114_v17 }
 0x140   : > { %1084 = vst.msk [vmem:[#allocation2 + $0x1c8] sm:$0xff] %vm224_vm0, %v1019_v14  ;;  %1057 = vst.msk [vmem:[#allocation2 + $0xf0] sm:$0xff] %vm224_vm0, %v992_v49  ;;  %v1146_v21 = vld [vmem:[#allocation2 + $0x1a0] sm:$0xff]  ;;  %v1117_v11 = vld [vmem:[#allocation2 + $0xb8] sm:$0xff] }
 0x141   : > { %1089 = vst.msk [vmem:[#allocation2 + $0x1f0] sm:$0xff] %vm224_vm0, %v1024_v50  ;;  %1055 = vst.msk [vmem:[#allocation2 + $0xe0] sm:$0xff] %vm224_vm0, %v990_v8  ;;  %v1149_v12 = vld [vmem:[#allocation2 + $0x1b8] sm:$0xff]  ;;  %vm1283_vm15 = vcmp.ge.f32.partialorder %v1219_v13, 0.0  ;;  %v1347_v24 = vmul.f32 0.2, %v1219_v13  ;;  %v1217_v27 = vadd.f32 %v2786_v2, %v1146_v21  ;;  %v1188_v23 = vadd.f32 %v2786_v2, %v1117_v11 }
 0x142   : > { %1087 = vst.msk [vmem:[#allocation2 + $0x1e0] sm:$0xff] %vm224_vm0, %v1022_v15  ;;  %1058 = vst.msk [vmem:[#allocation2 + $0xf8] sm:$0xff] %vm224_vm0, %v993_v16  ;;  %vm1249_vm2 = vcmp.ge.f32.partialorder %v1185_v18, 0.0  ;;  %v1313_v25 = vmul.f32 0.2, %v1185_v18  ;;  %v1220_v28 = vadd.f32 %v2786_v2, %v1149_v12  ;;  %v1115_v33 = vld [vmem:[#allocation2 + $0xa8] sm:$0xff] }
 0x143   : > { %1090 = vst.msk [vmem:[#allocation2 + $0x1f8] sm:$0xff] %vm224_vm0, %v1025_v26  ;;  %1056 = vst.msk [vmem:[#allocation2 + $0xe8] sm:$0xff] %vm224_vm0, %v991_v22  ;;  %v1147_v31 = vld [vmem:[#allocation2 + $0x1a8] sm:$0xff]  ;;  %v1411_v32 = vsel %vm1283_vm15, %v1219_v13, %v1347_v24  ;;  %v1186_v35 = vadd.f32 %v2786_v2, %v1115_v33  ;;  %v1345_v38 = vmul.f32 0.2, %v1217_v27  ;;  %v1120_v41 = vld [vmem:[#allocation2 + $0xd0] sm:$0xff] }
 0x144   : > { %1088 = vst.msk [vmem:[#allocation2 + $0x1e8] sm:$0xff] %vm224_vm0, %v1023_v54  ;;  %v1377_v34 = vsel %vm1249_vm2, %v1185_v18, %v1313_v25  ;;  %v1218_v36 = vadd.f32 %v2786_v2, %v1147_v31  ;;  %v1996_v37 = vpack.c.bf16 %v1411_v32, %v1411_v32  ;;  %vm1281_vm0 = vcmp.ge.f32.partialorder %v1217_v27, 0.0  ;;  %v1152_v9 = vld [vmem:[#allocation2 + $0x1d0] sm:$0xff]  ;;  %v1118_v47 = vld [vmem:[#allocation2 + $0xc0] sm:$0xff] }
 0x145   : > { %v1962_v3 = vpack.c.bf16 %v1377_v34, %v1377_v34  ;;  %vm1252_vm3 = vcmp.ge.f32.partialorder %v1188_v23, 0.0  ;;  %v1316_v42 = vmul.f32 0.2, %v1188_v23  ;;  %vm1284_vm4 = vcmp.ge.f32.partialorder %v1220_v28, 0.0  ;;  %v1150_v58 = vld [vmem:[#allocation2 + $0x1c0] sm:$0xff]  ;;  %v1121_v29 = vld [vmem:[#allocation2 + $0xd8] sm:$0xff] }
 0x146   : > { %v1348_v45 = vmul.f32 0.2, %v1220_v28  ;;  %1732 = vst.msk [vmem:[%s2503_s17 + $0xd8] sm:$0xf] %vm1677_vm1, %v1996_v37  ;;  %v1409_v46 = vsel %vm1281_vm0, %v1217_v27, %v1345_v38  ;;  %vm1250_vm5 = vcmp.ge.f32.partialorder %v1186_v35, 0.0  ;;  %vm1282_vm6 = vcmp.ge.f32.partialorder %v1218_v36, 0.0 }
 0x147   : > { %1698 = vst.msk [vmem:[%s2503_s17 + $0x50] sm:$0xf] %vm1677_vm1, %v1962_v3  ;;  %v1314_v6 = vmul.f32 0.2, %v1186_v35  ;;  %v1994_v52 = vpack.c.bf16 %v1409_v46, %v1409_v46  ;;  %v1380_v53 = vsel %vm1252_vm3, %v1188_v23, %v1316_v42  ;;  %v1346_v57 = vmul.f32 0.2, %v1218_v36 }
 0x148   : > { %v1412_v56 = vsel %vm1284_vm4, %v1220_v28, %v1348_v45  ;;  %v1965_v59 = vpack.c.bf16 %v1380_v53, %v1380_v53  ;;  %v1191_v62 = vadd.f32 %v2786_v2, %v1120_v41  ;;  %v1223_v19 = vadd.f32 %v2786_v2, %v1152_v9  ;;  %v1153_v4 = vld [vmem:[#allocation2 + $0x1d8] sm:$0xff]  ;;  %v1119_v48 = vld [vmem:[#allocation2 + $0xc8] sm:$0xff]  ;;  %v1124_v8 = vld [vmem:[#allocation2 + $0xf0] sm:$0xff] }
 0x149   : > { %v1997_v60 = vpack.c.bf16 %v1412_v56, %v1412_v56  ;;  %v1378_v61 = vsel %vm1250_vm5, %v1186_v35, %v1314_v6  ;;  %1730 = vst.msk [vmem:[%s2503_s17 + $0xd0] sm:$0xf] %vm1677_vm1, %v1994_v52  ;;  %v1410_v63 = vsel %vm1282_vm6, %v1218_v36, %v1346_v57  ;;  %v1189_v20 = vadd.f32 %v2786_v2, %v1118_v47  ;;  %v1151_v50 = vld [vmem:[#allocation2 + $0x1c8] sm:$0xff]  ;;  %v1156_v15 = vld [vmem:[#allocation2 + $0x1f0] sm:$0xff]  ;;  %v1122_v54 = vld [vmem:[#allocation2 + $0xe0] sm:$0xff] }
 0x14a   : > { %v1963_v10 = vpack.c.bf16 %v1378_v61, %v1378_v61  ;;  %1701 = vst.msk [vmem:[%s2503_s17 + $0x5c] sm:$0xf] %vm1677_vm1, %v1965_v59  ;;  %v1995_v30 = vpack.c.bf16 %v1410_v63, %v1410_v63  ;;  %vm1255_vm7 = vcmp.ge.f32.partialorder %v1191_v62, 0.0  ;;  %v1319_v0 = vmul.f32 0.2, %v1191_v62  ;;  %v1154_v55 = vld [vmem:[#allocation2 + $0x1e0] sm:$0xff] }
 0x14b   : > { %1733 = vst.msk [vmem:[%s2503_s17 + $0xdc] sm:$0xf] %vm1677_vm1, %v1997_v60  ;;  %v1221_v39 = vadd.f32 %v2786_v2, %v1150_v58  ;;  %vm1287_vm8 = vcmp.ge.f32.partialorder %v1223_v19, 0.0  ;;  %v1351_v5 = vmul.f32 0.2, %v1223_v19  ;;  %vm1253_vm9 = vcmp.ge.f32.partialorder %v1189_v20, 0.0 }
 0x14c   : > { %1699 = vst.msk [vmem:[%s2503_s17 + $0x54] sm:$0xf] %vm1677_vm1, %v1963_v10  ;;  %v1317_v43 = vmul.f32 0.2, %v1189_v20  ;;  %1731 = vst.msk [vmem:[%s2503_s17 + $0xd4] sm:$0xf] %vm1677_vm1, %v1995_v30  ;;  %v1383_v40 = vsel %vm1255_vm7, %v1191_v62, %v1319_v0  ;;  %v1192_v7 = vadd.f32 %v2786_v2, %v1121_v29  ;;  %v1224_v49 = vadd.f32 %v2786_v2, %v1153_v4 }
 0x14d   : > { %vm1285_vm10 = vcmp.ge.f32.partialorder %v1221_v39, 0.0  ;;  %v1349_v44 = vmul.f32 0.2, %v1221_v39  ;;  %v1968_v51 = vpack.c.bf16 %v1383_v40, %v1383_v40  ;;  %v1415_v1 = vsel %vm1287_vm8, %v1223_v19, %v1351_v5  ;;  %v1125_v3 = vld [vmem:[#allocation2 + $0xf8] sm:$0xff]  ;;  %v1123_v6 = vld [vmem:[#allocation2 + $0xe8] sm:$0xff] }
 0x14e   : > { %v1381_v14 = vsel %vm1253_vm9, %v1189_v20, %v1317_v43  ;;  %v2000_v16 = vpack.c.bf16 %v1415_v1, %v1415_v1  ;;  %vm1256_vm11 = vcmp.ge.f32.partialorder %v1192_v7, 0.0  ;;  %v1320_v13 = vmul.f32 0.2, %v1192_v7  ;;  %v1157_v46 = vld [vmem:[#allocation2 + $0x1f8] sm:$0xff]  ;;  %v1155_v9 = vld [vmem:[#allocation2 + $0x1e8] sm:$0xff] }
 0x14f   : > { %v1966_v26 = vpack.c.bf16 %v1381_v14, %v1381_v14  ;;  %v1413_v22 = vsel %vm1285_vm10, %v1221_v39, %v1349_v44  ;;  %1704 = vst.msk [vmem:[%s2503_s17 + $0x68] sm:$0xf] %vm1677_vm1, %v1968_v51  ;;  %vm1288_vm12 = vcmp.ge.f32.partialorder %v1224_v49, 0.0  ;;  %v1352_v18 = vmul.f32 0.2, %v1224_v49 }
 0x150   : > { %v1998_v17 = vpack.c.bf16 %v1413_v22, %v1413_v22  ;;  %1736 = vst.msk [vmem:[%s2503_s17 + $0xe8] sm:$0xf] %vm1677_vm1, %v2000_v16  ;;  %v1190_v21 = vadd.f32 %v2786_v2, %v1119_v48  ;;  %v1222_v11 = vadd.f32 %v2786_v2, %v1151_v50  ;;  %v1195_v12 = vadd.f32 %v2786_v2, %v1124_v8 }
 0x151   : > { %1702 = vst.msk [vmem:[%s2503_s17 + $0x60] sm:$0xf] %vm1677_vm1, %v1966_v26  ;;  %v1227_v24 = vadd.f32 %v2786_v2, %v1156_v15  ;;  %v1384_v25 = vsel %vm1256_vm11, %v1192_v7, %v1320_v13  ;;  %v1416_v27 = vsel %vm1288_vm12, %v1224_v49, %v1352_v18  ;;  %v1193_v23 = vadd.f32 %v2786_v2, %v1122_v54 }
 0x152   : > { %1734 = vst.msk [vmem:[%s2503_s17 + $0xe0] sm:$0xf] %vm1677_vm1, %v1998_v17  ;;  %v1225_v28 = vadd.f32 %v2786_v2, %v1154_v55  ;;  %v1969_v33 = vpack.c.bf16 %v1384_v25, %v1384_v25  ;;  %v2001_v31 = vpack.c.bf16 %v1416_v27, %v1416_v27  ;;  %vm1254_vm13 = vcmp.ge.f32.partialorder %v1190_v21, 0.0 }
 0x153   : > { %v1318_v32 = vmul.f32 0.2, %v1190_v21  ;;  %vm1286_vm14 = vcmp.ge.f32.partialorder %v1222_v11, 0.0  ;;  %v1350_v34 = vmul.f32 0.2, %v1222_v11  ;;  %vm1259_vm15 = vcmp.ge.f32.partialorder %v1195_v12, 0.0 }
 0x154   : > { %v1323_v35 = vmul.f32 0.2, %v1195_v12  ;;  %1705 = vst.msk [vmem:[%s2503_s17 + $0x6c] sm:$0xf] %vm1677_vm1, %v1969_v33  ;;  %1737 = vst.msk [vmem:[%s2503_s17 + $0xec] sm:$0xf] %vm1677_vm1, %v2001_v31  ;;  %v1196_v59 = vadd.f32 %v2786_v2, %v1125_v3  ;;  %v1228_v61 = vadd.f32 %v2786_v2, %v1157_v46  ;;  %v1194_v62 = vadd.f32 %v2786_v2, %v1123_v6 }
 0x155   : > { %v1382_v36 = vsel %vm1254_vm13, %v1190_v21, %v1318_v32  ;;  %vm1291_vm2 = vcmp.ge.f32.partialorder %v1227_v24, 0.0  ;;  %v1355_v37 = vmul.f32 0.2, %v1227_v24  ;;  %vm1257_vm0 = vcmp.ge.f32.partialorder %v1193_v23, 0.0 }
 0x156   : > { %v1967_v38 = vpack.c.bf16 %v1382_v36, %v1382_v36  ;;  %v1414_v41 = vsel %vm1286_vm14, %v1222_v11, %v1350_v34  ;;  %v1387_v42 = vsel %vm1259_vm15, %v1195_v12, %v1323_v35  ;;  %v1321_v45 = vmul.f32 0.2, %v1193_v23 }
 0x157   : > { %v1999_v47 = vpack.c.bf16 %v1414_v41, %v1414_v41  ;;  %v1972_v52 = vpack.c.bf16 %v1387_v42, %v1387_v42  ;;  %v1419_v53 = vsel %vm1291_vm2, %v1227_v24, %v1355_v37  ;;  %vm1289_vm3 = vcmp.ge.f32.partialorder %v1225_v28, 0.0 }
 0x158   : > { %1703 = vst.msk [vmem:[%s2503_s17 + $0x64] sm:$0xf] %vm1677_vm1, %v1967_v38  ;;  %v2004_v56 = vpack.c.bf16 %v1419_v53, %v1419_v53  ;;  %v1385_v57 = vsel %vm1257_vm0, %v1193_v23, %v1321_v45  ;;  %v1353_v58 = vmul.f32 0.2, %v1225_v28  ;;  %v1226_v10 = vadd.f32 %v2786_v2, %v1155_v9 }
 0x159   : > { %1735 = vst.msk [vmem:[%s2503_s17 + $0xe4] sm:$0xf] %vm1677_vm1, %v1999_v47  ;;  %1708 = vst.msk [vmem:[%s2503_s17 + $0x78] sm:$0xf] %vm1677_vm1, %v1972_v52  ;;  %v1970_v60 = vpack.c.bf16 %v1385_v57, %v1385_v57  ;;  %vm1260_vm4 = vcmp.ge.f32.partialorder %v1196_v59, 0.0  ;;  %vm1292_vm5 = vcmp.ge.f32.partialorder %v1228_v61, 0.0 }
 0x15a   : > { %1740 = vst.msk [vmem:[%s2503_s17 + $0xf8] sm:$0xf] %vm1677_vm1, %v2004_v56  ;;  %v1417_v63 = vsel %vm1289_vm3, %v1225_v28, %v1353_v58  ;;  %v1324_v19 = vmul.f32 0.2, %v1196_v59  ;;  %v1356_v29 = vmul.f32 0.2, %v1228_v61 }
 0x15b   : > { %1706 = vst.msk [vmem:[%s2503_s17 + $0x70] sm:$0xf] %vm1677_vm1, %v1970_v60  ;;  %v2002_v20 = vpack.c.bf16 %v1417_v63, %v1417_v63  ;;  %vm1258_vm6 = vcmp.ge.f32.partialorder %v1194_v62, 0.0  ;;  %v1322_v0 = vmul.f32 0.2, %v1194_v62  ;;  %vm1290_vm7 = vcmp.ge.f32.partialorder %v1226_v10, 0.0 }
 0x15c   : > { %v1388_v30 = vsel %vm1260_vm4, %v1196_v59, %v1324_v19  ;;  %v1354_v39 = vmul.f32 0.2, %v1226_v10  ;;  %v1420_v4 = vsel %vm1292_vm5, %v1228_v61, %v1356_v29 }
 0x15d   : > { %1738 = vst.msk [vmem:[%s2503_s17 + $0xf0] sm:$0xf] %vm1677_vm1, %v2002_v20  ;;  %v1973_v2 = vpack.c.bf16 %v1388_v30, %v1388_v30  ;;  %v2005_v5 = vpack.c.bf16 %v1420_v4, %v1420_v4  ;;  %v1386_v43 = vsel %vm1258_vm6, %v1194_v62, %v1322_v0 }
 0x15e   : > { %v1418_v40 = vsel %vm1290_vm7, %v1226_v10, %v1354_v39  ;;  %v1971_v44 = vpack.c.bf16 %v1386_v43, %v1386_v43 }
 0x15f   : > { %1709 = vst.msk [vmem:[%s2503_s17 + $0x7c] sm:$0xf] %vm1677_vm1, %v1973_v2  ;;  %v2003_v7 = vpack.c.bf16 %v1418_v40, %v1418_v40  ;;  %1741 = vst.msk [vmem:[%s2503_s17 + $0xfc] sm:$0xf] %vm1677_vm1, %v2005_v5 }
 0x160   : > { %1707 = vst.msk [vmem:[%s2503_s17 + $0x74] sm:$0xf] %vm1677_vm1, %v1971_v44 }
 0x161   : > { %1739 = vst.msk [vmem:[%s2503_s17 + $0xf4] sm:$0xf] %vm1677_vm1, %v2003_v7 }
 0x162 PF: > { %s13_s14 = sadd.s32 1, %s2230_s14   ;;  %s2872_s12 = smov %s2226_s13 }
 0x163   : > { %p10_p5 = scmp.ge.s32.totalorder %s13_s14, 5   ;;  %s2873_s13 = smov %s2875_s15 }
 0x165   :  { %12 = sbr.rel (!%p10_p5) target bundleno = 2 (0x2), region = 73 }

// kernel: turbnetd_forward.6
= control target key start
LH: loop header
LB: loop body
LE: loop exit
PB: predicated region body
PF: predicated region fallthrough
CT: control target
= control target key end

     0   :  { %v1873_v0 = vmov 0   ;;  %vm19_vm0 = vcmask 130048   ;;  %v1874_v15 = vmov 0.0   ;;  %vm1211_vm1 = vcmask 125952   ;;  %s2895_s1 = inlined_call_operand.vmem [shape: bf16[256,16], index: 1, kind: input, shape index: {}]   ;;  %s2896_s0 = inlined_call_operand.vmem [shape: bf16[432,256], index: 0, kind: input, shape index: {}]   ;;  %s2897_s2 = inlined_call_operand.vmem [shape: bf16[432,16], index: 2, kind: output, shape index: {0}]   ;;  %s2898_s3 = inlined_call_operand.vmem [shape: f32[1,1,16], index: 3, kind: output, shape index: {1}]   ;;  %s2899_s4 = inlined_call_operand.vmem [shape: f32[1,1,16], index: 4, kind: output, shape index: {2}]  }
   0x1   :  { %580 = vmatprep.subr.bf16.mxu0 %v1873_v0  ;;  %v1773_v1 = vld [vmem:[%s2895_s1 + $0x38] sm:$0xff]   ;;  %1739 = vmatprep.subr.bf16.mxu1 %v1873_v0  ;;  %v1774_v2 = vld [vmem:[%s2895_s1 + $0x30] sm:$0xff]   ;;  %v1775_v3 = vld [vmem:[%s2895_s1 + $0x28] sm:$0xff]   ;;  %20 = vst.msk [vmem:[#allocation2] sm:$0xff] %vm19_vm0, %v1874_v15  ;;  %vm1379_vm2 = vcmask 122880  }
   0x2   :  { %581 = vmatpush1.bf16.msra.mxu0 %v1773_v1  ;;  %1755 = vmatpush1.bf16.msra.mxu1 %v1773_v1  ;;  %v1776_v4 = vld [vmem:[%s2895_s1 + $0x20] sm:$0xff]   ;;  %v1777_v5 = vld [vmem:[%s2895_s1 + $0x18] sm:$0xff]   ;;  %v1778_v7 = vld [vmem:[%s2895_s1 + $0x10] sm:$0xff]   ;;  %21 = vst.msk [vmem:[#allocation2 + $0x8] sm:$0xff] %vm19_vm0, %v1874_v15 }
   0x3   :  { %582 = vmatprep.subr.bf16.mxu0 %v1873_v0  ;;  %1740 = vmatprep.subr.bf16.mxu1 %v1873_v0  ;;  %v1791_v6 = vld [vmem:[%s2896_s0 + $0x4] ss:$8 sps:$4 sm:$0xff]   ;;  %v1781_v11 = vld [vmem:[%s2895_s1 + $0x78] sm:$0xff]   ;;  %v1782_v12 = vld [vmem:[%s2895_s1 + $0x70] sm:$0xff]   ;;  %22 = vst.msk [vmem:[#allocation2 + $0x10] sm:$0xff] %vm19_vm0, %v1874_v15 }
   0x4   :  { %612 = vmatprep.mubr.bf16.mxu0 %v1791_v6  ;;  %v1779_v8 = vld [vmem:[%s2895_s1 + $0x8] sm:$0xff]   ;;  %v1780_v9 = vld [vmem:[%s2895_s1] sm:$0xff]   ;;  %23 = vst.msk [vmem:[#allocation2 + $0x18] sm:$0xff] %vm19_vm0, %v1874_v15  ;;  %24 = vst.msk [vmem:[#allocation2 + $0x20] sm:$0xff] %vm19_vm0, %v1874_v15 }
   0x5   :  { %v1812_v10 = vld [vmem:[%s2896_s0 + $0xe4] ss:$8 sps:$4 sm:$0xff]   ;;  %25 = vst.msk [vmem:[#allocation2 + $0x28] sm:$0xff] %vm19_vm0, %v1874_v15  ;;  %26 = vst.msk [vmem:[#allocation2 + $0x30] sm:$0xff] %vm19_vm0, %v1874_v15  ;;  %v1785_v16 = vld [vmem:[%s2895_s1 + $0x58] sm:$0xff]  }
   0x6   :  { %583 = vmatpush1.bf16.msra.mxu0 %v1774_v2  ;;  %1756 = vmatpush1.bf16.msra.mxu1 %v1774_v2  ;;  %v1783_v13 = vld [vmem:[%s2895_s1 + $0x68] sm:$0xff]   ;;  %v1784_v14 = vld [vmem:[%s2895_s1 + $0x60] sm:$0xff]   ;;  %27 = vst.msk [vmem:[#allocation2 + $0x38] sm:$0xff] %vm19_vm0, %v1874_v15  ;;  %28 = vst.msk [vmem:[#allocation2 + $0x40] sm:$0xff] %vm19_vm0, %v1874_v15 }
   0x7   :  { %584 = vmatprep.subr.bf16.mxu0 %v1873_v0  ;;  %1741 = vmatprep.subr.bf16.mxu1 %v1873_v0  ;;  %29 = vst.msk [vmem:[#allocation2 + $0x48] sm:$0xff] %vm19_vm0, %v1874_v15  ;;  %30 = vst.msk [vmem:[#allocation2 + $0x50] sm:$0xff] %vm19_vm0, %v1874_v15  ;;  %v1786_v17 = vld [vmem:[%s2895_s1 + $0x50] sm:$0xff]   ;;  %v1787_v18 = vld [vmem:[%s2895_s1 + $0x48] sm:$0xff]  }
   0x8   :  { %724 = vmatprep.mubr.bf16.mxu1 %v1812_v10  ;;  %31 = vst.msk [vmem:[#allocation2 + $0x58] sm:$0xff] %vm19_vm0, %v1874_v15  ;;  %32 = vst.msk [vmem:[#allocation2 + $0x60] sm:$0xff] %vm19_vm0, %v1874_v15  ;;  %v1788_v19 = vld [vmem:[%s2895_s1 + $0x40] sm:$0xff]   ;;  %v1792_v22 = vld [vmem:[%s2896_s0 + $0x14] ss:$8 sps:$4 sm:$0xff]  }
   0x9   :  { %33 = vst.msk [vmem:[#allocation2 + $0x68] sm:$0xff] %vm19_vm0, %v1874_v15  ;;  %34 = vst.msk [vmem:[#allocation2 + $0x70] sm:$0xff] %vm19_vm0, %v1874_v15  ;;  %v1789_v20 = vld [vmem:[%s2896_s0] ss:$8 sps:$4 sm:$0xff]   ;;  %v1816_v23 = vld [vmem:[%s2896_s0 + $0xf4] ss:$8 sps:$4 sm:$0xff]  }
   0xa   :  { %585 = vmatpush1.bf16.msra.mxu0 %v1775_v3  ;;  %1757 = vmatpush1.bf16.msra.mxu1 %v1775_v3  ;;  %35 = vst.msk [vmem:[#allocation2 + $0x78] sm:$0xff] %vm19_vm0, %v1874_v15  ;;  %36 = vst.msk [vmem:[#allocation2 + $0x80] sm:$0xff] %vm19_vm0, %v1874_v15  ;;  %v1810_v21 = vld [vmem:[%s2896_s0 + $0xe0] ss:$8 sps:$4 sm:$0xff]   ;;  %v1794_v24 = vld [vmem:[%s2896_s0 + $0x10] ss:$8 sps:$4 sm:$0xff]  }
   0xb   :  { %586 = vmatprep.subr.bf16.mxu0 %v1873_v0  ;;  %1742 = vmatprep.subr.bf16.mxu1 %v1873_v0  ;;  %37 = vst.msk [vmem:[#allocation2 + $0x88] sm:$0xff] %vm19_vm0, %v1874_v15  ;;  %38 = vst.msk [vmem:[#allocation2 + $0x90] sm:$0xff] %vm19_vm0, %v1874_v15  ;;  %v1818_v25 = vld [vmem:[%s2896_s0 + $0xf0] ss:$8 sps:$4 sm:$0xff]   ;;  %v1795_v26 = vld [vmem:[%s2896_s0 + $0x24] ss:$8 sps:$4 sm:$0xff]  }
   0xc   :  { %39 = vst.msk [vmem:[#allocation2 + $0x98] sm:$0xff] %vm19_vm0, %v1874_v15  ;;  %40 = vst.msk [vmem:[#allocation2 + $0xa0] sm:$0xff] %vm19_vm0, %v1874_v15  ;;  %v1822_v27 = vld [vmem:[%s2896_s0 + $0x104] ss:$8 sps:$4 sm:$0xff]   ;;  %v1797_v28 = vld [vmem:[%s2896_s0 + $0x20] ss:$8 sps:$4 sm:$0xff]  }
   0xd   :  { %41 = vst.msk [vmem:[#allocation2 + $0xa8] sm:$0xff] %vm19_vm0, %v1874_v15  ;;  %42 = vst.msk [vmem:[#allocation2 + $0xb0] sm:$0xff] %vm19_vm0, %v1874_v15  ;;  %v1824_v29 = vld [vmem:[%s2896_s0 + $0x100] ss:$8 sps:$4 sm:$0xff]   ;;  %v1798_v30 = vld [vmem:[%s2896_s0 + $0x34] ss:$8 sps:$4 sm:$0xff]  }
   0xe   :  { %587 = vmatpush1.bf16.msra.mxu0 %v1776_v4  ;;  %1758 = vmatpush1.bf16.msra.mxu1 %v1776_v4  ;;  %43 = vst.msk [vmem:[#allocation2 + $0xb8] sm:$0xff] %vm19_vm0, %v1874_v15  ;;  %44 = vst.msk [vmem:[#allocation2 + $0xc0] sm:$0xff] %vm19_vm0, %v1874_v15  ;;  %v1828_v31 = vld [vmem:[%s2896_s0 + $0x114] ss:$8 sps:$4 sm:$0xff]   ;;  %v1800_v32 = vld [vmem:[%s2896_s0 + $0x30] ss:$8 sps:$4 sm:$0xff]  }
   0xf   :  { %588 = vmatprep.subr.bf16.mxu0 %v1873_v0  ;;  %1743 = vmatprep.subr.bf16.mxu1 %v1873_v0  ;;  %45 = vst.msk [vmem:[#allocation2 + $0xc8] sm:$0xff] %vm19_vm0, %v1874_v15  ;;  %46 = vst.msk [vmem:[#allocation2 + $0xd0] sm:$0xff] %vm19_vm0, %v1874_v15  ;;  %v1830_v33 = vld [vmem:[%s2896_s0 + $0x110] ss:$8 sps:$4 sm:$0xff]   ;;  %v1801_v34 = vld [vmem:[%s2896_s0 + $0x44] ss:$8 sps:$4 sm:$0xff]  }
  0x10   :  { %47 = vst.msk [vmem:[#allocation2 + $0xd8] sm:$0xff] %vm19_vm0, %v1874_v15  ;;  %48 = vst.msk [vmem:[#allocation2 + $0xe0] sm:$0xff] %vm19_vm0, %v1874_v15  ;;  %v1834_v35 = vld [vmem:[%s2896_s0 + $0x124] ss:$8 sps:$4 sm:$0xff]   ;;  %v1803_v36 = vld [vmem:[%s2896_s0 + $0x40] ss:$8 sps:$4 sm:$0xff]  }
  0x11   :  { %49 = vst.msk [vmem:[#allocation2 + $0xe8] sm:$0xff] %vm19_vm0, %v1874_v15  ;;  %50 = vst.msk [vmem:[#allocation2 + $0xf0] sm:$0xff] %vm19_vm0, %v1874_v15  ;;  %v1836_v37 = vld [vmem:[%s2896_s0 + $0x120] ss:$8 sps:$4 sm:$0xff]   ;;  %v1804_v38 = vld [vmem:[%s2896_s0 + $0x54] ss:$8 sps:$4 sm:$0xff]  }
  0x12   :  { %589 = vmatpush1.bf16.msra.mxu0 %v1777_v5  ;;  %1759 = vmatpush1.bf16.msra.mxu1 %v1777_v5  ;;  %51 = vst.msk [vmem:[#allocation2 + $0xf8] sm:$0xff] %vm19_vm0, %v1874_v15  ;;  %52 = vst.msk [vmem:[#allocation2 + $0x100] sm:$0xff] %vm19_vm0, %v1874_v15  ;;  %v1840_v39 = vld [vmem:[%s2896_s0 + $0x134] ss:$8 sps:$4 sm:$0xff]   ;;  %v1806_v40 = vld [vmem:[%s2896_s0 + $0x50] ss:$8 sps:$4 sm:$0xff]  }
  0x13   :  { %590 = vmatprep.subr.bf16.mxu0 %v1873_v0  ;;  %1744 = vmatprep.subr.bf16.mxu1 %v1873_v0  ;;  %53 = vst.msk [vmem:[#allocation2 + $0x108] sm:$0xff] %vm19_vm0, %v1874_v15  ;;  %54 = vst.msk [vmem:[#allocation2 + $0x110] sm:$0xff] %vm19_vm0, %v1874_v15  ;;  %v1842_v41 = vld [vmem:[%s2896_s0 + $0x130] ss:$8 sps:$4 sm:$0xff]   ;;  %v1807_v42 = vld [vmem:[%s2896_s0 + $0x64] ss:$8 sps:$4 sm:$0xff]  }
  0x14   :  { %55 = vst.msk [vmem:[#allocation2 + $0x118] sm:$0xff] %vm19_vm0, %v1874_v15  ;;  %56 = vst.msk [vmem:[#allocation2 + $0x120] sm:$0xff] %vm19_vm0, %v1874_v15  ;;  %v1846_v43 = vld [vmem:[%s2896_s0 + $0x144] ss:$8 sps:$4 sm:$0xff]   ;;  %v1809_v44 = vld [vmem:[%s2896_s0 + $0x60] ss:$8 sps:$4 sm:$0xff]  }
  0x15   :  { %57 = vst.msk [vmem:[#allocation2 + $0x128] sm:$0xff] %vm19_vm0, %v1874_v15  ;;  %58 = vst.msk [vmem:[#allocation2 + $0x130] sm:$0xff] %vm19_vm0, %v1874_v15  ;;  %v1848_v45 = vld [vmem:[%s2896_s0 + $0x140] ss:$8 sps:$4 sm:$0xff]   ;;  %v1813_v46 = vld [vmem:[%s2896_s0 + $0x74] ss:$8 sps:$4 sm:$0xff]  }
  0x16   :  { %591 = vmatpush1.bf16.msra.mxu0 %v1778_v7  ;;  %1760 = vmatpush1.bf16.msra.mxu1 %v1778_v7  ;;  %59 = vst.msk [vmem:[#allocation2 + $0x138] sm:$0xff] %vm19_vm0, %v1874_v15  ;;  %60 = vst.msk [vmem:[#allocation2 + $0x140] sm:$0xff] %vm19_vm0, %v1874_v15  ;;  %v1852_v47 = vld [vmem:[%s2896_s0 + $0x154] ss:$8 sps:$4 sm:$0xff]   ;;  %v1815_v48 = vld [vmem:[%s2896_s0 + $0x70] ss:$8 sps:$4 sm:$0xff]  }
  0x17   :  { %592 = vmatprep.subr.bf16.mxu0 %v1873_v0  ;;  %1745 = vmatprep.subr.bf16.mxu1 %v1873_v0  ;;  %61 = vst.msk [vmem:[#allocation2 + $0x148] sm:$0xff] %vm19_vm0, %v1874_v15  ;;  %62 = vst.msk [vmem:[#allocation2 + $0x150] sm:$0xff] %vm19_vm0, %v1874_v15  ;;  %v1854_v49 = vld [vmem:[%s2896_s0 + $0x150] ss:$8 sps:$4 sm:$0xff]   ;;  %v1819_v50 = vld [vmem:[%s2896_s0 + $0x84] ss:$8 sps:$4 sm:$0xff]  }
  0x18   :  { %63 = vst.msk [vmem:[#allocation2 + $0x158] sm:$0xff] %vm19_vm0, %v1874_v15  ;;  %64 = vst.msk [vmem:[#allocation2 + $0x160] sm:$0xff] %vm19_vm0, %v1874_v15  ;;  %v1855_v51 = vld [vmem:[%s2896_s0 + $0x164] ss:$8 sps:$4 sm:$0xff]   ;;  %v1821_v52 = vld [vmem:[%s2896_s0 + $0x80] ss:$8 sps:$4 sm:$0xff]  }
  0x19   :  { %65 = vst.msk [vmem:[#allocation2 + $0x168] sm:$0xff] %vm19_vm0, %v1874_v15  ;;  %66 = vst.msk [vmem:[#allocation2 + $0x170] sm:$0xff] %vm19_vm0, %v1874_v15  ;;  %v1857_v53 = vld [vmem:[%s2896_s0 + $0x160] ss:$8 sps:$4 sm:$0xff]   ;;  %v1825_v54 = vld [vmem:[%s2896_s0 + $0x94] ss:$8 sps:$4 sm:$0xff]  }
  0x1a   :  { %593 = vmatpush1.bf16.msra.mxu0 %v1779_v8  ;;  %1761 = vmatpush1.bf16.msra.mxu1 %v1779_v8  ;;  %67 = vst.msk [vmem:[#allocation2 + $0x178] sm:$0xff] %vm19_vm0, %v1874_v15  ;;  %68 = vst.msk [vmem:[#allocation2 + $0x180] sm:$0xff] %vm19_vm0, %v1874_v15  ;;  %v1858_v55 = vld [vmem:[%s2896_s0 + $0x174] ss:$8 sps:$4 sm:$0xff]   ;;  %v1827_v56 = vld [vmem:[%s2896_s0 + $0x90] ss:$8 sps:$4 sm:$0xff]  }
  0x1b   :  { %594 = vmatprep.subr.bf16.mxu0 %v1873_v0  ;;  %1746 = vmatprep.subr.bf16.mxu1 %v1873_v0  ;;  %69 = vst.msk [vmem:[#allocation2 + $0x188] sm:$0xff] %vm19_vm0, %v1874_v15  ;;  %70 = vst.msk [vmem:[#allocation2 + $0x190] sm:$0xff] %vm19_vm0, %v1874_v15  ;;  %v1860_v57 = vld [vmem:[%s2896_s0 + $0x170] ss:$8 sps:$4 sm:$0xff]   ;;  %v1831_v58 = vld [vmem:[%s2896_s0 + $0xa4] ss:$8 sps:$4 sm:$0xff]  }
  0x1c   :  { %71 = vst.msk [vmem:[#allocation2 + $0x198] sm:$0xff] %vm19_vm0, %v1874_v15  ;;  %72 = vst.msk [vmem:[#allocation2 + $0x1a0] sm:$0xff] %vm19_vm0, %v1874_v15  ;;  %v1861_v59 = vld [vmem:[%s2896_s0 + $0x184] ss:$8 sps:$4 sm:$0xff]   ;;  %v1833_v60 = vld [vmem:[%s2896_s0 + $0xa0] ss:$8 sps:$4 sm:$0xff]  }
  0x1d   :  { %73 = vst.msk [vmem:[#allocation2 + $0x1a8] sm:$0xff] %vm19_vm0, %v1874_v15  ;;  %v1863_v61 = vld [vmem:[%s2896_s0 + $0x180] ss:$8 sps:$4 sm:$0xff]   ;;  %v1837_v62 = vld [vmem:[%s2896_s0 + $0xb4] ss:$8 sps:$4 sm:$0xff]  }
  0x1e   :  { %595 = vmatpush1.bf16.msra.mxu0 %v1780_v9  ;;  %1762 = vmatpush1.bf16.msra.mxu1 %v1780_v9  ;;  %v1864_v63 = vld [vmem:[%s2896_s0 + $0x194] ss:$8 sps:$4 sm:$0xff]   ;;  %v1866_v1 = vld [vmem:[%s2896_s0 + $0x190] ss:$8 sps:$4 sm:$0xff]   ;;  %v1843_v2 = vld [vmem:[%s2896_s0 + $0xc4] ss:$8 sps:$4 sm:$0xff]  }
  0x1f   :  { %596 = vmatprep.subr.bf16.mxu0 %v1873_v0  ;;  %1747 = vmatprep.subr.bf16.mxu1 %v1873_v0  ;;  %v1867_v3 = vld [vmem:[%s2896_s0 + $0x1a4] ss:$8 sps:$4 sm:$0xff]   ;;  %v1845_v4 = vld [vmem:[%s2896_s0 + $0xc0] ss:$8 sps:$4 sm:$0xff]   ;;  %v1849_v6 = vld [vmem:[%s2896_s0 + $0xd4] ss:$8 sps:$4 sm:$0xff]  }
  0x20   :  { %v1869_v5 = vld [vmem:[%s2896_s0 + $0x1a0] ss:$8 sps:$4 sm:$0xff]   ;;  %v1851_v7 = vld [vmem:[%s2896_s0 + $0xd0] ss:$8 sps:$4 sm:$0xff]  }
  0x21   :  { %v74_v8 = vld [vmem:[#allocation2] sm:$0xff]  ;;  %v75_v15 = vld [vmem:[#allocation2 + $0x8] sm:$0xff] }
  0x22   :  { %597 = vmatpush2.bf16.msra.mxu0 %v1781_v11  ;;  %1763 = vmatpush2.bf16.msra.mxu1 %v1781_v11  ;;  %v102_v9 = vld [vmem:[#allocation2 + $0xe0] sm:$0xff] }
  0x23   :  { %598 = vmatprep.subr.bf16.mxu0 %v1873_v0  ;;  %1748 = vmatprep.subr.bf16.mxu1 %v1873_v0 }
  0x26   :  { %599 = vmatpush2.bf16.msra.mxu0 %v1782_v12  ;;  %1764 = vmatpush2.bf16.msra.mxu1 %v1782_v12 }
  0x27   :  { %600 = vmatprep.subr.bf16.mxu0 %v1873_v0  ;;  %1749 = vmatprep.subr.bf16.mxu1 %v1873_v0 }
  0x2a   :  { %601 = vmatpush2.bf16.msra.mxu0 %v1783_v13  ;;  %1765 = vmatpush2.bf16.msra.mxu1 %v1783_v13 }
  0x2b   :  { %602 = vmatprep.subr.bf16.mxu0 %v1873_v0  ;;  %1750 = vmatprep.subr.bf16.mxu1 %v1873_v0 }
  0x2e   :  { %603 = vmatpush2.bf16.msra.mxu0 %v1784_v14  ;;  %1766 = vmatpush2.bf16.msra.mxu1 %v1784_v14 }
  0x2f   :  { %604 = vmatprep.subr.bf16.mxu0 %v1873_v0  ;;  %1751 = vmatprep.subr.bf16.mxu1 %v1873_v0 }
  0x32   :  { %605 = vmatpush2.bf16.msra.mxu0 %v1785_v16  ;;  %1767 = vmatpush2.bf16.msra.mxu1 %v1785_v16 }
  0x33   :  { %606 = vmatprep.subr.bf16.mxu0 %v1873_v0  ;;  %1752 = vmatprep.subr.bf16.mxu1 %v1873_v0 }
  0x36   :  { %607 = vmatpush2.bf16.msra.mxu0 %v1786_v17  ;;  %1768 = vmatpush2.bf16.msra.mxu1 %v1786_v17  ;;  %v103_v17 = vld [vmem:[#allocation2 + $0xe8] sm:$0xff] }
  0x37   :  { %608 = vmatprep.subr.bf16.mxu0 %v1873_v0  ;;  %1753 = vmatprep.subr.bf16.mxu1 %v1873_v0 }
  0x3a   :  { %609 = vmatpush2.bf16.msra.mxu0 %v1787_v18  ;;  %1769 = vmatpush2.bf16.msra.mxu1 %v1787_v18 }
  0x3b   :  { %610 = vmatprep.subr.bf16.mxu0 %v1873_v0  ;;  %1754 = vmatprep.subr.bf16.mxu1 %v1873_v0  ;;  %v1839_v0 = vld [vmem:[%s2896_s0 + $0xb0] ss:$8 sps:$4 sm:$0xff]  }
  0x3e   :  { %611 = vmatpush2.bf16.msra.mxu0 %v1788_v19  ;;  %1770 = vmatpush2.bf16.msra.mxu1 %v1788_v19 }
  0x41   :  { %613 = vmatmul.mubr.bf16.vlgmr.msra.gmra.mxu0 %v1789_v20  ;;  %725 = vmatmul.mubr.bf16.vlgmr.msra.gmra.mxu1 %v1810_v21 }
  0x42   :  { %620 = vmatprep.mubr.bf16.mxu0 %v1792_v22  ;;  %732 = vmatprep.mubr.bf16.mxu1 %v1816_v23  ;;  %v76_v23 = vld [vmem:[#allocation2 + $0x10] sm:$0xff] }
  0x49   :  { %621 = vmatmul.mubr.bf16.gmra.mxu0 %v1794_v24  ;;  %733 = vmatmul.mubr.bf16.gmra.mxu1 %v1818_v25  ;;  %v104_v25 = vld [vmem:[#allocation2 + $0xf0] sm:$0xff] }
  0x4a   :  { %628 = vmatprep.mubr.bf16.mxu0 %v1795_v26  ;;  %740 = vmatprep.mubr.bf16.mxu1 %v1822_v27 }
  0x51   :  { %629 = vmatmul.mubr.bf16.gmra.mxu0 %v1797_v28  ;;  %741 = vmatmul.mubr.bf16.gmra.mxu1 %v1824_v29  ;;  %v77_v29 = vld [vmem:[#allocation2 + $0x18] sm:$0xff] }
  0x52   :  { %636 = vmatprep.mubr.bf16.mxu0 %v1798_v30  ;;  %748 = vmatprep.mubr.bf16.mxu1 %v1828_v31 }
  0x59   :  { %637 = vmatmul.mubr.bf16.gmra.mxu0 %v1800_v32  ;;  %749 = vmatmul.mubr.bf16.gmra.mxu1 %v1830_v33 }
  0x5a   :  { %644 = vmatprep.mubr.bf16.mxu0 %v1801_v34  ;;  %756 = vmatprep.mubr.bf16.mxu1 %v1834_v35  ;;  %v105_v35 = vld [vmem:[#allocation2 + $0xf8] sm:$0xff] }
  0x61   :  { %645 = vmatmul.mubr.bf16.gmra.mxu0 %v1803_v36  ;;  %757 = vmatmul.mubr.bf16.gmra.mxu1 %v1836_v37 }
  0x62   :  { %652 = vmatprep.mubr.bf16.mxu0 %v1804_v38  ;;  %764 = vmatprep.mubr.bf16.mxu1 %v1840_v39 }
  0x69   :  { %653 = vmatmul.mubr.bf16.gmra.mxu0 %v1806_v40  ;;  %765 = vmatmul.mubr.bf16.gmra.mxu1 %v1842_v41  ;;  %v78_v41 = vld [vmem:[#allocation2 + $0x20] sm:$0xff] }
  0x6a   :  { %660 = vmatprep.mubr.bf16.mxu0 %v1807_v42  ;;  %772 = vmatprep.mubr.bf16.mxu1 %v1846_v43 }
  0x71   :  { %661 = vmatmul.mubr.bf16.gmra.mxu0 %v1809_v44  ;;  %773 = vmatmul.mubr.bf16.gmra.mxu1 %v1848_v45 }
  0x72   :  { %668 = vmatprep.mubr.bf16.mxu0 %v1813_v46  ;;  %780 = vmatprep.mubr.bf16.mxu1 %v1852_v47  ;;  %v106_v47 = vld [vmem:[#allocation2 + $0x100] sm:$0xff] }
  0x79   :  { %669 = vmatmul.mubr.bf16.gmra.mxu0 %v1815_v48  ;;  %781 = vmatmul.mubr.bf16.gmra.mxu1 %v1854_v49 }
  0x7a   :  { %676 = vmatprep.mubr.bf16.mxu0 %v1819_v50  ;;  %788 = vmatprep.mubr.bf16.mxu1 %v1855_v51 }
  0x81   :  { %677 = vmatmul.mubr.bf16.gmra.mxu0 %v1821_v52  ;;  %789 = vmatmul.mubr.bf16.gmra.mxu1 %v1857_v53  ;;  %v79_v53 = vld [vmem:[#allocation2 + $0x28] sm:$0xff] }
  0x82   :  { %684 = vmatprep.mubr.bf16.mxu0 %v1825_v54  ;;  %796 = vmatprep.mubr.bf16.mxu1 %v1858_v55 }
  0x89   :  { %685 = vmatmul.mubr.bf16.gmra.mxu0 %v1827_v56  ;;  %797 = vmatmul.mubr.bf16.gmra.mxu1 %v1860_v57 }
  0x8a   :  { %692 = vmatprep.mubr.bf16.mxu0 %v1831_v58  ;;  %804 = vmatprep.mubr.bf16.mxu1 %v1861_v59  ;;  %v107_v59 = vld [vmem:[#allocation2 + $0x108] sm:$0xff] }
  0x91   :  { %693 = vmatmul.mubr.bf16.gmra.mxu0 %v1833_v60  ;;  %805 = vmatmul.mubr.bf16.gmra.mxu1 %v1863_v61 }
  0x92   :  { %700 = vmatprep.mubr.bf16.mxu0 %v1837_v62  ;;  %812 = vmatprep.mubr.bf16.mxu1 %v1864_v63 }
  0x99   :  { %701 = vmatmul.mubr.bf16.gmra.mxu0 %v1839_v0  ;;  %813 = vmatmul.mubr.bf16.gmra.mxu1 %v1866_v1  ;;  %v80_v1 = vld [vmem:[#allocation2 + $0x30] sm:$0xff] }
  0x9a   :  { %708 = vmatprep.mubr.bf16.mxu0 %v1843_v2  ;;  %820 = vmatprep.mubr.bf16.mxu1 %v1867_v3 }
  0xa1   :  { %709 = vmatmul.mubr.bf16.gmra.mxu0 %v1845_v4  ;;  %821 = vmatmul.mubr.bf16.gmra.mxu1 %v1869_v5 }
  0xa2   :  { %716 = vmatprep.mubr.bf16.mxu0 %v1849_v6 }
  0xa9   :  { %717 = vmatmul.mubr.bf16.gmra.mxu0 %v1851_v7  ;;  %v108_v7 = vld [vmem:[#allocation2 + $0x110] sm:$0xff] }
 0x101   :  { %v614_v10 = vpop.f32.mrf.mxu0  ;;  %v726_v11 = vpop.f32.mrf.mxu1 }
 0x102   :  { %v829_v12 = vadd.f32 %v614_v10, %v74_v8  ;;  %v857_v13 = vadd.f32 %v726_v11, %v102_v9 }
 0x103   :  { %v616_v14 = vpop.f32.mrf.mxu0  ;;  %v728_v16 = vpop.f32.mrf.mxu1 }
 0x104   :  { %884 = vst.msk [vmem:[#allocation2] sm:$0xff] %vm19_vm0, %v829_v12  ;;  %912 = vst.msk [vmem:[#allocation2 + $0xe0] sm:$0xff] %vm19_vm0, %v857_v13  ;;  %v81_v13 = vld [vmem:[#allocation2 + $0x38] sm:$0xff] }
 0x105   :  { %v617_v18 = vpop.f32.mrf.mxu0  ;;  %v729_v19 = vpop.f32.mrf.mxu1 }
 0x106   :  { %v830_v20 = vadd.f32 %v617_v18, %v75_v15  ;;  %v858_v21 = vadd.f32 %v729_v19, %v103_v17  ;;  %v109_v19 = vld [vmem:[#allocation2 + $0x118] sm:$0xff] }
 0x107   :  { %v619_v22 = vpop.f32.mrf.mxu0  ;;  %v731_v24 = vpop.f32.mrf.mxu1 }
 0x108   :  { %885 = vst.msk [vmem:[#allocation2 + $0x8] sm:$0xff] %vm19_vm0, %v830_v20  ;;  %913 = vst.msk [vmem:[#allocation2 + $0xe8] sm:$0xff] %vm19_vm0, %v858_v21 }
 0x109   :  { %v622_v26 = vpop.f32.mrf.mxu0  ;;  %v734_v27 = vpop.f32.mrf.mxu1 }
 0x10a   :  { %v831_v28 = vadd.f32 %v622_v26, %v76_v23  ;;  %v859_v30 = vadd.f32 %v734_v27, %v104_v25  ;;  %v82_v25 = vld [vmem:[#allocation2 + $0x40] sm:$0xff] }
 0x10b   :  { %v2200_v31 = vld [vmem:[#allocation2] sm:$0xff]  ;;  %v624_v32 = vpop.f32.mrf.mxu0  ;;  %v736_v34 = vpop.f32.mrf.mxu1 }
 0x10c   :  { %v969_v33 = vld [vmem:[#allocation2 + $0xe0] sm:$0xff]  ;;  %v1685_v36 = vpack.c.bf16 %v2200_v31, %v2200_v31  ;;  %886 = vst.msk [vmem:[#allocation2 + $0x10] sm:$0xff] %vm19_vm0, %v831_v28  ;;  %914 = vst.msk [vmem:[#allocation2 + $0xf0] sm:$0xff] %vm19_vm0, %v859_v30 }
 0x10d   :  { %v1713_v37 = vpack.c.bf16 %v969_v33, %v969_v33  ;;  %v625_v38 = vpop.f32.mrf.mxu0  ;;  %v737_v39 = vpop.f32.mrf.mxu1  ;;  %v110_v32 = vld [vmem:[#allocation2 + $0x120] sm:$0xff] }
 0x10e   :  { %1212 = vst.msk [vmem:[%s2897_s2] sm:$0xf] %vm1211_vm1, %v1685_v36  ;;  %v832_v40 = vadd.f32 %v625_v38, %v77_v29  ;;  %v860_v42 = vadd.f32 %v737_v39, %v105_v35  ;;  %v83_v38 = vld [vmem:[#allocation2 + $0x48] sm:$0xff] }
 0x10f   :  { %1240 = vst.msk [vmem:[%s2897_s2 + $0x70] sm:$0xf] %vm1211_vm1, %v1713_v37  ;;  %v2214_v43 = vld [vmem:[#allocation2 + $0x8] sm:$0xff]  ;;  %v627_v44 = vpop.f32.mrf.mxu0  ;;  %v739_v46 = vpop.f32.mrf.mxu1 }
 0x110   :  { %v970_v45 = vld [vmem:[#allocation2 + $0xe8] sm:$0xff]  ;;  %v1686_v48 = vpack.c.bf16 %v2214_v43, %v2214_v43  ;;  %887 = vst.msk [vmem:[#allocation2 + $0x18] sm:$0xff] %vm19_vm0, %v832_v40  ;;  %915 = vst.msk [vmem:[#allocation2 + $0xf8] sm:$0xff] %vm19_vm0, %v860_v42 }
 0x111   :  { %v1714_v49 = vpack.c.bf16 %v970_v45, %v970_v45  ;;  %v630_v50 = vpop.f32.mrf.mxu0  ;;  %v742_v51 = vpop.f32.mrf.mxu1  ;;  %v111_v45 = vld [vmem:[#allocation2 + $0x128] sm:$0xff] }
 0x112   :  { %1213 = vst.msk [vmem:[%s2897_s2 + $0x4] sm:$0xf] %vm1211_vm1, %v1686_v48  ;;  %v833_v52 = vadd.f32 %v630_v50, %v78_v41  ;;  %v861_v54 = vadd.f32 %v742_v51, %v106_v47  ;;  %v84_v51 = vld [vmem:[#allocation2 + $0x50] sm:$0xff] }
 0x113   :  { %1241 = vst.msk [vmem:[%s2897_s2 + $0x74] sm:$0xf] %vm1211_vm1, %v1714_v49  ;;  %v2228_v55 = vld [vmem:[#allocation2 + $0x10] sm:$0xff]  ;;  %v632_v56 = vpop.f32.mrf.mxu0  ;;  %v744_v58 = vpop.f32.mrf.mxu1 }
 0x114   :  { %v971_v57 = vld [vmem:[#allocation2 + $0xf0] sm:$0xff]  ;;  %v1687_v60 = vpack.c.bf16 %v2228_v55, %v2228_v55  ;;  %888 = vst.msk [vmem:[#allocation2 + $0x20] sm:$0xff] %vm19_vm0, %v833_v52  ;;  %916 = vst.msk [vmem:[#allocation2 + $0x100] sm:$0xff] %vm19_vm0, %v861_v54 }
 0x115   :  { %v1715_v61 = vpack.c.bf16 %v971_v57, %v971_v57  ;;  %v633_v62 = vpop.f32.mrf.mxu0  ;;  %v745_v63 = vpop.f32.mrf.mxu1  ;;  %v112_v58 = vld [vmem:[#allocation2 + $0x130] sm:$0xff] }
 0x116   :  { %1214 = vst.msk [vmem:[%s2897_s2 + $0x8] sm:$0xf] %vm1211_vm1, %v1687_v60  ;;  %v834_v0 = vadd.f32 %v633_v62, %v79_v53  ;;  %v862_v2 = vadd.f32 %v745_v63, %v107_v59 }
 0x117   :  { %1242 = vst.msk [vmem:[%s2897_s2 + $0x78] sm:$0xf] %vm1211_vm1, %v1715_v61  ;;  %v2242_v3 = vld [vmem:[#allocation2 + $0x18] sm:$0xff]  ;;  %v635_v4 = vpop.f32.mrf.mxu0  ;;  %v747_v6 = vpop.f32.mrf.mxu1 }
 0x118   :  { %v2244_v5 = vld [vmem:[#allocation2 + $0xf8] sm:$0xff]  ;;  %v1688_v8 = vpack.c.bf16 %v2242_v3, %v2242_v3  ;;  %889 = vst.msk [vmem:[#allocation2 + $0x28] sm:$0xff] %vm19_vm0, %v834_v0  ;;  %917 = vst.msk [vmem:[#allocation2 + $0x108] sm:$0xff] %vm19_vm0, %v862_v2 }
 0x119   :  { %v1716_v9 = vpack.c.bf16 %v2244_v5, %v2244_v5  ;;  %v638_v10 = vpop.f32.mrf.mxu0  ;;  %v750_v11 = vpop.f32.mrf.mxu1  ;;  %v85_v0 = vld [vmem:[#allocation2 + $0x58] sm:$0xff] }
 0x11a   :  { %1215 = vst.msk [vmem:[%s2897_s2 + $0xc] sm:$0xf] %vm1211_vm1, %v1688_v8  ;;  %v835_v12 = vadd.f32 %v638_v10, %v80_v1  ;;  %v863_v14 = vadd.f32 %v750_v11, %v108_v7  ;;  %v113_v8 = vld [vmem:[#allocation2 + $0x138] sm:$0xff] }
 0x11b   :  { %1243 = vst.msk [vmem:[%s2897_s2 + $0x7c] sm:$0xf] %vm1211_vm1, %v1716_v9  ;;  %v2260_v15 = vld [vmem:[#allocation2 + $0x20] sm:$0xff]  ;;  %v640_v16 = vpop.f32.mrf.mxu0  ;;  %v752_v18 = vpop.f32.mrf.mxu1 }
 0x11c   :  { %v2262_v17 = vld [vmem:[#allocation2 + $0x100] sm:$0xff]  ;;  %v1689_v20 = vpack.c.bf16 %v2260_v15, %v2260_v15  ;;  %890 = vst.msk [vmem:[#allocation2 + $0x30] sm:$0xff] %vm19_vm0, %v835_v12  ;;  %918 = vst.msk [vmem:[#allocation2 + $0x110] sm:$0xff] %vm19_vm0, %v863_v14 }
 0x11d   :  { %v1717_v21 = vpack.c.bf16 %v2262_v17, %v2262_v17  ;;  %v641_v22 = vpop.f32.mrf.mxu0  ;;  %v753_v23 = vpop.f32.mrf.mxu1  ;;  %v86_v14 = vld [vmem:[#allocation2 + $0x60] sm:$0xff] }
 0x11e   :  { %1216 = vst.msk [vmem:[%s2897_s2 + $0x10] sm:$0xf] %vm1211_vm1, %v1689_v20  ;;  %v836_v24 = vadd.f32 %v641_v22, %v81_v13  ;;  %v864_v26 = vadd.f32 %v753_v23, %v109_v19  ;;  %v114_v22 = vld [vmem:[#allocation2 + $0x140] sm:$0xff] }
 0x11f   :  { %1244 = vst.msk [vmem:[%s2897_s2 + $0x80] sm:$0xf] %vm1211_vm1, %v1717_v21  ;;  %v2278_v27 = vld [vmem:[#allocation2 + $0x28] sm:$0xff]  ;;  %v643_v28 = vpop.f32.mrf.mxu0  ;;  %v755_v30 = vpop.f32.mrf.mxu1 }
 0x120   :  { %v2280_v29 = vld [vmem:[#allocation2 + $0x108] sm:$0xff]  ;;  %v1690_v33 = vpack.c.bf16 %v2278_v27, %v2278_v27  ;;  %891 = vst.msk [vmem:[#allocation2 + $0x38] sm:$0xff] %vm19_vm0, %v836_v24  ;;  %919 = vst.msk [vmem:[#allocation2 + $0x118] sm:$0xff] %vm19_vm0, %v864_v26 }
 0x121   :  { %v1718_v34 = vpack.c.bf16 %v2280_v29, %v2280_v29  ;;  %v646_v35 = vpop.f32.mrf.mxu0  ;;  %v758_v36 = vpop.f32.mrf.mxu1  ;;  %v87_v30 = vld [vmem:[#allocation2 + $0x68] sm:$0xff] }
 0x122   :  { %1217 = vst.msk [vmem:[%s2897_s2 + $0x14] sm:$0xf] %vm1211_vm1, %v1690_v33  ;;  %v837_v37 = vadd.f32 %v646_v35, %v82_v25  ;;  %v865_v39 = vadd.f32 %v758_v36, %v110_v32 }
 0x123   :  { %1245 = vst.msk [vmem:[%s2897_s2 + $0x84] sm:$0xf] %vm1211_vm1, %v1718_v34  ;;  %v2296_v40 = vld [vmem:[#allocation2 + $0x30] sm:$0xff]  ;;  %v648_v41 = vpop.f32.mrf.mxu0  ;;  %v760_v44 = vpop.f32.mrf.mxu1 }
 0x124   :  { %v2298_v42 = vld [vmem:[#allocation2 + $0x110] sm:$0xff]  ;;  %v1691_v46 = vpack.c.bf16 %v2296_v40, %v2296_v40  ;;  %892 = vst.msk [vmem:[#allocation2 + $0x40] sm:$0xff] %vm19_vm0, %v837_v37  ;;  %920 = vst.msk [vmem:[#allocation2 + $0x120] sm:$0xff] %vm19_vm0, %v865_v39  ;;  %v115_v37 = vld [vmem:[#allocation2 + $0x148] sm:$0xff] }
 0x125   :  { %v1719_v47 = vpack.c.bf16 %v2298_v42, %v2298_v42  ;;  %v649_v48 = vpop.f32.mrf.mxu0  ;;  %v761_v49 = vpop.f32.mrf.mxu1 }
 0x126   :  { %1218 = vst.msk [vmem:[%s2897_s2 + $0x18] sm:$0xf] %vm1211_vm1, %v1691_v46  ;;  %v838_v50 = vadd.f32 %v649_v48, %v83_v38  ;;  %v866_v52 = vadd.f32 %v761_v49, %v111_v45  ;;  %v88_v46 = vld [vmem:[#allocation2 + $0x70] sm:$0xff] }
 0x127   :  { %1246 = vst.msk [vmem:[%s2897_s2 + $0x88] sm:$0xf] %vm1211_vm1, %v1719_v47  ;;  %v2314_v53 = vld [vmem:[#allocation2 + $0x38] sm:$0xff]  ;;  %v651_v54 = vpop.f32.mrf.mxu0  ;;  %v763_v57 = vpop.f32.mrf.mxu1 }
 0x128   :  { %v2316_v56 = vld [vmem:[#allocation2 + $0x118] sm:$0xff]  ;;  %v1692_v59 = vpack.c.bf16 %v2314_v53, %v2314_v53  ;;  %893 = vst.msk [vmem:[#allocation2 + $0x48] sm:$0xff] %vm19_vm0, %v838_v50  ;;  %921 = vst.msk [vmem:[#allocation2 + $0x128] sm:$0xff] %vm19_vm0, %v866_v52  ;;  %v116_v52 = vld [vmem:[#allocation2 + $0x150] sm:$0xff] }
 0x129   :  { %v1720_v60 = vpack.c.bf16 %v2316_v56, %v2316_v56  ;;  %v654_v61 = vpop.f32.mrf.mxu0  ;;  %v766_v62 = vpop.f32.mrf.mxu1 }
 0x12a   :  { %1219 = vst.msk [vmem:[%s2897_s2 + $0x1c] sm:$0xf] %vm1211_vm1, %v1692_v59  ;;  %v839_v63 = vadd.f32 %v654_v61, %v84_v51  ;;  %v867_v1 = vadd.f32 %v766_v62, %v112_v58  ;;  %v89_v61 = vld [vmem:[#allocation2 + $0x78] sm:$0xff] }
 0x12b   :  { %1247 = vst.msk [vmem:[%s2897_s2 + $0x8c] sm:$0xf] %vm1211_vm1, %v1720_v60  ;;  %v2332_v2 = vld [vmem:[#allocation2 + $0x40] sm:$0xff]  ;;  %v656_v4 = vpop.f32.mrf.mxu0  ;;  %v768_v7 = vpop.f32.mrf.mxu1 }
 0x12c   :  { %v2334_v6 = vld [vmem:[#allocation2 + $0x120] sm:$0xff]  ;;  %v1693_v9 = vpack.c.bf16 %v2332_v2, %v2332_v2  ;;  %894 = vst.msk [vmem:[#allocation2 + $0x50] sm:$0xff] %vm19_vm0, %v839_v63  ;;  %922 = vst.msk [vmem:[#allocation2 + $0x130] sm:$0xff] %vm19_vm0, %v867_v1  ;;  %v117_v7 = vld [vmem:[#allocation2 + $0x158] sm:$0xff] }
 0x12d   :  { %v1721_v10 = vpack.c.bf16 %v2334_v6, %v2334_v6  ;;  %v657_v11 = vpop.f32.mrf.mxu0  ;;  %v769_v12 = vpop.f32.mrf.mxu1 }
 0x12e   :  { %1220 = vst.msk [vmem:[%s2897_s2 + $0x20] sm:$0xf] %vm1211_vm1, %v1693_v9  ;;  %v840_v13 = vadd.f32 %v657_v11, %v85_v0  ;;  %v868_v16 = vadd.f32 %v769_v12, %v113_v8 }
 0x12f   :  { %1248 = vst.msk [vmem:[%s2897_s2 + $0x90] sm:$0xf] %vm1211_vm1, %v1721_v10  ;;  %v2350_v18 = vld [vmem:[#allocation2 + $0x48] sm:$0xff]  ;;  %v659_v19 = vpop.f32.mrf.mxu0  ;;  %v771_v21 = vpop.f32.mrf.mxu1 }
 0x130   :  { %v2352_v20 = vld [vmem:[#allocation2 + $0x128] sm:$0xff]  ;;  %v1694_v23 = vpack.c.bf16 %v2350_v18, %v2350_v18  ;;  %895 = vst.msk [vmem:[#allocation2 + $0x58] sm:$0xff] %vm19_vm0, %v840_v13  ;;  %923 = vst.msk [vmem:[#allocation2 + $0x138] sm:$0xff] %vm19_vm0, %v868_v16  ;;  %v90_v13 = vld [vmem:[#allocation2 + $0x80] sm:$0xff] }
 0x131   :  { %v1722_v24 = vpack.c.bf16 %v2352_v20, %v2352_v20  ;;  %v662_v25 = vpop.f32.mrf.mxu0  ;;  %v774_v26 = vpop.f32.mrf.mxu1 }
 0x132   :  { %1221 = vst.msk [vmem:[%s2897_s2 + $0x24] sm:$0xf] %vm1211_vm1, %v1694_v23  ;;  %v841_v28 = vadd.f32 %v662_v25, %v86_v14  ;;  %v869_v32 = vadd.f32 %v774_v26, %v114_v22  ;;  %v118_v23 = vld [vmem:[#allocation2 + $0x160] sm:$0xff] }
 0x133   :  { %1249 = vst.msk [vmem:[%s2897_s2 + $0x94] sm:$0xf] %vm1211_vm1, %v1722_v24  ;;  %v2368_v33 = vld [vmem:[#allocation2 + $0x50] sm:$0xff]  ;;  %v664_v34 = vpop.f32.mrf.mxu0  ;;  %v776_v36 = vpop.f32.mrf.mxu1  ;;  %v1382_v24 = vmul.f32 %v2214_v43, %v2214_v43 }
 0x134   :  { %v2370_v35 = vld [vmem:[#allocation2 + $0x130] sm:$0xff]  ;;  %v1695_v38 = vpack.c.bf16 %v2368_v33, %v2368_v33  ;;  %896 = vst.msk [vmem:[#allocation2 + $0x60] sm:$0xff] %vm19_vm0, %v841_v28  ;;  %924 = vst.msk [vmem:[#allocation2 + $0x140] sm:$0xff] %vm19_vm0, %v869_v32  ;;  %v1381_v28 = vmul.f32 %v2200_v31, %v2200_v31  ;;  %v1267_v36 = vsel %vm19_vm0, %v2214_v43, 0.0 }
 0x135   :  { %v1723_v39 = vpack.c.bf16 %v2370_v35, %v2370_v35  ;;  %v665_v41 = vpop.f32.mrf.mxu0  ;;  %v777_v44 = vpop.f32.mrf.mxu1 }
 0x136   :  { %1222 = vst.msk [vmem:[%s2897_s2 + $0x28] sm:$0xf] %vm1211_vm1, %v1695_v38  ;;  %v842_v45 = vadd.f32 %v665_v41, %v87_v30  ;;  %v870_v47 = vadd.f32 %v777_v44, %v115_v37  ;;  %v1383_v30 = vmul.f32 %v2228_v55, %v2228_v55  ;;  %v91_v38 = vld [vmem:[#allocation2 + $0x88] sm:$0xff]  ;;  %v1266_v41 = vsel %vm19_vm0, %v2200_v31, 0.0 }
 0x137   :  { %1250 = vst.msk [vmem:[%s2897_s2 + $0x98] sm:$0xf] %vm1211_vm1, %v1723_v39  ;;  %v2386_v48 = vld [vmem:[#allocation2 + $0x58] sm:$0xff]  ;;  %v667_v49 = vpop.f32.mrf.mxu0  ;;  %v779_v51 = vpop.f32.mrf.mxu1  ;;  %v1384_v44 = vmul.f32 %v2242_v3, %v2242_v3 }
 0x138   :  { %v2388_v50 = vld [vmem:[#allocation2 + $0x138] sm:$0xff]  ;;  %v1696_v54 = vpack.c.bf16 %v2386_v48, %v2386_v48  ;;  %897 = vst.msk [vmem:[#allocation2 + $0x68] sm:$0xff] %vm19_vm0, %v842_v45  ;;  %925 = vst.msk [vmem:[#allocation2 + $0x148] sm:$0xff] %vm19_vm0, %v870_v47  ;;  %v119_v49 = vld [vmem:[#allocation2 + $0x168] sm:$0xff]  ;;  %v1436_v51 = vsel %vm19_vm0, %v1382_v24, 0.0 }
 0x139   :  { %v1724_v57 = vpack.c.bf16 %v2388_v50, %v2388_v50  ;;  %v670_v58 = vpop.f32.mrf.mxu0  ;;  %v782_v59 = vpop.f32.mrf.mxu1 }
 0x13a   :  { %1223 = vst.msk [vmem:[%s2897_s2 + $0x2c] sm:$0xf] %vm1211_vm1, %v1696_v54  ;;  %v843_v60 = vadd.f32 %v670_v58, %v88_v46  ;;  %v871_v62 = vadd.f32 %v782_v59, %v116_v52  ;;  %v1269_v52 = vsel %vm19_vm0, %v2228_v55, 0.0  ;;  %v1268_v58 = vadd.f32 %v1267_v36, %v1266_v41 }
 0x13b   :  { %1251 = vst.msk [vmem:[%s2897_s2 + $0x9c] sm:$0xf] %vm1211_vm1, %v1724_v57  ;;  %v2404_v63 = vld [vmem:[#allocation2 + $0x60] sm:$0xff]  ;;  %v672_v0 = vpop.f32.mrf.mxu0  ;;  %v784_v4 = vpop.f32.mrf.mxu1  ;;  %v1435_v57 = vsel %vm19_vm0, %v1381_v28, 0.0  ;;  %v1438_v59 = vsel %vm19_vm0, %v1383_v30, 0.0  ;;  %v1271_v55 = vsel %vm19_vm0, %v2242_v3, 0.0  ;;  %v1387_v28 = vmul.f32 %v2296_v40, %v2296_v40 }
 0x13c   :  { %v2406_v1 = vld [vmem:[#allocation2 + $0x140] sm:$0xff]  ;;  %v1697_v8 = vpack.c.bf16 %v2404_v63, %v2404_v63  ;;  %898 = vst.msk [vmem:[#allocation2 + $0x70] sm:$0xff] %vm19_vm0, %v843_v60  ;;  %926 = vst.msk [vmem:[#allocation2 + $0x150] sm:$0xff] %vm19_vm0, %v871_v62  ;;  %v1385_v62 = vmul.f32 %v2260_v15, %v2260_v15  ;;  %v92_v4 = vld [vmem:[#allocation2 + $0x90] sm:$0xff]  ;;  %v1440_v3 = vsel %vm19_vm0, %v1384_v44, 0.0  ;;  %v1388_v44 = vmul.f32 %v2314_v53, %v2314_v53 }
 0x13d   :  { %v1725_v9 = vpack.c.bf16 %v2406_v1, %v2406_v1  ;;  %v673_v10 = vpop.f32.mrf.mxu0  ;;  %v785_v11 = vpop.f32.mrf.mxu1 }
 0x13e   :  { %1224 = vst.msk [vmem:[%s2897_s2 + $0x30] sm:$0xf] %vm1211_vm1, %v1697_v8  ;;  %v844_v12 = vadd.f32 %v673_v10, %v89_v61  ;;  %v872_v14 = vadd.f32 %v785_v11, %v117_v7  ;;  %v1437_v8 = vadd.f32 %v1436_v51, %v1435_v57  ;;  %v121_v51 = vld [vmem:[#allocation2 + $0x178] sm:$0xff] }
 0x13f   :  { %1252 = vst.msk [vmem:[%s2897_s2 + $0xa0] sm:$0xf] %vm1211_vm1, %v1725_v9  ;;  %v2422_v16 = vld [vmem:[#allocation2 + $0x68] sm:$0xff]  ;;  %v675_v19 = vpop.f32.mrf.mxu0  ;;  %v787_v22 = vpop.f32.mrf.mxu1  ;;  %v1270_v9 = vadd.f32 %v1269_v52, %v1268_v58 }
 0x140   :  { %v2424_v21 = vld [vmem:[#allocation2 + $0x148] sm:$0xff]  ;;  %v1698_v25 = vpack.c.bf16 %v2422_v16, %v2422_v16  ;;  %899 = vst.msk [vmem:[#allocation2 + $0x78] sm:$0xff] %vm19_vm0, %v844_v12  ;;  %927 = vst.msk [vmem:[#allocation2 + $0x158] sm:$0xff] %vm19_vm0, %v872_v14  ;;  %v120_v14 = vld [vmem:[#allocation2 + $0x170] sm:$0xff]  ;;  %v1273_v19 = vsel %vm19_vm0, %v2260_v15, 0.0  ;;  %v1386_v22 = vmul.f32 %v2278_v27, %v2278_v27 }
 0x141   :  { %v1726_v26 = vpack.c.bf16 %v2424_v21, %v2424_v21  ;;  %v678_v32 = vpop.f32.mrf.mxu0  ;;  %v790_v34 = vpop.f32.mrf.mxu1 }
 0x142   :  { %1225 = vst.msk [vmem:[%s2897_s2 + $0x34] sm:$0xf] %vm1211_vm1, %v1698_v25  ;;  %v845_v37 = vadd.f32 %v678_v32, %v90_v13  ;;  %v873_v39 = vadd.f32 %v790_v34, %v118_v23  ;;  %v1439_v25 = vadd.f32 %v1438_v59, %v1437_v8  ;;  %v1442_v32 = vsel %vm19_vm0, %v1385_v62, 0.0 }
 0x143   :  { %1253 = vst.msk [vmem:[%s2897_s2 + $0xa4] sm:$0xf] %vm1211_vm1, %v1726_v26  ;;  %v2452_v43 = vld [vmem:[#allocation2 + $0x70] sm:$0xff]  ;;  %v680_v45 = vpop.f32.mrf.mxu0  ;;  %v792_v47 = vpop.f32.mrf.mxu1  ;;  %v1272_v26 = vadd.f32 %v1271_v55, %v1270_v9  ;;  %v1275_v34 = vsel %vm19_vm0, %v2278_v27, 0.0  ;;  %v1444_v52 = vsel %vm19_vm0, %v1386_v22, 0.0  ;;  %v1279_v62 = vsel %vm19_vm0, %v2314_v53, 0.0 }
 0x144   :  { %v2454_v46 = vld [vmem:[#allocation2 + $0x150] sm:$0xff]  ;;  %v1699_v54 = vpack.c.bf16 %v2452_v43, %v2452_v43  ;;  %900 = vst.msk [vmem:[#allocation2 + $0x80] sm:$0xff] %vm19_vm0, %v845_v37  ;;  %928 = vst.msk [vmem:[#allocation2 + $0x160] sm:$0xff] %vm19_vm0, %v873_v39  ;;  %v93_v37 = vld [vmem:[#allocation2 + $0x98] sm:$0xff]  ;;  %v1441_v39 = vadd.f32 %v1440_v3, %v1439_v25  ;;  %v1448_v53 = vsel %vm19_vm0, %v1388_v44, 0.0  ;;  %v1281_v22 = vsel %vm19_vm0, %v2332_v2, 0.0 }
 0x145   :  { %v1727_v31 = vpack.c.bf16 %v2454_v46, %v2454_v46  ;;  %v681_v60 = vpop.f32.mrf.mxu0  ;;  %v793_v61 = vpop.f32.mrf.mxu1  ;;  %v1274_v41 = vadd.f32 %v1273_v19, %v1272_v26  ;;  %v122_v19 = vld [vmem:[#allocation2 + $0x180] sm:$0xff]  ;;  %v1392_v44 = vmul.f32 %v2386_v48, %v2386_v48 }
 0x146   :  { %1226 = vst.msk [vmem:[%s2897_s2 + $0x38] sm:$0xf] %vm1211_vm1, %v1699_v54  ;;  %v846_v0 = vadd.f32 %v681_v60, %v91_v38  ;;  %v874_v7 = vadd.f32 %v793_v61, %v119_v49  ;;  %v1277_v54 = vsel %vm19_vm0, %v2296_v40, 0.0  ;;  %v1443_v58 = vadd.f32 %v1442_v32, %v1441_v39 }
 0x147   :  { %1254 = vst.msk [vmem:[%s2897_s2 + $0xa8] sm:$0xf] %vm1211_vm1, %v1727_v31  ;;  %v2480_v10 = vld [vmem:[#allocation2 + $0x78] sm:$0xff]  ;;  %v683_v11 = vpop.f32.mrf.mxu0  ;;  %v795_v13 = vpop.f32.mrf.mxu1  ;;  %v1276_v59 = vadd.f32 %v1275_v34, %v1274_v41  ;;  %v1446_v60 = vsel %vm19_vm0, %v1387_v28, 0.0  ;;  %v1389_v40 = vmul.f32 %v2332_v2, %v2332_v2  ;;  %v1283_v34 = vsel %vm19_vm0, %v2350_v18, 0.0 }
 0x148   :  { %v2482_v12 = vld [vmem:[#allocation2 + $0x158] sm:$0xff]  ;;  %v1700_v23 = vpack.c.bf16 %v2480_v10, %v2480_v10  ;;  %901 = vst.msk [vmem:[#allocation2 + $0x88] sm:$0xff] %vm19_vm0, %v846_v0  ;;  %929 = vst.msk [vmem:[#allocation2 + $0x168] sm:$0xff] %vm19_vm0, %v874_v7  ;;  %v1445_v8 = vadd.f32 %v1444_v52, %v1443_v58  ;;  %v123_v52 = vld [vmem:[#allocation2 + $0x188] sm:$0xff] }
 0x149   :  { %v1728_v24 = vpack.c.bf16 %v2482_v12, %v2482_v12  ;;  %v686_v30 = vpop.f32.mrf.mxu0  ;;  %v798_v15 = vpop.f32.mrf.mxu1  ;;  %v1278_v9 = vadd.f32 %v1277_v54, %v1276_v59  ;;  %v1450_v32 = vsel %vm19_vm0, %v1389_v40, 0.0  ;;  %v1287_v40 = vsel %vm19_vm0, %v2386_v48, 0.0 }
 0x14a   :  { %1227 = vst.msk [vmem:[%s2897_s2 + $0x3c] sm:$0xf] %vm1211_vm1, %v1700_v23  ;;  %v847_v36 = vadd.f32 %v686_v30, %v92_v4  ;;  %v875_v38 = vadd.f32 %v798_v15, %v120_v14  ;;  %v94_v4 = vld [vmem:[#allocation2 + $0xa0] sm:$0xff]  ;;  %v1390_v23 = vmul.f32 %v2350_v18, %v2350_v18  ;;  %v1447_v26 = vadd.f32 %v1446_v60, %v1445_v8 }
 0x14b   :  { %1255 = vst.msk [vmem:[%s2897_s2 + $0xac] sm:$0xf] %vm1211_vm1, %v1728_v24  ;;  %v2509_v45 = vld [vmem:[#allocation2 + $0x80] sm:$0xff]  ;;  %v688_v27 = vpop.f32.mrf.mxu0  ;;  %v800_v49 = vpop.f32.mrf.mxu1  ;;  %v1280_v28 = vadd.f32 %v1279_v62, %v1278_v9  ;;  %v1391_v30 = vmul.f32 %v2368_v33, %v2368_v33  ;;  %v1456_v48 = vsel %vm19_vm0, %v1392_v44, 0.0  ;;  %v1396_v44 = vmul.f32 %v2480_v10, %v2480_v10 }
 0x14c   :  { %v2511_v47 = vld [vmem:[#allocation2 + $0x160] sm:$0xff]  ;;  %v1701_v31 = vpack.c.bf16 %v2509_v45, %v2509_v45  ;;  %902 = vst.msk [vmem:[#allocation2 + $0x90] sm:$0xff] %vm19_vm0, %v847_v36  ;;  %930 = vst.msk [vmem:[#allocation2 + $0x170] sm:$0xff] %vm19_vm0, %v875_v38  ;;  %v1449_v39 = vadd.f32 %v1448_v53, %v1447_v26  ;;  %v1452_v54 = vsel %vm19_vm0, %v1390_v23, 0.0  ;;  %v1289_v23 = vsel %vm19_vm0, %v2404_v63, 0.0 }
 0x14d   :  { %v1729_v57 = vpack.c.bf16 %v2511_v47, %v2511_v47  ;;  %v689_v61 = vpop.f32.mrf.mxu0  ;;  %v801_v55 = vpop.f32.mrf.mxu1  ;;  %v1282_v41 = vadd.f32 %v1281_v22, %v1280_v28  ;;  %v124_v22 = vld [vmem:[#allocation2 + $0x190] sm:$0xff] }
 0x14e   :  { %1228 = vst.msk [vmem:[%s2897_s2 + $0x40] sm:$0xf] %vm1211_vm1, %v1701_v31  ;;  %v848_v0 = vadd.f32 %v689_v61, %v93_v37  ;;  %v876_v7 = vadd.f32 %v801_v55, %v121_v51  ;;  %v95_v37 = vld [vmem:[#allocation2 + $0xa8] sm:$0xff]  ;;  %v1285_v31 = vsel %vm19_vm0, %v2368_v33, 0.0  ;;  %v1451_v59 = vadd.f32 %v1450_v32, %v1449_v39 }
 0x14f   :  { %1256 = vst.msk [vmem:[%s2897_s2 + $0xb0] sm:$0xf] %vm1211_vm1, %v1729_v57  ;;  %v2536_v3 = vld [vmem:[#allocation2 + $0x88] sm:$0xff]  ;;  %v691_v11 = vpop.f32.mrf.mxu0  ;;  %v803_v14 = vpop.f32.mrf.mxu1  ;;  %v1284_v60 = vadd.f32 %v1283_v34, %v1282_v41  ;;  %v1454_v61 = vsel %vm19_vm0, %v1391_v30, 0.0  ;;  %v1393_v33 = vmul.f32 %v2404_v63, %v2404_v63  ;;  %v1291_v34 = vsel %vm19_vm0, %v2422_v16, 0.0 }
 0x150   :  { %v2538_v13 = vld [vmem:[#allocation2 + $0x168] sm:$0xff]  ;;  %v1702_v24 = vpack.c.bf16 %v2536_v3, %v2536_v3  ;;  %903 = vst.msk [vmem:[#allocation2 + $0x98] sm:$0xff] %vm19_vm0, %v848_v0  ;;  %931 = vst.msk [vmem:[#allocation2 + $0x178] sm:$0xff] %vm19_vm0, %v876_v7  ;;  %v1453_v8 = vadd.f32 %v1452_v54, %v1451_v59  ;;  %v125_v54 = vld [vmem:[#allocation2 + $0x198] sm:$0xff] }
 0x151   :  { %v1730_v25 = vpack.c.bf16 %v2538_v13, %v2538_v13  ;;  %v694_v15 = vpop.f32.mrf.mxu0  ;;  %v806_v2 = vpop.f32.mrf.mxu1  ;;  %v1286_v9 = vadd.f32 %v1285_v31, %v1284_v60  ;;  %v1458_v32 = vsel %vm19_vm0, %v1393_v33, 0.0  ;;  %v1295_v33 = vsel %vm19_vm0, %v2480_v10, 0.0 }
 0x152   :  { %1229 = vst.msk [vmem:[%s2897_s2 + $0x44] sm:$0xf] %vm1211_vm1, %v1702_v24  ;;  %v849_v36 = vadd.f32 %v694_v15, %v94_v4  ;;  %v877_v38 = vadd.f32 %v806_v2, %v122_v19  ;;  %v96_v4 = vld [vmem:[#allocation2 + $0xb0] sm:$0xff]  ;;  %v1394_v24 = vmul.f32 %v2422_v16, %v2422_v16  ;;  %v1455_v28 = vadd.f32 %v1454_v61, %v1453_v8 }
 0x153   :  { %1257 = vst.msk [vmem:[%s2897_s2 + $0xb4] sm:$0xf] %vm1211_vm1, %v1730_v25  ;;  %v2565_v27 = vld [vmem:[#allocation2 + $0x90] sm:$0xff]  ;;  %v696_v18 = vpop.f32.mrf.mxu0  ;;  %v808_v51 = vpop.f32.mrf.mxu1  ;;  %v1288_v30 = vadd.f32 %v1287_v40, %v1286_v9  ;;  %v1395_v15 = vmul.f32 %v2452_v43, %v2452_v43  ;;  %v1464_v10 = vsel %vm19_vm0, %v1396_v44, 0.0 }
 0x154   :  { %v2567_v49 = vld [vmem:[#allocation2 + $0x170] sm:$0xff]  ;;  %v1703_v57 = vpack.c.bf16 %v2565_v27, %v2565_v27  ;;  %904 = vst.msk [vmem:[#allocation2 + $0xa0] sm:$0xff] %vm19_vm0, %v849_v36  ;;  %932 = vst.msk [vmem:[#allocation2 + $0x180] sm:$0xff] %vm19_vm0, %v877_v38  ;;  %v1457_v39 = vadd.f32 %v1456_v48, %v1455_v28  ;;  %v1460_v31 = vsel %vm19_vm0, %v1394_v24, 0.0  ;;  %v1297_v24 = vsel %vm19_vm0, %v2509_v45, 0.0 }
 0x155   :  { %v1731_v58 = vpack.c.bf16 %v2567_v49, %v2567_v49  ;;  %v697_v55 = vpop.f32.mrf.mxu0  ;;  %v809_v62 = vpop.f32.mrf.mxu1  ;;  %v1290_v41 = vadd.f32 %v1289_v23, %v1288_v30  ;;  %v126_v23 = vld [vmem:[#allocation2 + $0x1a0] sm:$0xff] }
 0x156   :  { %1230 = vst.msk [vmem:[%s2897_s2 + $0x48] sm:$0xf] %vm1211_vm1, %v1703_v57  ;;  %v850_v0 = vadd.f32 %v697_v55, %v95_v37  ;;  %v878_v7 = vadd.f32 %v809_v62, %v123_v52  ;;  %v97_v37 = vld [vmem:[#allocation2 + $0xb8] sm:$0xff]  ;;  %v1293_v57 = vsel %vm19_vm0, %v2452_v43, 0.0  ;;  %v1459_v60 = vadd.f32 %v1458_v32, %v1457_v39 }
 0x157   :  { %1258 = vst.msk [vmem:[%s2897_s2 + $0xb8] sm:$0xf] %vm1211_vm1, %v1731_v58  ;;  %v2592_v53 = vld [vmem:[#allocation2 + $0x98] sm:$0xff]  ;;  %v699_v11 = vpop.f32.mrf.mxu0  ;;  %v811_v19 = vpop.f32.mrf.mxu1  ;;  %v1292_v61 = vadd.f32 %v1291_v34, %v1290_v41  ;;  %v1462_v55 = vsel %vm19_vm0, %v1395_v15, 0.0  ;;  %v1397_v43 = vmul.f32 %v2509_v45, %v2509_v45  ;;  %v1299_v34 = vsel %vm19_vm0, %v2536_v3, 0.0 }
 0x158   :  { %v2594_v14 = vld [vmem:[#allocation2 + $0x178] sm:$0xff]  ;;  %v1704_v25 = vpack.c.bf16 %v2592_v53, %v2592_v53  ;;  %905 = vst.msk [vmem:[#allocation2 + $0xa8] sm:$0xff] %vm19_vm0, %v850_v0  ;;  %933 = vst.msk [vmem:[#allocation2 + $0x188] sm:$0xff] %vm19_vm0, %v878_v7  ;;  %v1461_v8 = vadd.f32 %v1460_v31, %v1459_v60  ;;  %v1400_v44 = vmul.f32 %v2592_v53, %v2592_v53  ;;  %v127_v31 = vld [vmem:[#allocation2 + $0x1a8] sm:$0xff] }
 0x159   :  { %v1732_v26 = vpack.c.bf16 %v2594_v14, %v2594_v14  ;;  %v702_v2 = vpop.f32.mrf.mxu0  ;;  %v814_v63 = vpop.f32.mrf.mxu1  ;;  %v1294_v9 = vadd.f32 %v1293_v57, %v1292_v61  ;;  %v1466_v32 = vsel %vm19_vm0, %v1397_v43, 0.0  ;;  %v1303_v43 = vsel %vm19_vm0, %v2592_v53, 0.0 }
 0x15a   :  { %1231 = vst.msk [vmem:[%s2897_s2 + $0x4c] sm:$0xf] %vm1211_vm1, %v1704_v25  ;;  %v851_v36 = vadd.f32 %v702_v2, %v96_v4  ;;  %v879_v38 = vadd.f32 %v814_v63, %v124_v22  ;;  %v98_v4 = vld [vmem:[#allocation2 + $0xc0] sm:$0xff]  ;;  %v1398_v25 = vmul.f32 %v2536_v3, %v2536_v3  ;;  %v1463_v30 = vadd.f32 %v1462_v55, %v1461_v8 }
 0x15b   :  { %1259 = vst.msk [vmem:[%s2897_s2 + $0xbc] sm:$0xf] %vm1211_vm1, %v1732_v26  ;;  %v2621_v18 = vld [vmem:[#allocation2 + $0xa0] sm:$0xff]  ;;  %v704_v16 = vpop.f32.mrf.mxu0  ;;  %v816_v52 = vpop.f32.mrf.mxu1  ;;  %v1296_v15 = vadd.f32 %v1295_v33, %v1294_v9  ;;  %v1399_v2 = vmul.f32 %v2565_v27, %v2565_v27  ;;  %v1472_v9 = vsel %vm19_vm0, %v1400_v44, 0.0 }
 0x15c   :  { %v2623_v51 = vld [vmem:[#allocation2 + $0x180] sm:$0xff]  ;;  %v1705_v58 = vpack.c.bf16 %v2621_v18, %v2621_v18  ;;  %906 = vst.msk [vmem:[#allocation2 + $0xb0] sm:$0xff] %vm19_vm0, %v851_v36  ;;  %934 = vst.msk [vmem:[#allocation2 + $0x190] sm:$0xff] %vm19_vm0, %v879_v38  ;;  %v1465_v39 = vadd.f32 %v1464_v10, %v1463_v30  ;;  %v1468_v57 = vsel %vm19_vm0, %v1398_v25, 0.0 }
 0x15d   :  { %v1733_v59 = vpack.c.bf16 %v2623_v51, %v2623_v51  ;;  %v705_v62 = vpop.f32.mrf.mxu0  ;;  %v817_v40 = vpop.f32.mrf.mxu1  ;;  %v1298_v41 = vadd.f32 %v1297_v24, %v1296_v15  ;;  %v1305_v24 = vsel %vm19_vm0, %v2621_v18, 0.0 }
 0x15e   :  { %1232 = vst.msk [vmem:[%s2897_s2 + $0x50] sm:$0xf] %vm1211_vm1, %v1705_v58  ;;  %v852_v0 = vadd.f32 %v705_v62, %v97_v37  ;;  %v880_v7 = vadd.f32 %v817_v40, %v125_v54  ;;  %v99_v37 = vld [vmem:[#allocation2 + $0xc8] sm:$0xff]  ;;  %v1301_v58 = vsel %vm19_vm0, %v2565_v27, 0.0  ;;  %v1467_v61 = vadd.f32 %v1466_v32, %v1465_v39 }
 0x15f   :  { %1260 = vst.msk [vmem:[%s2897_s2 + $0xc0] sm:$0xf] %vm1211_vm1, %v1733_v59  ;;  %v2648_v48 = vld [vmem:[#allocation2 + $0xa8] sm:$0xff]  ;;  %v707_v11 = vpop.f32.mrf.mxu0  ;;  %v819_v22 = vpop.f32.mrf.mxu1  ;;  %v1300_v55 = vadd.f32 %v1299_v34, %v1298_v41  ;;  %v1470_v62 = vsel %vm19_vm0, %v1399_v2, 0.0  ;;  %v1401_v27 = vmul.f32 %v2621_v18, %v2621_v18  ;;  %v101_v41 = vld [vmem:[#allocation2 + $0xd8] sm:$0xff] }
 0x160   :  { %v2650_v19 = vld [vmem:[#allocation2 + $0x188] sm:$0xff]  ;;  %v1706_v26 = vpack.c.bf16 %v2648_v48, %v2648_v48  ;;  %907 = vst.msk [vmem:[#allocation2 + $0xb8] sm:$0xff] %vm19_vm0, %v852_v0  ;;  %935 = vst.msk [vmem:[#allocation2 + $0x198] sm:$0xff] %vm19_vm0, %v880_v7  ;;  %v1469_v7 = vadd.f32 %v1468_v57, %v1467_v61  ;;  %v100_v11 = vld [vmem:[#allocation2 + $0xd0] sm:$0xff]  ;;  %v1402_v25 = vmul.f32 %v2648_v48, %v2648_v48 }
 0x161   :  { %v1734_v28 = vpack.c.bf16 %v2650_v19, %v2650_v19  ;;  %v710_v63 = vpop.f32.mrf.mxu0  ;;  %v822_v45 = vpop.f32.mrf.mxu1  ;;  %v1302_v8 = vadd.f32 %v1301_v58, %v1300_v55 }
 0x162   :  { %1233 = vst.msk [vmem:[%s2897_s2 + $0x54] sm:$0xf] %vm1211_vm1, %v1706_v26  ;;  %v853_v36 = vadd.f32 %v710_v63, %v98_v4  ;;  %v881_v38 = vadd.f32 %v822_v45, %v126_v23  ;;  %v1471_v30 = vadd.f32 %v1470_v62, %v1469_v7  ;;  %v1474_v63 = vsel %vm19_vm0, %v1401_v27, 0.0 }
 0x163   :  { %1261 = vst.msk [vmem:[%s2897_s2 + $0xc4] sm:$0xf] %vm1211_vm1, %v1734_v28  ;;  %v963_v16 = vld [vmem:[#allocation2 + $0xb0] sm:$0xff]  ;;  %v712_v3 = vpop.f32.mrf.mxu0  ;;  %v824_v54 = vpop.f32.mrf.mxu1  ;;  %v1304_v15 = vadd.f32 %v1303_v43, %v1302_v8  ;;  %v1307_v45 = vsel %vm19_vm0, %v2648_v48, 0.0  ;;  %v1476_v48 = vsel %vm19_vm0, %v1402_v25, 0.0 }
 0x164   :  { %v2677_v52 = vld [vmem:[#allocation2 + $0x190] sm:$0xff]  ;;  %v1707_v59 = vpack.c.bf16 %v963_v16, %v963_v16  ;;  %908 = vst.msk [vmem:[#allocation2 + $0xc0] sm:$0xff] %vm19_vm0, %v853_v36  ;;  %936 = vst.msk [vmem:[#allocation2 + $0x1a0] sm:$0xff] %vm19_vm0, %v881_v38  ;;  %v1403_v18 = vmul.f32 %v963_v16, %v963_v16  ;;  %v1473_v34 = vadd.f32 %v1472_v9, %v1471_v30  ;;  %v1309_v3 = vsel %vm19_vm0, %v963_v16, 0.0 }
 0x165   :  { %v1735_v60 = vpack.c.bf16 %v2677_v52, %v2677_v52  ;;  %v713_v40 = vpop.f32.mrf.mxu0  ;;  %v825_v33 = vpop.f32.mrf.mxu1  ;;  %v1306_v36 = vadd.f32 %v1305_v24, %v1304_v15 }
 0x166   :  { %1234 = vst.msk [vmem:[%s2897_s2 + $0x58] sm:$0xf] %vm1211_vm1, %v1707_v59  ;;  %v854_v0 = vadd.f32 %v713_v40, %v99_v37  ;;  %v882_v4 = vadd.f32 %v825_v33, %v127_v31  ;;  %v1475_v57 = vadd.f32 %v1474_v63, %v1473_v34 }
 0x167   :  { %1262 = vst.msk [vmem:[%s2897_s2 + $0xc8] sm:$0xf] %vm1211_vm1, %v1735_v60  ;;  %v964_v53 = vld [vmem:[#allocation2 + $0xb8] sm:$0xff]  ;;  %v715_v10 = vpop.f32.mrf.mxu0  ;;  %v827_v23 = vpop.f32.mrf.mxu1  ;;  %v1308_v58 = vadd.f32 %v1307_v45, %v1306_v36  ;;  %v1478_v60 = vsel %vm19_vm0, %v1403_v18, 0.0 }
 0x168   :  { %v2700_v22 = vld [vmem:[#allocation2 + $0x198] sm:$0xff]  ;;  %v1708_v26 = vpack.c.bf16 %v964_v53, %v964_v53  ;;  %909 = vst.msk [vmem:[#allocation2 + $0xc8] sm:$0xff] %vm19_vm0, %v854_v0  ;;  %937 = vst.msk [vmem:[#allocation2 + $0x1a8] sm:$0xff] %vm19_vm0, %v882_v4  ;;  %v1404_v37 = vmul.f32 %v964_v53, %v964_v53  ;;  %v1311_v61 = vsel %vm19_vm0, %v964_v53, 0.0  ;;  %v1477_v62 = vadd.f32 %v1476_v48, %v1475_v57  ;;  %v1871_v57 = vld [vmem:[#allocation2 + $0xe8] sm:$0xff] }
 0x169   :  { %v1736_v28 = vpack.c.bf16 %v2700_v22, %v2700_v22  ;;  %v718_v2 = vpop.f32.mrf.mxu0  ;;  %v1310_v40 = vadd.f32 %v1309_v3, %v1308_v58  ;;  %v1410_v58 = vmul.f32 %v1871_v57, %v1871_v57 }
 0x16a   :  { %1235 = vst.msk [vmem:[%s2897_s2 + $0x5c] sm:$0xf] %vm1211_vm1, %v1708_v26  ;;  %v855_v32 = vadd.f32 %v718_v2, %v100_v11  ;;  %v1480_v33 = vsel %vm19_vm0, %v1404_v37, 0.0  ;;  %v1479_v53 = vadd.f32 %v1478_v60, %v1477_v62  ;;  %v1870_v37 = vld [vmem:[#allocation2 + $0xe0] sm:$0xff]  ;;  %v1872_v62 = vld [vmem:[#allocation2 + $0xf0] sm:$0xff] }
 0x16b   :  { %1263 = vst.msk [vmem:[%s2897_s2 + $0xcc] sm:$0xf] %vm1211_vm1, %v1736_v28  ;;  %v965_v38 = vld [vmem:[#allocation2 + $0xc0] sm:$0xff]  ;;  %v720_v39 = vpop.f32.mrf.mxu0  ;;  %v1312_v10 = vadd.f32 %v1311_v61, %v1310_v40  ;;  %v1411_v40 = vmul.f32 %v1872_v62, %v1872_v62 }
 0x16c   :  { %v2721_v44 = vld [vmem:[#allocation2 + $0x1a0] sm:$0xff]  ;;  %v1709_v54 = vpack.c.bf16 %v965_v38, %v965_v38  ;;  %910 = vst.msk [vmem:[#allocation2 + $0xd0] sm:$0xff] %vm19_vm0, %v855_v32  ;;  %v1405_v55 = vmul.f32 %v965_v38, %v965_v38  ;;  %v1313_v4 = vsel %vm19_vm0, %v965_v38, 0.0  ;;  %v1481_v24 = vadd.f32 %v1480_v33, %v1479_v53 }
 0x16d   :  { %v1737_v31 = vpack.c.bf16 %v2721_v44, %v2721_v44  ;;  %v721_v59 = vpop.f32.mrf.mxu0  ;;  %v1314_v25 = vadd.f32 %v1313_v4, %v1312_v10  ;;  %v1409_v38 = vmul.f32 %v1870_v37, %v1870_v37  ;;  %v1325_v4 = vsel %vm19_vm0, %v1872_v62, 0.0 }
 0x16e   :  { %1236 = vst.msk [vmem:[%s2897_s2 + $0x60] sm:$0xf] %vm1211_vm1, %v1709_v54  ;;  %v856_v16 = vadd.f32 %v721_v59, %v101_v41  ;;  %v1482_v11 = vsel %vm19_vm0, %v1405_v55, 0.0  ;;  %v1494_v53 = vsel %vm19_vm0, %v1411_v40, 0.0  ;;  %v1327_v10 = vsel %vm19_vm0, %v2244_v5, 0.0 }
 0x16f   :  { %1264 = vst.msk [vmem:[%s2897_s2 + $0xd0] sm:$0xf] %vm1211_vm1, %v1737_v31  ;;  %v966_v43 = vld [vmem:[#allocation2 + $0xc8] sm:$0xff]  ;;  %v723_v27 = vpop.f32.mrf.mxu0  ;;  %v1483_v63 = vadd.f32 %v1482_v11, %v1481_v24  ;;  %v1321_v31 = vsel %vm19_vm0, %v1870_v37, 0.0  ;;  %v1490_v55 = vsel %vm19_vm0, %v1409_v38, 0.0  ;;  %v1413_v11 = vmul.f32 %v2262_v17, %v2262_v17 }
 0x170   :  { %v2739_v0 = vld [vmem:[#allocation2 + $0x1a8] sm:$0xff]  ;;  %v1710_v7 = vpack.c.bf16 %v966_v43, %v966_v43  ;;  %v1406_v8 = vmul.f32 %v966_v43, %v966_v43  ;;  %911 = vst.msk [vmem:[#allocation2 + $0xd8] sm:$0xff] %vm19_vm0, %v856_v16  ;;  %v1315_v23 = vsel %vm19_vm0, %v966_v43, 0.0  ;;  %v1323_v16 = vsel %vm19_vm0, %v1871_v57, 0.0 }
 0x171   :  { %v1738_v9 = vpack.c.bf16 %v2739_v0, %v2739_v0  ;;  %v1316_v45 = vadd.f32 %v1315_v23, %v1314_v25  ;;  %v1492_v27 = vsel %vm19_vm0, %v1410_v58, 0.0 }
 0x172   :  { %1237 = vst.msk [vmem:[%s2897_s2 + $0x64] sm:$0xf] %vm1211_vm1, %v1710_v7  ;;  %v1484_v28 = vsel %vm19_vm0, %v1406_v8, 0.0  ;;  %v1412_v7 = vmul.f32 %v2244_v5, %v2244_v5  ;;  %v1331_v5 = vsel %vm19_vm0, %v2280_v29, 0.0 }
 0x173   :  { %1265 = vst.msk [vmem:[%s2897_s2 + $0xd4] sm:$0xf] %vm1211_vm1, %v1738_v9  ;;  %v967_v26 = vld [vmem:[#allocation2 + $0xd0] sm:$0xff]  ;;  %v1485_v32 = vadd.f32 %v1484_v28, %v1483_v63  ;;  %v1414_v28 = vmul.f32 %v2280_v29, %v2280_v29  ;;  %v1415_v63 = vmul.f32 %v2298_v42, %v2298_v42  ;;  %v1335_v29 = vsel %vm19_vm0, %v2316_v56, 0.0 }
 0x174   :  { %v1711_v30 = vpack.c.bf16 %v967_v26, %v967_v26  ;;  %v1317_v15 = vsel %vm19_vm0, %v967_v26, 0.0  ;;  %v1407_v2 = vmul.f32 %v967_v26, %v967_v26  ;;  %v1496_v25 = vsel %vm19_vm0, %v1412_v7, 0.0 }
 0x175   :  { %v1318_v34 = vadd.f32 %v1317_v15, %v1316_v45  ;;  %v1329_v26 = vsel %vm19_vm0, %v2262_v17, 0.0  ;;  %v1333_v17 = vsel %vm19_vm0, %v2298_v42, 0.0  ;;  %v1502_v38 = vsel %vm19_vm0, %v1415_v63, 0.0 }
 0x176   :  { %1238 = vst.msk [vmem:[%s2897_s2 + $0x68] sm:$0xf] %vm1211_vm1, %v1711_v30  ;;  %v1486_v18 = vsel %vm19_vm0, %v1407_v2, 0.0  ;;  %v1498_v2 = vsel %vm19_vm0, %v1413_v11, 0.0  ;;  %v1337_v42 = vsel %vm19_vm0, %v2334_v6, 0.0  ;;  %v1423_v11 = vmul.f32 %v2454_v46, %v2454_v46 }
 0x177   :  { %v968_v36 = vld [vmem:[#allocation2 + $0xd8] sm:$0xff]  ;;  %v1487_v3 = vadd.f32 %v1486_v18, %v1485_v32  ;;  %v1500_v32 = vsel %vm19_vm0, %v1414_v28, 0.0 }
 0x178   :  { %v1712_v39 = vpack.c.bf16 %v968_v36, %v968_v36  ;;  %v1319_v41 = vsel %vm19_vm0, %v968_v36, 0.0  ;;  %v1408_v48 = vmul.f32 %v968_v36, %v968_v36 }
 0x179   :  { %v1320_v54 = vadd.f32 %v1319_v41, %v1318_v34  ;;  %v1416_v34 = vmul.f32 %v2316_v56, %v2316_v56  ;;  %v1339_v56 = vsel %vm19_vm0, %v2352_v20, 0.0 }
 0x17a   :  { %1239 = vst.msk [vmem:[%s2897_s2 + $0x6c] sm:$0xf] %vm1211_vm1, %v1712_v39  ;;  %v1488_v59 = vsel %vm19_vm0, %v1408_v48, 0.0  ;;  %v1417_v39 = vmul.f32 %v2334_v6, %v2334_v6  ;;  %v1341_v6 = vsel %vm19_vm0, %v2370_v35, 0.0 }
 0x17b   :  { %v1322_v60 = vadd.f32 %v1321_v31, %v1320_v54  ;;  %v1489_v61 = vadd.f32 %v1488_v59, %v1487_v3  ;;  %v1504_v3 = vsel %vm19_vm0, %v1416_v34, 0.0  ;;  %v1418_v54 = vmul.f32 %v2352_v20, %v2352_v20 }
 0x17c   :  { %v1506_v58 = vsel %vm19_vm0, %v1417_v39, 0.0  ;;  %v1419_v59 = vmul.f32 %v2370_v35, %v2370_v35  ;;  %v1343_v20 = vsel %vm19_vm0, %v2388_v50, 0.0  ;;  %v1345_v35 = vsel %vm19_vm0, %v2406_v1, 0.0 }
 0x17d   :  { %v1324_v33 = vadd.f32 %v1323_v16, %v1322_v60  ;;  %v1491_v43 = vadd.f32 %v1490_v55, %v1489_v61  ;;  %v1508_v55 = vsel %vm19_vm0, %v1418_v54, 0.0  ;;  %v1420_v16 = vmul.f32 %v2388_v50, %v2388_v50 }
 0x17e   :  { %v1347_v50 = vsel %vm19_vm0, %v2424_v21, 0.0  ;;  %v1428_v39 = vmul.f32 %v2594_v14, %v2594_v14 }
 0x17f   :  { %v1326_v8 = vadd.f32 %v1325_v4, %v1324_v33  ;;  %v1493_v9 = vadd.f32 %v1492_v27, %v1491_v43  ;;  %v1510_v33 = vsel %vm19_vm0, %v1419_v59, 0.0  ;;  %v1421_v43 = vmul.f32 %v2406_v1, %v2406_v1 }
 0x180   :  { %v1512_v7 = vsel %vm19_vm0, %v1420_v16, 0.0  ;;  %v1349_v1 = vsel %vm19_vm0, %v2454_v46, 0.0  ;;  %v1353_v46 = vsel %vm19_vm0, %v2511_v47, 0.0 }
 0x181   :  { %v1328_v23 = vadd.f32 %v1327_v10, %v1326_v8  ;;  %v1495_v24 = vadd.f32 %v1494_v53, %v1493_v9  ;;  %v1422_v8 = vmul.f32 %v2424_v21, %v2424_v21  ;;  %v1514_v10 = vsel %vm19_vm0, %v1421_v43, 0.0 }
 0x182   :  { %v1351_v21 = vsel %vm19_vm0, %v2482_v12, 0.0  ;;  %v1433_v43 = vmul.f32 %v2721_v44, %v2721_v44 }
 0x183   :  { %v1330_v30 = vadd.f32 %v1329_v26, %v1328_v23  ;;  %v1497_v15 = vadd.f32 %v1496_v25, %v1495_v24  ;;  %v1516_v25 = vsel %vm19_vm0, %v1422_v8, 0.0  ;;  %v1424_v26 = vmul.f32 %v2482_v12, %v2482_v12 }
 0x184   :  { %v1355_v12 = vsel %vm19_vm0, %v2538_v13, 0.0 }
 0x185   :  { %v1332_v45 = vadd.f32 %v1331_v5, %v1330_v30  ;;  %v1499_v18 = vadd.f32 %v1498_v2, %v1497_v15  ;;  %v1518_v15 = vsel %vm19_vm0, %v1423_v11, 0.0  ;;  %v1425_v2 = vmul.f32 %v2511_v47, %v2511_v47 }
 0x186   :  { %v1357_v47 = vsel %vm19_vm0, %v2567_v49, 0.0 }
 0x187   :  { %v1334_v36 = vadd.f32 %v1333_v17, %v1332_v45  ;;  %v1501_v37 = vadd.f32 %v1500_v32, %v1499_v18  ;;  %v1520_v45 = vsel %vm19_vm0, %v1424_v26, 0.0  ;;  %v1426_v18 = vmul.f32 %v2538_v13, %v2538_v13 }
 0x188   :  { %v1522_v34 = vsel %vm19_vm0, %v1425_v2, 0.0  ;;  %v1359_v13 = vsel %vm19_vm0, %v2594_v14, 0.0  ;;  %v1363_v14 = vsel %vm19_vm0, %v2650_v19, 0.0 }
 0x189   :  { %v1503_v41 = vadd.f32 %v1502_v38, %v1501_v37  ;;  %v1336_v48 = vadd.f32 %v1335_v29, %v1334_v36  ;;  %v1427_v36 = vmul.f32 %v2567_v49, %v2567_v49  ;;  %v1524_v29 = vsel %vm19_vm0, %v1426_v18, 0.0 }
 0x18a   :  { %v1361_v49 = vsel %vm19_vm0, %v2623_v51, 0.0 }
 0x18b   :  { %v1338_v31 = vadd.f32 %v1337_v42, %v1336_v48  ;;  %v1505_v57 = vadd.f32 %v1504_v3, %v1503_v41  ;;  %v1526_v3 = vsel %vm19_vm0, %v1427_v36, 0.0  ;;  %v1429_v42 = vmul.f32 %v2623_v51, %v2623_v51 }
 0x18c   :  { %v1365_v51 = vsel %vm19_vm0, %v2677_v52, 0.0 }
 0x18d   :  { %v1340_v60 = vadd.f32 %v1339_v56, %v1338_v31  ;;  %v1507_v61 = vadd.f32 %v1506_v58, %v1505_v57  ;;  %v1528_v57 = vsel %vm19_vm0, %v1428_v39, 0.0  ;;  %v1430_v58 = vmul.f32 %v2650_v19, %v2650_v19 }
 0x18e   :  { %v1367_v19 = vsel %vm19_vm0, %v2700_v22, 0.0 }
 0x18f   :  { %v1342_v62 = vadd.f32 %v1341_v6, %v1340_v60  ;;  %v1509_v40 = vadd.f32 %v1508_v55, %v1507_v61  ;;  %v1530_v60 = vsel %vm19_vm0, %v1429_v42, 0.0  ;;  %v1431_v61 = vmul.f32 %v2677_v52, %v2677_v52 }
 0x190   :  { %v1532_v16 = vsel %vm19_vm0, %v1430_v58, 0.0  ;;  %v1369_v52 = vsel %vm19_vm0, %v2721_v44, 0.0 }
 0x191   :  { %v1344_v27 = vadd.f32 %v1343_v20, %v1342_v62  ;;  %v1511_v4 = vadd.f32 %v1510_v33, %v1509_v40  ;;  %v1432_v62 = vmul.f32 %v2700_v22, %v2700_v22  ;;  %v1534_v20 = vsel %vm19_vm0, %v1431_v61, 0.0 }
 0x192   :  { %v1371_v22 = vsel %vm19_vm0, %v2739_v0, 0.0 }
 0x193   :  { %v1346_v9 = vadd.f32 %v1345_v35, %v1344_v27  ;;  %v1513_v53 = vadd.f32 %v1512_v7, %v1511_v4  ;;  %v1536_v7 = vsel %vm19_vm0, %v1432_v62, 0.0  ;;  %v1434_v35 = vmul.f32 %v2739_v0, %v2739_v0 }
 0x195   :  { %v1348_v23 = vadd.f32 %v1347_v50, %v1346_v9  ;;  %v1515_v24 = vadd.f32 %v1514_v10, %v1513_v53  ;;  %v1538_v53 = vsel %vm19_vm0, %v1433_v43, 0.0  ;;  %v1540_v11 = vsel %vm19_vm0, %v1434_v35, 0.0 }
 0x197   :  { %v1350_v28 = vadd.f32 %v1349_v1, %v1348_v23  ;;  %v1517_v30 = vadd.f32 %v1516_v25, %v1515_v24 }
 0x199   :  { %v1519_v5 = vadd.f32 %v1518_v15, %v1517_v30  ;;  %v1352_v63 = vadd.f32 %v1351_v21, %v1350_v28 }
 0x19b   :  { %v1521_v32 = vadd.f32 %v1520_v45, %v1519_v5  ;;  %v1354_v17 = vadd.f32 %v1353_v46, %v1352_v63 }
 0x19d   :  { %v1523_v37 = vadd.f32 %v1522_v34, %v1521_v32  ;;  %v1356_v38 = vadd.f32 %v1355_v12, %v1354_v17 }
 0x19f   :  { %v1525_v41 = vadd.f32 %v1524_v29, %v1523_v37  ;;  %v1358_v48 = vadd.f32 %v1357_v47, %v1356_v38 }
 0x1a1   :  { %v1527_v54 = vadd.f32 %v1526_v3, %v1525_v41  ;;  %v1360_v31 = vadd.f32 %v1359_v13, %v1358_v48 }
 0x1a3   :  { %v1529_v56 = vadd.f32 %v1528_v57, %v1527_v54  ;;  %v1362_v59 = vadd.f32 %v1361_v49, %v1360_v31 }
 0x1a5   :  { %v1531_v55 = vadd.f32 %v1530_v60, %v1529_v56  ;;  %v1364_v6 = vadd.f32 %v1363_v14, %v1362_v59 }
 0x1a7   :  { %v1533_v40 = vadd.f32 %v1532_v16, %v1531_v55  ;;  %v1366_v33 = vadd.f32 %v1365_v51, %v1364_v6 }
 0x1a9   :  { %v1535_v27 = vadd.f32 %v1534_v20, %v1533_v40  ;;  %v1368_v4 = vadd.f32 %v1367_v19, %v1366_v33 }
 0x1ab   :  { %v1537_v8 = vadd.f32 %v1536_v7, %v1535_v27  ;;  %v1370_v9 = vadd.f32 %v1369_v52, %v1368_v4 }
 0x1ad   :  { %v1539_v10 = vadd.f32 %v1538_v53, %v1537_v8  ;;  %v1372_v50 = vadd.f32 %v1371_v22, %v1370_v9 }
 0x1af   :  { %v1373_v23 = vrot.slane %v1372_v50, 4  ;;  %v1541_v24 = vadd.f32 %v1540_v11, %v1539_v10 }
 0x1b1   :  { %v1374_v25 = vadd.f32 %v1373_v23, %v1372_v50  ;;  %v1542_v1 = vrot.slane %v1541_v24, 4 }
 0x1b3   :  { %v1375_v26 = vrot.slane %v1374_v25, 2  ;;  %v1543_v44 = vadd.f32 %v1542_v1, %v1541_v24 }
 0x1b5   :  { %v1376_v28 = vadd.f32 %v1375_v26, %v1374_v25  ;;  %v1544_v30 = vrot.slane %v1543_v44, 2 }
 0x1b7   :  { %v1377_v15 = vrot.slane %v1376_v28, 1  ;;  %v1545_v21 = vadd.f32 %v1544_v30, %v1543_v44 }
 0x1b9   :  { %v1378_v2 = vadd.f32 %v1377_v15, %v1376_v28  ;;  %v1546_v5 = vrot.slane %v1545_v21, 1 }
 0x1bb   :  { %1380 = vst.msk [vmem:[%s2898_s3] sm:$0x1] %vm1379_vm2, %v1378_v2  ;;  %v1547_v0 = vadd.f32 %v1546_v5, %v1545_v21 }
 0x1bd   :  { %1548 = vst.msk [vmem:[%s2899_s4] sm:$0x1] %vm1379_vm2, %v1547_v0 }

// kernel: turbnetd_forward.7
= control target key start
LH: loop header
LB: loop body
LE: loop exit
PB: predicated region body
PF: predicated region fallthrough
CT: control target
= control target key end

     0   :  { %vm19_vm0 = vcmask 261120   ;;  %vm810_vm1 = vcmask 257024   ;;  %vm864_vm2 = vcmask 253952   ;;  %s1652_s1 = inlined_call_operand.vmem [shape: bf16[512,32], index: 1, kind: input, shape index: {}]   ;;  %s1653_s0 = inlined_call_operand.vmem [shape: bf16[128,512], index: 0, kind: input, shape index: {}]   ;;  %s1654_s2 = inlined_call_operand.vmem [shape: bf16[128,32], index: 2, kind: output, shape index: {0}]   ;;  %s1655_s3 = inlined_call_operand.vmem [shape: f32[1,1,32], index: 3, kind: output, shape index: {1}]   ;;  %s1656_s4 = inlined_call_operand.vmem [shape: f32[1,1,32], index: 4, kind: output, shape index: {2}]  }
   0x1   :  { %v1157_v0 = vld [vmem:[%s1652_s1 + $0x78] sm:$0xff]   ;;  %v1161_v4 = vld [vmem:[%s1652_s1 + $0x70] sm:$0xff]   ;;  %v1165_v8 = vld [vmem:[%s1652_s1 + $0x68] sm:$0xff]  }
   0x2   :  { %v1158_v1 = vld [vmem:[%s1652_s1 + $0xf8] sm:$0xff]   ;;  %1028 = vmatprep.subr.bf16.mxu0 %v1157_v0  ;;  %v1162_v5 = vld [vmem:[%s1652_s1 + $0xf0] sm:$0xff]   ;;  %v1166_v9 = vld [vmem:[%s1652_s1 + $0xe8] sm:$0xff]   ;;  %v1237_v0 = vmov 0.0  }
   0x3   :  { %v1159_v2 = vld [vmem:[%s1652_s1 + $0x38] sm:$0xff]   ;;  %1092 = vmatprep.subr.bf16.mxu1 %v1158_v1  ;;  %v1163_v6 = vld [vmem:[%s1652_s1 + $0x30] sm:$0xff]   ;;  %v1167_v10 = vld [vmem:[%s1652_s1 + $0x28] sm:$0xff]   ;;  %20 = vst.msk [vmem:[#allocation2] sm:$0xff] %vm19_vm0, %v1237_v0 }
   0x4   :  { %v1160_v3 = vld [vmem:[%s1652_s1 + $0xb8] sm:$0xff]   ;;  %1029 = vmatpush3.bf16.msra.mxu0 %v1159_v2  ;;  %v1164_v7 = vld [vmem:[%s1652_s1 + $0xb0] sm:$0xff]   ;;  %v1168_v11 = vld [vmem:[%s1652_s1 + $0xa8] sm:$0xff]   ;;  %21 = vst.msk [vmem:[#allocation2 + $0x8] sm:$0xff] %vm19_vm0, %v1237_v0 }
   0x5   :  { %1093 = vmatpush3.bf16.msra.mxu1 %v1160_v3  ;;  %1030 = vmatprep.subr.bf16.mxu0 %v1161_v4  ;;  %v1169_v12 = vld [vmem:[%s1652_s1 + $0x60] sm:$0xff]   ;;  %v1173_v16 = vld [vmem:[%s1652_s1 + $0x58] sm:$0xff]   ;;  %v1177_v20 = vld [vmem:[%s1652_s1 + $0x50] sm:$0xff]   ;;  %22 = vst.msk [vmem:[#allocation2 + $0x10] sm:$0xff] %vm19_vm0, %v1237_v0 }
   0x6   :  { %1094 = vmatprep.subr.bf16.mxu1 %v1162_v5  ;;  %v1170_v13 = vld [vmem:[%s1652_s1 + $0xe0] sm:$0xff]   ;;  %v1174_v17 = vld [vmem:[%s1652_s1 + $0xd8] sm:$0xff]   ;;  %v1178_v21 = vld [vmem:[%s1652_s1 + $0xd0] sm:$0xff]   ;;  %23 = vst.msk [vmem:[#allocation2 + $0x18] sm:$0xff] %vm19_vm0, %v1237_v0 }
   0x7   :  { %v1171_v14 = vld [vmem:[%s1652_s1 + $0x20] sm:$0xff]   ;;  %v1175_v18 = vld [vmem:[%s1652_s1 + $0x18] sm:$0xff]   ;;  %v1179_v22 = vld [vmem:[%s1652_s1 + $0x10] sm:$0xff]   ;;  %24 = vst.msk [vmem:[#allocation2 + $0x20] sm:$0xff] %vm19_vm0, %v1237_v0 }
   0x8   :  { %1031 = vmatpush3.bf16.msra.mxu0 %v1163_v6  ;;  %v1172_v15 = vld [vmem:[%s1652_s1 + $0xa0] sm:$0xff]   ;;  %v1176_v19 = vld [vmem:[%s1652_s1 + $0x98] sm:$0xff]   ;;  %v1180_v23 = vld [vmem:[%s1652_s1 + $0x90] sm:$0xff]   ;;  %25 = vst.msk [vmem:[#allocation2 + $0x28] sm:$0xff] %vm19_vm0, %v1237_v0 }
   0x9   :  { %1095 = vmatpush3.bf16.msra.mxu1 %v1164_v7  ;;  %1032 = vmatprep.subr.bf16.mxu0 %v1165_v8  ;;  %v1181_v24 = vld [vmem:[%s1652_s1 + $0x48] sm:$0xff]   ;;  %v1185_v28 = vld [vmem:[%s1652_s1 + $0x40] sm:$0xff]   ;;  %26 = vst.msk [vmem:[#allocation2 + $0x30] sm:$0xff] %vm19_vm0, %v1237_v0  ;;  %27 = vst.msk [vmem:[#allocation2 + $0x38] sm:$0xff] %vm19_vm0, %v1237_v0 }
   0xa   :  { %1096 = vmatprep.subr.bf16.mxu1 %v1166_v9  ;;  %v1182_v25 = vld [vmem:[%s1652_s1 + $0xc8] sm:$0xff]   ;;  %v1186_v29 = vld [vmem:[%s1652_s1 + $0xc0] sm:$0xff]   ;;  %28 = vst.msk [vmem:[#allocation2 + $0x40] sm:$0xff] %vm19_vm0, %v1237_v0  ;;  %29 = vst.msk [vmem:[#allocation2 + $0x48] sm:$0xff] %vm19_vm0, %v1237_v0 }
   0xb   :  { %v1183_v26 = vld [vmem:[%s1652_s1 + $0x8] sm:$0xff]   ;;  %v1187_v30 = vld [vmem:[%s1652_s1] sm:$0xff]   ;;  %30 = vst.msk [vmem:[#allocation2 + $0x50] sm:$0xff] %vm19_vm0, %v1237_v0  ;;  %31 = vst.msk [vmem:[#allocation2 + $0x58] sm:$0xff] %vm19_vm0, %v1237_v0 }
   0xc   :  { %1033 = vmatpush3.bf16.msra.mxu0 %v1167_v10  ;;  %v1184_v27 = vld [vmem:[%s1652_s1 + $0x88] sm:$0xff]   ;;  %v1188_v31 = vld [vmem:[%s1652_s1 + $0x80] sm:$0xff]   ;;  %32 = vst.msk [vmem:[#allocation2 + $0x60] sm:$0xff] %vm19_vm0, %v1237_v0  ;;  %33 = vst.msk [vmem:[#allocation2 + $0x68] sm:$0xff] %vm19_vm0, %v1237_v0 }
   0xd   :  { %1097 = vmatpush3.bf16.msra.mxu1 %v1168_v11  ;;  %1034 = vmatprep.subr.bf16.mxu0 %v1169_v12  ;;  %v1189_v32 = vld [vmem:[%s1653_s0] ss:$16 sps:$4 sm:$0xff]   ;;  %v1191_v33 = vld [vmem:[%s1653_s0 + $0x4] ss:$16 sps:$4 sm:$0xff]   ;;  %v1192_v34 = vld [vmem:[%s1653_s0 + $0x8] ss:$16 sps:$4 sm:$0xff]  }
   0xe   :  { %1098 = vmatprep.subr.bf16.mxu1 %v1170_v13  ;;  %v1194_v35 = vld [vmem:[%s1653_s0 + $0xc] ss:$16 sps:$4 sm:$0xff]   ;;  %532 = vmatprep.mubr.bf16.mxu0 %v1191_v33  ;;  %v1195_v36 = vld [vmem:[%s1653_s0 + $0x24] ss:$16 sps:$4 sm:$0xff]   ;;  %v1199_v38 = vld [vmem:[%s1653_s0 + $0x20] ss:$16 sps:$4 sm:$0xff]  }
   0xf   :  { %629 = vmatprep.mubr.bf16.mxu1 %v1194_v35  ;;  %v1197_v37 = vld [vmem:[%s1653_s0 + $0x2c] ss:$16 sps:$4 sm:$0xff]   ;;  %v1200_v39 = vld [vmem:[%s1653_s0 + $0x28] ss:$16 sps:$4 sm:$0xff]   ;;  %v1201_v40 = vld [vmem:[%s1653_s0 + $0x44] ss:$16 sps:$4 sm:$0xff]  }
  0x10   :  { %1035 = vmatpush3.bf16.msra.mxu0 %v1171_v14  ;;  %v1203_v41 = vld [vmem:[%s1653_s0 + $0x4c] ss:$16 sps:$4 sm:$0xff]   ;;  %v1205_v42 = vld [vmem:[%s1653_s0 + $0x40] ss:$16 sps:$4 sm:$0xff]   ;;  %v1206_v43 = vld [vmem:[%s1653_s0 + $0x48] ss:$16 sps:$4 sm:$0xff]  }
  0x11   :  { %1099 = vmatpush3.bf16.msra.mxu1 %v1172_v15  ;;  %1036 = vmatprep.subr.bf16.mxu0 %v1173_v16  ;;  %v1207_v44 = vld [vmem:[%s1653_s0 + $0x64] ss:$16 sps:$4 sm:$0xff]   ;;  %v1209_v45 = vld [vmem:[%s1653_s0 + $0x6c] ss:$16 sps:$4 sm:$0xff]   ;;  %v1211_v46 = vld [vmem:[%s1653_s0 + $0x60] ss:$16 sps:$4 sm:$0xff]  }
  0x12   :  { %1100 = vmatprep.subr.bf16.mxu1 %v1174_v17  ;;  %v1212_v47 = vld [vmem:[%s1653_s0 + $0x68] ss:$16 sps:$4 sm:$0xff]   ;;  %v1213_v48 = vld [vmem:[%s1653_s0 + $0x84] ss:$16 sps:$4 sm:$0xff]   ;;  %v1215_v49 = vld [vmem:[%s1653_s0 + $0x8c] ss:$16 sps:$4 sm:$0xff]  }
  0x13   :  { %v1217_v50 = vld [vmem:[%s1653_s0 + $0x80] ss:$16 sps:$4 sm:$0xff]   ;;  %v1218_v51 = vld [vmem:[%s1653_s0 + $0x88] ss:$16 sps:$4 sm:$0xff]   ;;  %v1219_v52 = vld [vmem:[%s1653_s0 + $0xa4] ss:$16 sps:$4 sm:$0xff]  }
  0x14   :  { %1037 = vmatpush3.bf16.msra.mxu0 %v1175_v18  ;;  %v1221_v53 = vld [vmem:[%s1653_s0 + $0xac] ss:$16 sps:$4 sm:$0xff]   ;;  %v1223_v54 = vld [vmem:[%s1653_s0 + $0xa0] ss:$16 sps:$4 sm:$0xff]   ;;  %v1224_v55 = vld [vmem:[%s1653_s0 + $0xa8] ss:$16 sps:$4 sm:$0xff]  }
  0x15   :  { %1101 = vmatpush3.bf16.msra.mxu1 %v1176_v19  ;;  %1038 = vmatprep.subr.bf16.mxu0 %v1177_v20  ;;  %v1225_v56 = vld [vmem:[%s1653_s0 + $0xc4] ss:$16 sps:$4 sm:$0xff]   ;;  %v1227_v57 = vld [vmem:[%s1653_s0 + $0xcc] ss:$16 sps:$4 sm:$0xff]   ;;  %v1229_v58 = vld [vmem:[%s1653_s0 + $0xc0] ss:$16 sps:$4 sm:$0xff]  }
  0x16   :  { %1102 = vmatprep.subr.bf16.mxu1 %v1178_v21  ;;  %v1230_v59 = vld [vmem:[%s1653_s0 + $0xc8] ss:$16 sps:$4 sm:$0xff]   ;;  %v1231_v60 = vld [vmem:[%s1653_s0 + $0xe4] ss:$16 sps:$4 sm:$0xff]   ;;  %v1233_v61 = vld [vmem:[%s1653_s0 + $0xec] ss:$16 sps:$4 sm:$0xff]  }
  0x17   :  { %v1235_v62 = vld [vmem:[%s1653_s0 + $0xe0] ss:$16 sps:$4 sm:$0xff]   ;;  %v1236_v63 = vld [vmem:[%s1653_s0 + $0xe8] ss:$16 sps:$4 sm:$0xff]   ;;  %34 = vst.msk [vmem:[#allocation2 + $0x70] sm:$0xff] %vm19_vm0, %v1237_v0  ;;  %35 = vst.msk [vmem:[#allocation2 + $0x78] sm:$0xff] %vm19_vm0, %v1237_v0 }
  0x18   :  { %1039 = vmatpush3.bf16.msra.mxu0 %v1179_v22  ;;  %v36_v8 = vld [vmem:[#allocation2] sm:$0xff]  ;;  %v37_v17 = vld [vmem:[#allocation2 + $0x8] sm:$0xff] }
  0x19   :  { %1103 = vmatpush3.bf16.msra.mxu1 %v1180_v23  ;;  %1040 = vmatprep.subr.bf16.mxu0 %v1181_v24 }
  0x1a   :  { %1104 = vmatprep.subr.bf16.mxu1 %v1182_v25 }
  0x1c   :  { %1041 = vmatpush3.bf16.msra.mxu0 %v1183_v26  ;;  %v38_v26 = vld [vmem:[#allocation2 + $0x10] sm:$0xff] }
  0x1d   :  { %1105 = vmatpush3.bf16.msra.mxu1 %v1184_v27  ;;  %1042 = vmatprep.subr.bf16.mxu0 %v1185_v28 }
  0x1e   :  { %1106 = vmatprep.subr.bf16.mxu1 %v1186_v29 }
  0x20   :  { %1043 = vmatpush3.bf16.msra.mxu0 %v1187_v30 }
  0x21   :  { %1107 = vmatpush3.bf16.msra.mxu1 %v1188_v31 }
  0x23   :  { %533 = vmatmul.mubr.bf16.vlgmr.msra.gmra.mxu0 %v1189_v32 }
  0x24   :  { %630 = vmatmul.mubr.bf16.vlgmr.msra.gmra.mxu1 %v1192_v34  ;;  %540 = vmatprep.mubr.bf16.mxu0 %v1195_v36  ;;  %v39_v36 = vld [vmem:[#allocation2 + $0x18] sm:$0xff] }
  0x25   :  { %637 = vmatprep.mubr.bf16.mxu1 %v1197_v37 }
  0x2b   :  { %541 = vmatmul.mubr.bf16.gmra.mxu0 %v1199_v38 }
  0x2c   :  { %638 = vmatmul.mubr.bf16.gmra.mxu1 %v1200_v39  ;;  %548 = vmatprep.mubr.bf16.mxu0 %v1201_v40 }
  0x2d   :  { %645 = vmatprep.mubr.bf16.mxu1 %v1203_v41 }
  0x33   :  { %549 = vmatmul.mubr.bf16.gmra.mxu0 %v1205_v42 }
  0x34   :  { %646 = vmatmul.mubr.bf16.gmra.mxu1 %v1206_v43  ;;  %556 = vmatprep.mubr.bf16.mxu0 %v1207_v44 }
  0x35   :  { %653 = vmatprep.mubr.bf16.mxu1 %v1209_v45 }
  0x3b   :  { %557 = vmatmul.mubr.bf16.gmra.mxu0 %v1211_v46 }
  0x3c   :  { %654 = vmatmul.mubr.bf16.gmra.mxu1 %v1212_v47  ;;  %564 = vmatprep.mubr.bf16.mxu0 %v1213_v48  ;;  %v40_v47 = vld [vmem:[#allocation2 + $0x20] sm:$0xff] }
  0x3d   :  { %661 = vmatprep.mubr.bf16.mxu1 %v1215_v49 }
  0x43   :  { %565 = vmatmul.mubr.bf16.gmra.mxu0 %v1217_v50 }
  0x44   :  { %662 = vmatmul.mubr.bf16.gmra.mxu1 %v1218_v51  ;;  %572 = vmatprep.mubr.bf16.mxu0 %v1219_v52 }
  0x45   :  { %669 = vmatprep.mubr.bf16.mxu1 %v1221_v53 }
  0x4b   :  { %573 = vmatmul.mubr.bf16.gmra.mxu0 %v1223_v54 }
  0x4c   :  { %670 = vmatmul.mubr.bf16.gmra.mxu1 %v1224_v55  ;;  %580 = vmatprep.mubr.bf16.mxu0 %v1225_v56 }
  0x4d   :  { %677 = vmatprep.mubr.bf16.mxu1 %v1227_v57 }
  0x53   :  { %581 = vmatmul.mubr.bf16.gmra.mxu0 %v1229_v58  ;;  %v41_v58 = vld [vmem:[#allocation2 + $0x28] sm:$0xff] }
  0x54   :  { %678 = vmatmul.mubr.bf16.gmra.mxu1 %v1230_v59  ;;  %588 = vmatprep.mubr.bf16.mxu0 %v1231_v60 }
  0x55   :  { %685 = vmatprep.mubr.bf16.mxu1 %v1233_v61 }
  0x5b   :  { %589 = vmatmul.mubr.bf16.gmra.mxu0 %v1235_v62 }
  0x5c   :  { %686 = vmatmul.mubr.bf16.gmra.mxu1 %v1236_v63 }
  0xe3   :  { %v1044_v1 = vpop.f32.mrf.mxu0 }
  0xe4   :  { %v1108_v2 = vpop.f32.mrf.mxu1 }
  0xe5   :  { %v1045_v3 = vpop.f32.mrf.mxu0 }
  0xe6   :  { %v1046_v4 = vadd.f32 %v1045_v3, %v1044_v1  ;;  %v1109_v5 = vpop.f32.mrf.mxu1 }
  0xe7   :  { %v1110_v6 = vadd.f32 %v1109_v5, %v1108_v2  ;;  %v1047_v7 = vpop.f32.mrf.mxu0  ;;  %v42_v5 = vld [vmem:[#allocation2 + $0x30] sm:$0xff] }
  0xe8   :  { %v1111_v9 = vpop.f32.mrf.mxu1 }
  0xe9   :  { %v632_v10 = vadd.f32 %v1110_v6, %v1046_v4  ;;  %v1048_v11 = vpop.f32.mrf.mxu0 }
  0xea   :  { %v1049_v12 = vadd.f32 %v1048_v11, %v1047_v7  ;;  %v1112_v13 = vpop.f32.mrf.mxu1 }
  0xeb   :  { %v694_v14 = vadd.f32 %v632_v10, %v36_v8  ;;  %v1113_v15 = vadd.f32 %v1112_v13, %v1111_v9  ;;  %v1050_v16 = vpop.f32.mrf.mxu0 }
  0xec   :  { %v1114_v18 = vpop.f32.mrf.mxu1 }
  0xed   :  { %711 = vst.msk [vmem:[#allocation2] sm:$0xff] %vm19_vm0, %v694_v14  ;;  %v635_v19 = vadd.f32 %v1113_v15, %v1049_v12  ;;  %v1051_v20 = vpop.f32.mrf.mxu0 }
  0xee   :  { %v1052_v21 = vadd.f32 %v1051_v20, %v1050_v16  ;;  %v1115_v22 = vpop.f32.mrf.mxu1  ;;  %v43_v16 = vld [vmem:[#allocation2 + $0x38] sm:$0xff] }
  0xef   :  { %v695_v23 = vadd.f32 %v635_v19, %v37_v17  ;;  %v1116_v24 = vadd.f32 %v1115_v22, %v1114_v18  ;;  %v1053_v25 = vpop.f32.mrf.mxu0 }
  0xf0   :  { %v1117_v27 = vpop.f32.mrf.mxu1 }
  0xf1   :  { %712 = vst.msk [vmem:[#allocation2 + $0x8] sm:$0xff] %vm19_vm0, %v695_v23  ;;  %v640_v28 = vadd.f32 %v1116_v24, %v1052_v21  ;;  %v1054_v29 = vpop.f32.mrf.mxu0 }
  0xf2   :  { %v1055_v30 = vadd.f32 %v1054_v29, %v1053_v25  ;;  %v1118_v31 = vpop.f32.mrf.mxu1 }
  0xf3   :  { %v696_v32 = vadd.f32 %v640_v28, %v38_v26  ;;  %v1119_v33 = vadd.f32 %v1118_v31, %v1117_v27  ;;  %v1056_v34 = vpop.f32.mrf.mxu0  ;;  %v44_v27 = vld [vmem:[#allocation2 + $0x40] sm:$0xff] }
  0xf4   :  { %v1473_v35 = vld [vmem:[#allocation2] sm:$0xff]  ;;  %v1120_v37 = vpop.f32.mrf.mxu1 }
  0xf5   :  { %v1012_v38 = vpack.c.bf16 %v1473_v35, %v1473_v35  ;;  %713 = vst.msk [vmem:[#allocation2 + $0x10] sm:$0xff] %vm19_vm0, %v696_v32  ;;  %v643_v39 = vadd.f32 %v1119_v33, %v1055_v30  ;;  %v1057_v40 = vpop.f32.mrf.mxu0 }
  0xf6   :  { %v1058_v41 = vadd.f32 %v1057_v40, %v1056_v34  ;;  %v1121_v42 = vpop.f32.mrf.mxu1 }
  0xf7   :  { %811 = vst.msk [vmem:[%s1654_s2] sm:$0xf] %vm810_vm1, %v1012_v38  ;;  %v697_v43 = vadd.f32 %v643_v39, %v39_v36  ;;  %v1122_v44 = vadd.f32 %v1121_v42, %v1120_v37  ;;  %v1059_v45 = vpop.f32.mrf.mxu0  ;;  %v45_v39 = vld [vmem:[#allocation2 + $0x48] sm:$0xff] }
  0xf8   :  { %v1482_v46 = vld [vmem:[#allocation2 + $0x8] sm:$0xff]  ;;  %v1123_v48 = vpop.f32.mrf.mxu1 }
  0xf9   :  { %v1013_v49 = vpack.c.bf16 %v1482_v46, %v1482_v46  ;;  %714 = vst.msk [vmem:[#allocation2 + $0x18] sm:$0xff] %vm19_vm0, %v697_v43  ;;  %v648_v50 = vadd.f32 %v1122_v44, %v1058_v41  ;;  %v1060_v51 = vpop.f32.mrf.mxu0 }
  0xfa   :  { %v1061_v52 = vadd.f32 %v1060_v51, %v1059_v45  ;;  %v1124_v53 = vpop.f32.mrf.mxu1 }
  0xfb   :  { %812 = vst.msk [vmem:[%s1654_s2 + $0x4] sm:$0xf] %vm810_vm1, %v1013_v49  ;;  %v698_v54 = vadd.f32 %v648_v50, %v40_v47  ;;  %v1125_v55 = vadd.f32 %v1124_v53, %v1123_v48  ;;  %v1062_v56 = vpop.f32.mrf.mxu0  ;;  %v867_v50 = vmul.f32 %v1482_v46, %v1482_v46 }
  0xfc   :  { %v1491_v57 = vld [vmem:[#allocation2 + $0x10] sm:$0xff]  ;;  %v1126_v59 = vpop.f32.mrf.mxu1 }
  0xfd   :  { %v1014_v60 = vpack.c.bf16 %v1491_v57, %v1491_v57  ;;  %715 = vst.msk [vmem:[#allocation2 + $0x20] sm:$0xff] %vm19_vm0, %v698_v54  ;;  %v651_v61 = vadd.f32 %v1125_v55, %v1061_v52  ;;  %v1063_v62 = vpop.f32.mrf.mxu0  ;;  %v46_v52 = vld [vmem:[#allocation2 + $0x50] sm:$0xff] }
  0xfe   :  { %v1064_v63 = vadd.f32 %v1063_v62, %v1062_v56  ;;  %v1127_v0 = vpop.f32.mrf.mxu1  ;;  %v868_v62 = vmul.f32 %v1491_v57, %v1491_v57 }
  0xff   :  { %813 = vst.msk [vmem:[%s1654_s2 + $0x8] sm:$0xf] %vm810_vm1, %v1014_v60  ;;  %v699_v1 = vadd.f32 %v651_v61, %v41_v58  ;;  %v1128_v2 = vadd.f32 %v1127_v0, %v1126_v59  ;;  %v1065_v3 = vpop.f32.mrf.mxu0  ;;  %v866_v58 = vmul.f32 %v1473_v35, %v1473_v35  ;;  %v828_v61 = vsel %vm19_vm0, %v1482_v46, 0.0 }
 0x100   :  { %v1500_v4 = vld [vmem:[#allocation2 + $0x18] sm:$0xff]  ;;  %v1129_v6 = vpop.f32.mrf.mxu1 }
 0x101   :  { %v1015_v7 = vpack.c.bf16 %v1500_v4, %v1500_v4  ;;  %716 = vst.msk [vmem:[#allocation2 + $0x28] sm:$0xff] %vm19_vm0, %v699_v1  ;;  %v656_v8 = vadd.f32 %v1128_v2, %v1064_v63  ;;  %v1066_v9 = vpop.f32.mrf.mxu0  ;;  %v827_v2 = vsel %vm19_vm0, %v1473_v35, 0.0  ;;  %v882_v35 = vsel %vm19_vm0, %v866_v58, 0.0 }
 0x102   :  { %v1067_v10 = vadd.f32 %v1066_v9, %v1065_v3  ;;  %v1130_v11 = vpop.f32.mrf.mxu1  ;;  %v883_v3 = vsel %vm19_vm0, %v867_v50, 0.0 }
 0x103   :  { %814 = vst.msk [vmem:[%s1654_s2 + $0xc] sm:$0xf] %vm810_vm1, %v1015_v7  ;;  %v700_v12 = vadd.f32 %v656_v8, %v42_v5  ;;  %v1131_v13 = vadd.f32 %v1130_v11, %v1129_v6  ;;  %v1068_v14 = vpop.f32.mrf.mxu0  ;;  %v47_v6 = vld [vmem:[#allocation2 + $0x58] sm:$0xff]  ;;  %v830_v7 = vsel %vm19_vm0, %v1491_v57, 0.0  ;;  %v869_v8 = vmul.f32 %v1500_v4, %v1500_v4 }
 0x104   :  { %v1509_v15 = vld [vmem:[#allocation2 + $0x20] sm:$0xff]  ;;  %v1132_v17 = vpop.f32.mrf.mxu1  ;;  %v885_v57 = vsel %vm19_vm0, %v868_v62, 0.0 }
 0x105   :  { %v1016_v18 = vpack.c.bf16 %v1509_v15, %v1509_v15  ;;  %717 = vst.msk [vmem:[#allocation2 + $0x30] sm:$0xff] %vm19_vm0, %v700_v12  ;;  %v659_v19 = vadd.f32 %v1131_v13, %v1067_v10  ;;  %v1069_v20 = vpop.f32.mrf.mxu0  ;;  %v829_v12 = vadd.f32 %v828_v61, %v827_v2  ;;  %v870_v13 = vmul.f32 %v1509_v15, %v1509_v15 }
 0x106   :  { %v1070_v21 = vadd.f32 %v1069_v20, %v1068_v14  ;;  %v1133_v22 = vpop.f32.mrf.mxu1 }
 0x107   :  { %815 = vst.msk [vmem:[%s1654_s2 + $0x10] sm:$0xf] %vm810_vm1, %v1016_v18  ;;  %v701_v23 = vadd.f32 %v659_v19, %v43_v16  ;;  %v1134_v24 = vadd.f32 %v1133_v22, %v1132_v17  ;;  %v1071_v25 = vpop.f32.mrf.mxu0  ;;  %v832_v17 = vsel %vm19_vm0, %v1500_v4, 0.0  ;;  %v831_v22 = vadd.f32 %v830_v7, %v829_v12 }
 0x108   :  { %v1518_v26 = vld [vmem:[#allocation2 + $0x28] sm:$0xff]  ;;  %v1135_v28 = vpop.f32.mrf.mxu1  ;;  %v834_v4 = vsel %vm19_vm0, %v1509_v15, 0.0 }
 0x109   :  { %v1017_v29 = vpack.c.bf16 %v1518_v26, %v1518_v26  ;;  %718 = vst.msk [vmem:[#allocation2 + $0x38] sm:$0xff] %vm19_vm0, %v701_v23  ;;  %v664_v30 = vadd.f32 %v1134_v24, %v1070_v21  ;;  %v1072_v31 = vpop.f32.mrf.mxu0  ;;  %v884_v21 = vadd.f32 %v883_v3, %v882_v35  ;;  %v871_v23 = vmul.f32 %v1518_v26, %v1518_v26 }
 0x10a   :  { %v1073_v32 = vadd.f32 %v1072_v31, %v1071_v25  ;;  %v1136_v33 = vpop.f32.mrf.mxu1  ;;  %v48_v25 = vld [vmem:[#allocation2 + $0x60] sm:$0xff] }
 0x10b   :  { %816 = vst.msk [vmem:[%s1654_s2 + $0x14] sm:$0xf] %vm810_vm1, %v1017_v29  ;;  %v702_v34 = vadd.f32 %v664_v30, %v44_v27  ;;  %v1137_v36 = vadd.f32 %v1136_v33, %v1135_v28  ;;  %v1074_v37 = vpop.f32.mrf.mxu0  ;;  %v887_v28 = vsel %vm19_vm0, %v869_v8, 0.0  ;;  %v833_v33 = vadd.f32 %v832_v17, %v831_v22 }
 0x10c   :  { %v1527_v38 = vld [vmem:[#allocation2 + $0x30] sm:$0xff]  ;;  %v1138_v40 = vpop.f32.mrf.mxu1 }
 0x10d   :  { %v1018_v41 = vpack.c.bf16 %v1527_v38, %v1527_v38  ;;  %719 = vst.msk [vmem:[#allocation2 + $0x40] sm:$0xff] %vm19_vm0, %v702_v34  ;;  %v667_v42 = vadd.f32 %v1137_v36, %v1073_v32  ;;  %v1075_v43 = vpop.f32.mrf.mxu0  ;;  %v886_v32 = vadd.f32 %v885_v57, %v884_v21  ;;  %v889_v34 = vsel %vm19_vm0, %v870_v13, 0.0 }
 0x10e   :  { %v1076_v44 = vadd.f32 %v1075_v43, %v1074_v37  ;;  %v1139_v45 = vpop.f32.mrf.mxu1 }
 0x10f   :  { %817 = vst.msk [vmem:[%s1654_s2 + $0x18] sm:$0xf] %vm810_vm1, %v1018_v41  ;;  %v703_v47 = vadd.f32 %v667_v42, %v45_v39  ;;  %v1140_v48 = vadd.f32 %v1139_v45, %v1138_v40  ;;  %v1077_v49 = vpop.f32.mrf.mxu0  ;;  %v836_v39 = vsel %vm19_vm0, %v1518_v26, 0.0  ;;  %v872_v40 = vmul.f32 %v1527_v38, %v1527_v38 }
 0x110   :  { %v1538_v51 = vld [vmem:[#allocation2 + $0x38] sm:$0xff]  ;;  %v1141_v53 = vpop.f32.mrf.mxu1  ;;  %v888_v43 = vadd.f32 %v887_v28, %v886_v32  ;;  %v891_v45 = vsel %vm19_vm0, %v871_v23, 0.0  ;;  %v838_v26 = vsel %vm19_vm0, %v1527_v38, 0.0 }
 0x111   :  { %v1019_v54 = vpack.c.bf16 %v1538_v51, %v1538_v51  ;;  %720 = vst.msk [vmem:[#allocation2 + $0x48] sm:$0xff] %vm19_vm0, %v703_v47  ;;  %v672_v55 = vadd.f32 %v1140_v48, %v1076_v44  ;;  %v1078_v56 = vpop.f32.mrf.mxu0  ;;  %v835_v44 = vadd.f32 %v834_v4, %v833_v33  ;;  %v49_v48 = vld [vmem:[#allocation2 + $0x68] sm:$0xff]  ;;  %v873_v50 = vmul.f32 %v1538_v51, %v1538_v51  ;;  %v51_v23 = vld [vmem:[#allocation2 + $0x78] sm:$0xff] }
 0x112   :  { %v1079_v59 = vadd.f32 %v1078_v56, %v1077_v49  ;;  %v1142_v60 = vpop.f32.mrf.mxu1  ;;  %v893_v61 = vsel %vm19_vm0, %v872_v40, 0.0  ;;  %v840_v38 = vsel %vm19_vm0, %v1538_v51, 0.0 }
 0x113   :  { %818 = vst.msk [vmem:[%s1654_s2 + $0x1c] sm:$0xf] %vm810_vm1, %v1019_v54  ;;  %v704_v63 = vadd.f32 %v672_v55, %v46_v52  ;;  %v1143_v0 = vadd.f32 %v1142_v60, %v1141_v53  ;;  %v1080_v1 = vpop.f32.mrf.mxu0  ;;  %v890_v55 = vadd.f32 %v889_v34, %v888_v43  ;;  %v837_v56 = vadd.f32 %v836_v39, %v835_v44 }
 0x114   :  { %v1556_v5 = vld [vmem:[#allocation2 + $0x40] sm:$0xff]  ;;  %v1144_v46 = vpop.f32.mrf.mxu1  ;;  %v895_v8 = vsel %vm19_vm0, %v873_v50, 0.0 }
 0x115   :  { %v1020_v9 = vpack.c.bf16 %v1556_v5, %v1556_v5  ;;  %721 = vst.msk [vmem:[#allocation2 + $0x50] sm:$0xff] %vm19_vm0, %v704_v63  ;;  %v675_v10 = vadd.f32 %v1143_v0, %v1079_v59  ;;  %v1081_v11 = vpop.f32.mrf.mxu0  ;;  %v874_v58 = vmul.f32 %v1556_v5, %v1556_v5  ;;  %v839_v2 = vadd.f32 %v838_v26, %v837_v56 }
 0x116   :  { %v1082_v14 = vadd.f32 %v1081_v11, %v1080_v1  ;;  %v1145_v16 = vpop.f32.mrf.mxu1  ;;  %v892_v1 = vadd.f32 %v891_v45, %v890_v55 }
 0x117   :  { %819 = vst.msk [vmem:[%s1654_s2 + $0x20] sm:$0xf] %vm810_vm1, %v1020_v9  ;;  %v705_v18 = vadd.f32 %v675_v10, %v47_v6  ;;  %v1146_v19 = vadd.f32 %v1145_v16, %v1144_v46  ;;  %v1083_v20 = vpop.f32.mrf.mxu0  ;;  %v50_v46 = vld [vmem:[#allocation2 + $0x70] sm:$0xff]  ;;  %v842_v9 = vsel %vm19_vm0, %v1556_v5, 0.0  ;;  %v841_v12 = vadd.f32 %v840_v38, %v839_v2 }
 0x118   :  { %v739_v24 = vld [vmem:[#allocation2 + $0x48] sm:$0xff]  ;;  %v1147_v27 = vpop.f32.mrf.mxu1  ;;  %v894_v35 = vadd.f32 %v893_v61, %v892_v1  ;;  %v897_v13 = vsel %vm19_vm0, %v874_v58, 0.0 }
 0x119   :  { %v1021_v29 = vpack.c.bf16 %v739_v24, %v739_v24  ;;  %722 = vst.msk [vmem:[#allocation2 + $0x58] sm:$0xff] %vm19_vm0, %v705_v18  ;;  %v680_v30 = vadd.f32 %v1146_v19, %v1082_v14  ;;  %v1084_v31 = vpop.f32.mrf.mxu0  ;;  %v875_v3 = vmul.f32 %v739_v24, %v739_v24  ;;  %v844_v57 = vsel %vm19_vm0, %v739_v24, 0.0 }
 0x11a   :  { %v1085_v36 = vadd.f32 %v1084_v31, %v1083_v20  ;;  %v1148_v37 = vpop.f32.mrf.mxu1  ;;  %v896_v19 = vadd.f32 %v895_v8, %v894_v35  ;;  %v843_v20 = vadd.f32 %v842_v9, %v841_v12 }
 0x11b   :  { %820 = vst.msk [vmem:[%s1654_s2 + $0x24] sm:$0xf] %vm810_vm1, %v1021_v29  ;;  %v706_v15 = vadd.f32 %v680_v30, %v48_v25  ;;  %v1149_v41 = vadd.f32 %v1148_v37, %v1147_v27  ;;  %v1086_v42 = vpop.f32.mrf.mxu0  ;;  %v899_v21 = vsel %vm19_vm0, %v875_v3, 0.0 }
 0x11c   :  { %v740_v47 = vld [vmem:[#allocation2 + $0x50] sm:$0xff]  ;;  %v1150_v49 = vpop.f32.mrf.mxu1  ;;  %v898_v4 = vadd.f32 %v897_v13, %v896_v19  ;;  %v845_v29 = vadd.f32 %v844_v57, %v843_v20 }
 0x11d   :  { %v1022_v52 = vpack.c.bf16 %v740_v47, %v740_v47  ;;  %723 = vst.msk [vmem:[#allocation2 + $0x60] sm:$0xff] %vm19_vm0, %v706_v15  ;;  %v683_v53 = vadd.f32 %v1149_v41, %v1085_v36  ;;  %v1087_v54 = vpop.f32.mrf.mxu0  ;;  %v876_v17 = vmul.f32 %v740_v47, %v740_v47  ;;  %v846_v25 = vsel %vm19_vm0, %v740_v47, 0.0 }
 0x11e   :  { %v1088_v59 = vadd.f32 %v1087_v54, %v1086_v42  ;;  %v1151_v60 = vpop.f32.mrf.mxu1  ;;  %v900_v34 = vadd.f32 %v899_v21, %v898_v4  ;;  %v847_v36 = vadd.f32 %v846_v25, %v845_v29 }
 0x11f   :  { %821 = vst.msk [vmem:[%s1654_s2 + $0x28] sm:$0xf] %vm810_vm1, %v1022_v52  ;;  %v707_v62 = vadd.f32 %v683_v53, %v49_v48  ;;  %v1152_v63 = vadd.f32 %v1151_v60, %v1150_v49  ;;  %v1089_v0 = vpop.f32.mrf.mxu0  ;;  %v901_v30 = vsel %vm19_vm0, %v876_v17, 0.0 }
 0x120   :  { %v741_v6 = vld [vmem:[#allocation2 + $0x58] sm:$0xff]  ;;  %v1153_v7 = vpop.f32.mrf.mxu1  ;;  %v902_v42 = vadd.f32 %v901_v30, %v900_v34 }
 0x121   :  { %v1023_v51 = vpack.c.bf16 %v741_v6, %v741_v6  ;;  %724 = vst.msk [vmem:[#allocation2 + $0x68] sm:$0xff] %vm19_vm0, %v707_v62  ;;  %v688_v10 = vadd.f32 %v1152_v63, %v1088_v59  ;;  %v1090_v11 = vpop.f32.mrf.mxu0  ;;  %v877_v27 = vmul.f32 %v741_v6, %v741_v6  ;;  %v848_v31 = vsel %vm19_vm0, %v741_v6, 0.0 }
 0x122   :  { %v1091_v14 = vadd.f32 %v1090_v11, %v1089_v0  ;;  %v1154_v16 = vpop.f32.mrf.mxu1  ;;  %v849_v43 = vadd.f32 %v848_v31, %v847_v36 }
 0x123   :  { %822 = vst.msk [vmem:[%s1654_s2 + $0x2c] sm:$0xf] %vm810_vm1, %v1023_v51  ;;  %v708_v5 = vadd.f32 %v688_v10, %v50_v46  ;;  %v1155_v18 = vadd.f32 %v1154_v16, %v1153_v7  ;;  %v903_v39 = vsel %vm19_vm0, %v877_v27, 0.0 }
 0x124   :  { %v742_v22 = vld [vmem:[#allocation2 + $0x60] sm:$0xff]  ;;  %v904_v47 = vadd.f32 %v903_v39, %v902_v42 }
 0x125   :  { %v1024_v28 = vpack.c.bf16 %v742_v22, %v742_v22  ;;  %725 = vst.msk [vmem:[#allocation2 + $0x70] sm:$0xff] %vm19_vm0, %v708_v5  ;;  %v691_v24 = vadd.f32 %v1155_v18, %v1091_v14  ;;  %v878_v32 = vmul.f32 %v742_v22, %v742_v22  ;;  %v850_v40 = vsel %vm19_vm0, %v742_v22, 0.0 }
 0x126   :  { %v851_v48 = vadd.f32 %v850_v40, %v849_v43 }
 0x127   :  { %823 = vst.msk [vmem:[%s1654_s2 + $0x30] sm:$0xf] %vm810_vm1, %v1024_v28  ;;  %v709_v33 = vadd.f32 %v691_v24, %v51_v23  ;;  %v905_v44 = vsel %vm19_vm0, %v878_v32, 0.0 }
 0x128   :  { %v743_v37 = vld [vmem:[#allocation2 + $0x68] sm:$0xff]  ;;  %v906_v54 = vadd.f32 %v905_v44, %v904_v47 }
 0x129   :  { %v1025_v15 = vpack.c.bf16 %v743_v37, %v743_v37  ;;  %v879_v41 = vmul.f32 %v743_v37, %v743_v37  ;;  %726 = vst.msk [vmem:[#allocation2 + $0x78] sm:$0xff] %vm19_vm0, %v709_v33  ;;  %v852_v45 = vsel %vm19_vm0, %v743_v37, 0.0 }
 0x12a   :  { %v853_v55 = vadd.f32 %v852_v45, %v851_v48 }
 0x12b   :  { %824 = vst.msk [vmem:[%s1654_s2 + $0x34] sm:$0xf] %vm810_vm1, %v1025_v15  ;;  %v907_v26 = vsel %vm19_vm0, %v879_v41, 0.0 }
 0x12c   :  { %v744_v49 = vld [vmem:[#allocation2 + $0x70] sm:$0xff]  ;;  %v908_v58 = vadd.f32 %v907_v26, %v906_v54 }
 0x12d   :  { %v1026_v50 = vpack.c.bf16 %v744_v49, %v744_v49  ;;  %v854_v52 = vsel %vm19_vm0, %v744_v49, 0.0  ;;  %v880_v53 = vmul.f32 %v744_v49, %v744_v49 }
 0x12e   :  { %v855_v59 = vadd.f32 %v854_v52, %v853_v55 }
 0x12f   :  { %825 = vst.msk [vmem:[%s1654_s2 + $0x38] sm:$0xf] %vm810_vm1, %v1026_v50  ;;  %v909_v56 = vsel %vm19_vm0, %v880_v53, 0.0 }
 0x130   :  { %v745_v60 = vld [vmem:[#allocation2 + $0x78] sm:$0xff]  ;;  %v910_v63 = vadd.f32 %v909_v56, %v908_v58 }
 0x131   :  { %v1027_v61 = vpack.c.bf16 %v745_v60, %v745_v60  ;;  %v856_v38 = vsel %vm19_vm0, %v745_v60, 0.0  ;;  %v881_v62 = vmul.f32 %v745_v60, %v745_v60 }
 0x132   :  { %v857_v0 = vadd.f32 %v856_v38, %v855_v59 }
 0x133   :  { %826 = vst.msk [vmem:[%s1654_s2 + $0x3c] sm:$0xf] %vm810_vm1, %v1027_v61  ;;  %v911_v1 = vsel %vm19_vm0, %v881_v62, 0.0 }
 0x134   :  { %v858_v2 = vrot.slane %v857_v0, 4  ;;  %v912_v3 = vadd.f32 %v911_v1, %v910_v63 }
 0x136   :  { %v859_v6 = vadd.f32 %v858_v2, %v857_v0  ;;  %v913_v46 = vrot.slane %v912_v3, 4 }
 0x138   :  { %v860_v7 = vrot.slane %v859_v6, 2  ;;  %v914_v8 = vadd.f32 %v913_v46, %v912_v3 }
 0x13a   :  { %v861_v9 = vadd.f32 %v860_v7, %v859_v6  ;;  %v915_v51 = vrot.slane %v914_v8, 2 }
 0x13c   :  { %v862_v10 = vrot.slane %v861_v9, 1  ;;  %v916_v11 = vadd.f32 %v915_v51, %v914_v8 }
 0x13e   :  { %v863_v35 = vadd.f32 %v862_v10, %v861_v9  ;;  %v917_v12 = vrot.slane %v916_v11, 1 }
 0x140   :  { %865 = vst.msk [vmem:[%s1655_s3] sm:$0x1] %vm864_vm2, %v863_v35  ;;  %v918_v13 = vadd.f32 %v917_v12, %v916_v11 }
 0x142   :  { %919 = vst.msk [vmem:[%s1656_s4] sm:$0x1] %vm864_vm2, %v918_v13 }

// kernel: turbnetd_forward.8
= control target key start
LH: loop header
LB: loop body
LE: loop exit
PB: predicated region body
PF: predicated region fallthrough
CT: control target
= control target key end

     0   :  { %vm19_vm0 = vcmask 523264   ;;  %vm980_vm1 = vcmask 519168   ;;  %vm1010_vm2 = vcmask 516096   ;;  %s1801_s1 = inlined_call_operand.vmem [shape: bf16[896,64], index: 1, kind: input, shape index: {}]   ;;  %s1802_s0 = inlined_call_operand.vmem [shape: bf16[64,896], index: 0, kind: input, shape index: {}]   ;;  %s1803_s2 = inlined_call_operand.vmem [shape: bf16[64,64], index: 2, kind: output, shape index: {0}]   ;;  %s1804_s3 = inlined_call_operand.vmem [shape: f32[1,1,64], index: 3, kind: output, shape index: {1}]   ;;  %s1805_s4 = inlined_call_operand.vmem [shape: f32[1,1,64], index: 4, kind: output, shape index: {2}]  }
   0x1   :  { %v1311_v0 = vld [vmem:[%s1801_s1 + $0x78] sm:$0xff]   ;;  %v1315_v4 = vld [vmem:[%s1801_s1 + $0x70] sm:$0xff]   ;;  %v1319_v8 = vld [vmem:[%s1801_s1 + $0x68] sm:$0xff]  }
   0x2   :  { %v1312_v1 = vld [vmem:[%s1801_s1 + $0xf8] sm:$0xff]   ;;  %1154 = vmatprep.subr.bf16.mxu0 %v1311_v0  ;;  %v1316_v5 = vld [vmem:[%s1801_s1 + $0xf0] sm:$0xff]   ;;  %v1320_v9 = vld [vmem:[%s1801_s1 + $0xe8] sm:$0xff]  }
   0x3   :  { %v1313_v2 = vld [vmem:[%s1801_s1 + $0x38] sm:$0xff]   ;;  %1194 = vmatprep.subr.bf16.mxu1 %v1312_v1  ;;  %v1317_v6 = vld [vmem:[%s1801_s1 + $0x30] sm:$0xff]   ;;  %v1321_v10 = vld [vmem:[%s1801_s1 + $0x28] sm:$0xff]  }
   0x4   :  { %v1314_v3 = vld [vmem:[%s1801_s1 + $0xb8] sm:$0xff]   ;;  %1155 = vmatpush3.bf16.msra.mxu0 %v1313_v2  ;;  %v1318_v7 = vld [vmem:[%s1801_s1 + $0xb0] sm:$0xff]   ;;  %v1322_v11 = vld [vmem:[%s1801_s1 + $0xa8] sm:$0xff]  }
   0x5   :  { %1195 = vmatpush3.bf16.msra.mxu1 %v1314_v3  ;;  %1156 = vmatprep.subr.bf16.mxu0 %v1315_v4  ;;  %v1323_v12 = vld [vmem:[%s1801_s1 + $0x60] sm:$0xff]   ;;  %v1327_v16 = vld [vmem:[%s1801_s1 + $0x58] sm:$0xff]   ;;  %v1331_v20 = vld [vmem:[%s1801_s1 + $0x50] sm:$0xff]  }
   0x6   :  { %1196 = vmatprep.subr.bf16.mxu1 %v1316_v5  ;;  %v1324_v13 = vld [vmem:[%s1801_s1 + $0xe0] sm:$0xff]   ;;  %v1328_v17 = vld [vmem:[%s1801_s1 + $0xd8] sm:$0xff]   ;;  %v1332_v21 = vld [vmem:[%s1801_s1 + $0xd0] sm:$0xff]  }
   0x7   :  { %v1325_v14 = vld [vmem:[%s1801_s1 + $0x20] sm:$0xff]   ;;  %v1329_v18 = vld [vmem:[%s1801_s1 + $0x18] sm:$0xff]   ;;  %v1333_v22 = vld [vmem:[%s1801_s1 + $0x10] sm:$0xff]  }
   0x8   :  { %1157 = vmatpush3.bf16.msra.mxu0 %v1317_v6  ;;  %v1326_v15 = vld [vmem:[%s1801_s1 + $0xa0] sm:$0xff]   ;;  %v1330_v19 = vld [vmem:[%s1801_s1 + $0x98] sm:$0xff]   ;;  %v1334_v23 = vld [vmem:[%s1801_s1 + $0x90] sm:$0xff]  }
   0x9   :  { %1197 = vmatpush3.bf16.msra.mxu1 %v1318_v7  ;;  %1158 = vmatprep.subr.bf16.mxu0 %v1319_v8  ;;  %v1335_v24 = vld [vmem:[%s1801_s1 + $0x48] sm:$0xff]   ;;  %v1339_v28 = vld [vmem:[%s1801_s1 + $0x40] sm:$0xff]   ;;  %v1349_v36 = vld [vmem:[%s1801_s1 + $0x178] sm:$0xff]  }
   0xa   :  { %1198 = vmatprep.subr.bf16.mxu1 %v1320_v9  ;;  %v1336_v25 = vld [vmem:[%s1801_s1 + $0xc8] sm:$0xff]   ;;  %v1340_v29 = vld [vmem:[%s1801_s1 + $0xc0] sm:$0xff]   ;;  %v1350_v37 = vld [vmem:[%s1801_s1 + $0x138] sm:$0xff]  }
   0xb   :  { %v1337_v26 = vld [vmem:[%s1801_s1 + $0x8] sm:$0xff]   ;;  %v1341_v30 = vld [vmem:[%s1801_s1] sm:$0xff]   ;;  %v1351_v38 = vld [vmem:[%s1801_s1 + $0x170] sm:$0xff]  }
   0xc   :  { %1159 = vmatpush3.bf16.msra.mxu0 %v1321_v10  ;;  %v1338_v27 = vld [vmem:[%s1801_s1 + $0x88] sm:$0xff]   ;;  %v1342_v31 = vld [vmem:[%s1801_s1 + $0x80] sm:$0xff]   ;;  %v1352_v39 = vld [vmem:[%s1801_s1 + $0x1b8] sm:$0xff]  }
   0xd   :  { %1199 = vmatpush3.bf16.msra.mxu1 %v1322_v11  ;;  %1160 = vmatprep.subr.bf16.mxu0 %v1323_v12  ;;  %v1343_v32 = vld [vmem:[%s1802_s0] ss:$28 sps:$4 sm:$0xff]   ;;  %v1346_v34 = vld [vmem:[%s1802_s0 + $0x8] ss:$28 sps:$4 sm:$0xff]   ;;  %v1353_v40 = vld [vmem:[%s1801_s1 + $0x130] sm:$0xff]  }
   0xe   :  { %1200 = vmatprep.subr.bf16.mxu1 %v1324_v13  ;;  %v1345_v33 = vld [vmem:[%s1802_s0 + $0x4] ss:$28 sps:$4 sm:$0xff]   ;;  %v1348_v35 = vld [vmem:[%s1802_s0 + $0xc] ss:$28 sps:$4 sm:$0xff]   ;;  %v1354_v41 = vld [vmem:[%s1802_s0 + $0x3c] ss:$28 sps:$4 sm:$0xff]  }
   0xf   :  { %692 = vmatprep.mubr.bf16.mxu0 %v1345_v33  ;;  %757 = vmatprep.mubr.bf16.mxu1 %v1348_v35  ;;  %v1356_v42 = vld [vmem:[%s1802_s0 + $0x44] ss:$28 sps:$4 sm:$0xff]   ;;  %v1358_v43 = vld [vmem:[%s1802_s0 + $0x38] ss:$28 sps:$4 sm:$0xff]   ;;  %v1360_v45 = vld [vmem:[%s1801_s1 + $0x168] sm:$0xff]  }
  0x10   :  { %1161 = vmatpush3.bf16.msra.mxu0 %v1325_v14  ;;  %v1359_v44 = vld [vmem:[%s1802_s0 + $0x40] ss:$28 sps:$4 sm:$0xff]   ;;  %v1361_v46 = vld [vmem:[%s1801_s1 + $0x1b0] sm:$0xff]   ;;  %v1362_v47 = vld [vmem:[%s1801_s1 + $0x128] sm:$0xff]  }
  0x11   :  { %1201 = vmatpush3.bf16.msra.mxu1 %v1326_v15  ;;  %1162 = vmatprep.subr.bf16.mxu0 %v1327_v16  ;;  %v1363_v48 = vld [vmem:[%s1801_s1 + $0x160] sm:$0xff]   ;;  %v1364_v49 = vld [vmem:[%s1801_s1 + $0x1a8] sm:$0xff]   ;;  %v1366_v51 = vld [vmem:[%s1802_s0 + $0x74] ss:$28 sps:$4 sm:$0xff]  }
  0x12   :  { %1202 = vmatprep.subr.bf16.mxu1 %v1328_v17  ;;  %v1365_v50 = vld [vmem:[%s1801_s1 + $0x120] sm:$0xff]   ;;  %v1368_v52 = vld [vmem:[%s1802_s0 + $0x7c] ss:$28 sps:$4 sm:$0xff]   ;;  %v1370_v53 = vld [vmem:[%s1802_s0 + $0x70] ss:$28 sps:$4 sm:$0xff]  }
  0x13   :  { %v1371_v54 = vld [vmem:[%s1802_s0 + $0x78] ss:$28 sps:$4 sm:$0xff]   ;;  %v1373_v56 = vld [vmem:[%s1801_s1 + $0x1a0] sm:$0xff]   ;;  %v1378_v61 = vld [vmem:[%s1802_s0 + $0xac] ss:$28 sps:$4 sm:$0xff]  }
  0x14   :  { %1163 = vmatpush3.bf16.msra.mxu0 %v1329_v18  ;;  %v1372_v55 = vld [vmem:[%s1801_s1 + $0x158] sm:$0xff]   ;;  %v1375_v58 = vld [vmem:[%s1801_s1 + $0x150] sm:$0xff]   ;;  %v1382_v63 = vld [vmem:[%s1802_s0 + $0xa8] ss:$28 sps:$4 sm:$0xff]  }
  0x15   :  { %1203 = vmatpush3.bf16.msra.mxu1 %v1330_v19  ;;  %1164 = vmatprep.subr.bf16.mxu0 %v1331_v20  ;;  %v1374_v57 = vld [vmem:[%s1801_s1 + $0x118] sm:$0xff]   ;;  %v1377_v60 = vld [vmem:[%s1801_s1 + $0x110] sm:$0xff]   ;;  %v1384_v1 = vld [vmem:[%s1801_s1 + $0x148] sm:$0xff]   ;;  %v1407_v20 = vmov 0.0  }
  0x16   :  { %1204 = vmatprep.subr.bf16.mxu1 %v1332_v21  ;;  %v1376_v59 = vld [vmem:[%s1801_s1 + $0x198] sm:$0xff]   ;;  %v1380_v62 = vld [vmem:[%s1802_s0 + $0xb4] ss:$28 sps:$4 sm:$0xff]   ;;  %v1386_v3 = vld [vmem:[%s1801_s1 + $0x108] sm:$0xff]   ;;  %20 = vst.msk [vmem:[#allocation2] sm:$0xff] %vm19_vm0, %v1407_v20 }
  0x17   :  { %v1383_v0 = vld [vmem:[%s1802_s0 + $0xb0] ss:$28 sps:$4 sm:$0xff]   ;;  %v1387_v4 = vld [vmem:[%s1801_s1 + $0x140] sm:$0xff]   ;;  %v1394_v10 = vld [vmem:[%s1802_s0 + $0x18] ss:$28 sps:$4 sm:$0xff]   ;;  %21 = vst.msk [vmem:[#allocation2 + $0x8] sm:$0xff] %vm19_vm0, %v1407_v20 }
  0x18   :  { %1165 = vmatpush3.bf16.msra.mxu0 %v1333_v22  ;;  %v1385_v2 = vld [vmem:[%s1801_s1 + $0x190] sm:$0xff]   ;;  %v1388_v5 = vld [vmem:[%s1801_s1 + $0x188] sm:$0xff]   ;;  %v1389_v6 = vld [vmem:[%s1801_s1 + $0x100] sm:$0xff]   ;;  %22 = vst.msk [vmem:[#allocation2 + $0x10] sm:$0xff] %vm19_vm0, %v1407_v20 }
  0x19   :  { %1205 = vmatpush3.bf16.msra.mxu1 %v1334_v23  ;;  %1166 = vmatprep.subr.bf16.mxu0 %v1335_v24  ;;  %v1390_v7 = vld [vmem:[%s1802_s0 + $0x10] ss:$28 sps:$4 sm:$0xff]   ;;  %v1393_v9 = vld [vmem:[%s1801_s1 + $0x180] sm:$0xff]   ;;  %v1404_v18 = vld [vmem:[%s1802_s0 + $0xbc] ss:$28 sps:$4 sm:$0xff]   ;;  %23 = vst.msk [vmem:[#allocation2 + $0x18] sm:$0xff] %vm19_vm0, %v1407_v20 }
  0x1a   :  { %1206 = vmatprep.subr.bf16.mxu1 %v1336_v25  ;;  %v1392_v8 = vld [vmem:[%s1802_s0 + $0x14] ss:$28 sps:$4 sm:$0xff]   ;;  %v1396_v11 = vld [vmem:[%s1802_s0 + $0x4c] ss:$28 sps:$4 sm:$0xff]   ;;  %v1399_v15 = vld [vmem:[%s1802_s0 + $0x84] ss:$28 sps:$4 sm:$0xff]  }
  0x1b   :  { %v1395_v12 = vld [vmem:[%s1802_s0 + $0x50] ss:$28 sps:$4 sm:$0xff]   ;;  %v1402_v13 = vld [vmem:[%s1802_s0 + $0x88] ss:$28 sps:$4 sm:$0xff]   ;;  %v1403_v16 = vld [vmem:[%s1802_s0 + $0xc0] ss:$28 sps:$4 sm:$0xff]  }
  0x1c   :  { %1167 = vmatpush3.bf16.msra.mxu0 %v1337_v26  ;;  %v1398_v14 = vld [vmem:[%s1802_s0 + $0x48] ss:$28 sps:$4 sm:$0xff]   ;;  %v1401_v17 = vld [vmem:[%s1802_s0 + $0x80] ss:$28 sps:$4 sm:$0xff]   ;;  %v1406_v19 = vld [vmem:[%s1802_s0 + $0xb8] ss:$28 sps:$4 sm:$0xff]  }
  0x1d   :  { %1207 = vmatpush3.bf16.msra.mxu1 %v1338_v27  ;;  %1168 = vmatprep.subr.bf16.mxu0 %v1339_v28  ;;  %24 = vst.msk [vmem:[#allocation2 + $0x20] sm:$0xff] %vm19_vm0, %v1407_v20  ;;  %25 = vst.msk [vmem:[#allocation2 + $0x28] sm:$0xff] %vm19_vm0, %v1407_v20 }
  0x1e   :  { %1208 = vmatprep.subr.bf16.mxu1 %v1340_v29  ;;  %26 = vst.msk [vmem:[#allocation2 + $0x30] sm:$0xff] %vm19_vm0, %v1407_v20  ;;  %27 = vst.msk [vmem:[#allocation2 + $0x38] sm:$0xff] %vm19_vm0, %v1407_v20 }
  0x20   :  { %1169 = vmatpush3.bf16.msra.mxu0 %v1341_v30 }
  0x21   :  { %1209 = vmatpush3.bf16.msra.mxu1 %v1342_v31  ;;  %1234 = vmatprep.subr.bf16.mxu0 %v1349_v36 }
  0x22   :  { %1286 = vmatprep.subr.bf16.mxu1 %v1352_v39 }
  0x23   :  { %693 = vmatmul.mubr.bf16.vlgmr.msra.gmra.mxu0 %v1343_v32 }
  0x24   :  { %758 = vmatmul.mubr.bf16.vlgmr.msra.gmra.mxu1 %v1346_v34  ;;  %1235 = vmatpush3.bf16.msra.mxu0 %v1350_v37 }
  0x25   :  { %1236 = vmatprep.subr.bf16.mxu0 %v1351_v38  ;;  %1287 = vmatpush3.bf16.msra.mxu1 %v1352_v39 }
  0x26   :  { %700 = vmatprep.mubr.bf16.mxu0 %v1354_v41  ;;  %765 = vmatprep.mubr.bf16.mxu1 %v1356_v42 }
  0x27   :  { %1288 = vmatprep.subr.bf16.mxu1 %v1361_v46 }
  0x28   :  { %1237 = vmatpush3.bf16.msra.mxu0 %v1353_v40 }
  0x29   :  { %1238 = vmatprep.subr.bf16.mxu0 %v1360_v45  ;;  %1289 = vmatpush3.bf16.msra.mxu1 %v1361_v46 }
  0x2a   :  { %1290 = vmatprep.subr.bf16.mxu1 %v1364_v49 }
  0x2b   :  { %701 = vmatmul.mubr.bf16.gmra.mxu0 %v1358_v43 }
  0x2c   :  { %766 = vmatmul.mubr.bf16.gmra.mxu1 %v1359_v44  ;;  %1239 = vmatpush3.bf16.msra.mxu0 %v1362_v47 }
  0x2d   :  { %1240 = vmatprep.subr.bf16.mxu0 %v1363_v48  ;;  %1291 = vmatpush3.bf16.msra.mxu1 %v1364_v49 }
  0x2e   :  { %708 = vmatprep.mubr.bf16.mxu0 %v1366_v51  ;;  %773 = vmatprep.mubr.bf16.mxu1 %v1368_v52 }
  0x2f   :  { %1292 = vmatprep.subr.bf16.mxu1 %v1373_v56 }
  0x30   :  { %1241 = vmatpush3.bf16.msra.mxu0 %v1365_v50 }
  0x31   :  { %1242 = vmatprep.subr.bf16.mxu0 %v1372_v55  ;;  %1293 = vmatpush3.bf16.msra.mxu1 %v1373_v56 }
  0x32   :  { %1294 = vmatprep.subr.bf16.mxu1 %v1376_v59 }
  0x33   :  { %709 = vmatmul.mubr.bf16.gmra.mxu0 %v1370_v53 }
  0x34   :  { %774 = vmatmul.mubr.bf16.gmra.mxu1 %v1371_v54  ;;  %1243 = vmatpush3.bf16.msra.mxu0 %v1374_v57 }
  0x35   :  { %1244 = vmatprep.subr.bf16.mxu0 %v1375_v58  ;;  %1295 = vmatpush3.bf16.msra.mxu1 %v1376_v59 }
  0x36   :  { %716 = vmatprep.mubr.bf16.mxu0 %v1378_v61  ;;  %781 = vmatprep.mubr.bf16.mxu1 %v1380_v62 }
  0x37   :  { %1296 = vmatprep.subr.bf16.mxu1 %v1385_v2 }
  0x38   :  { %1245 = vmatpush3.bf16.msra.mxu0 %v1377_v60 }
  0x39   :  { %1246 = vmatprep.subr.bf16.mxu0 %v1384_v1  ;;  %1297 = vmatpush3.bf16.msra.mxu1 %v1385_v2 }
  0x3a   :  { %1298 = vmatprep.subr.bf16.mxu1 %v1388_v5 }
  0x3b   :  { %717 = vmatmul.mubr.bf16.gmra.mxu0 %v1382_v63 }
  0x3c   :  { %782 = vmatmul.mubr.bf16.gmra.mxu1 %v1383_v0  ;;  %1247 = vmatpush3.bf16.msra.mxu0 %v1386_v3  ;;  %v28_v3 = vld [vmem:[#allocation2] sm:$0xff] }
  0x3d   :  { %1248 = vmatprep.subr.bf16.mxu0 %v1387_v4  ;;  %1299 = vmatpush3.bf16.msra.mxu1 %v1388_v5 }
  0x3e   :  { %822 = vmatprep.mubr.bf16.mxu0 %v1392_v8  ;;  %1300 = vmatprep.subr.bf16.mxu1 %v1393_v9 }
  0x3f   :  { %1302 = vmatprep.mubr.bf16.mxu1 %v1394_v10 }
  0x40   :  { %1249 = vmatpush3.bf16.msra.mxu0 %v1389_v6 }
  0x41   :  { %1301 = vmatpush3.bf16.msra.mxu1 %v1393_v9 }
  0x43   :  { %823 = vmatmul.mubr.bf16.vlgmr.msra.gmra.mxu0 %v1390_v7 }
  0x44   :  { %830 = vmatprep.mubr.bf16.mxu0 %v1396_v11  ;;  %1303 = vmatmul.mubr.bf16.vlgmr.msra.gmra.mxu1 %v1395_v12 }
  0x45   :  { %1306 = vmatprep.mubr.bf16.mxu1 %v1402_v13 }
  0x4b   :  { %831 = vmatmul.mubr.bf16.gmra.mxu0 %v1398_v14  ;;  %v29_v14 = vld [vmem:[#allocation2 + $0x8] sm:$0xff] }
  0x4c   :  { %838 = vmatprep.mubr.bf16.mxu0 %v1399_v15  ;;  %1307 = vmatmul.mubr.bf16.gmra.mxu1 %v1403_v16 }
  0x53   :  { %839 = vmatmul.mubr.bf16.gmra.mxu0 %v1401_v17 }
  0x54   :  { %846 = vmatprep.mubr.bf16.mxu0 %v1404_v18 }
  0x5b   :  { %847 = vmatmul.mubr.bf16.gmra.mxu0 %v1406_v19 }
  0xe3   :  { %v1170_v21 = vpop.f32.mrf.mxu0 }
  0xe4   :  { %v1210_v22 = vpop.f32.mrf.mxu1 }
  0xe5   :  { %v1171_v23 = vpop.f32.mrf.mxu0 }
  0xe6   :  { %v1211_v24 = vpop.f32.mrf.mxu1  ;;  %v1172_v52 = vadd.f32 %v1171_v23, %v1170_v21  ;;  %v30_v23 = vld [vmem:[#allocation2 + $0x10] sm:$0xff] }
  0xe7   :  { %v1173_v25 = vpop.f32.mrf.mxu0  ;;  %v1212_v53 = vadd.f32 %v1211_v24, %v1210_v22 }
  0xe8   :  { %v1213_v26 = vpop.f32.mrf.mxu1 }
  0xe9   :  { %v1174_v27 = vpop.f32.mrf.mxu0  ;;  %v760_v57 = vadd.f32 %v1212_v53, %v1172_v52 }
  0xea   :  { %v1214_v28 = vpop.f32.mrf.mxu1  ;;  %v1175_v58 = vadd.f32 %v1174_v27, %v1173_v25 }
  0xeb   :  { %v1176_v29 = vpop.f32.mrf.mxu0  ;;  %v1215_v59 = vadd.f32 %v1214_v28, %v1213_v26 }
  0xec   :  { %v1216_v30 = vpop.f32.mrf.mxu1 }
  0xed   :  { %v1177_v31 = vpop.f32.mrf.mxu0  ;;  %v763_v5 = vadd.f32 %v1215_v59, %v1175_v58 }
  0xee   :  { %v1217_v32 = vpop.f32.mrf.mxu1  ;;  %v1178_v0 = vadd.f32 %v1177_v31, %v1176_v29 }
  0xef   :  { %v1179_v33 = vpop.f32.mrf.mxu0  ;;  %v1218_v1 = vadd.f32 %v1217_v32, %v1216_v30 }
  0xf0   :  { %v1219_v34 = vpop.f32.mrf.mxu1 }
  0xf1   :  { %v1180_v35 = vpop.f32.mrf.mxu0  ;;  %v768_v12 = vadd.f32 %v1218_v1, %v1178_v0 }
  0xf2   :  { %v1220_v36 = vpop.f32.mrf.mxu1  ;;  %v1181_v16 = vadd.f32 %v1180_v35, %v1179_v33  ;;  %v31_v35 = vld [vmem:[#allocation2 + $0x18] sm:$0xff] }
  0xf3   :  { %v1182_v37 = vpop.f32.mrf.mxu0  ;;  %v1221_v17 = vadd.f32 %v1220_v36, %v1219_v34 }
  0xf4   :  { %v1222_v38 = vpop.f32.mrf.mxu1 }
  0xf5   :  { %v1183_v39 = vpop.f32.mrf.mxu0  ;;  %v771_v26 = vadd.f32 %v1221_v17, %v1181_v16 }
  0xf6   :  { %v1223_v40 = vpop.f32.mrf.mxu1  ;;  %v1184_v29 = vadd.f32 %v1183_v39, %v1182_v37 }
  0xf7   :  { %v1693_v41 = vpop.f32.mrf.mxu0  ;;  %v1224_v30 = vadd.f32 %v1223_v40, %v1222_v38 }
  0xf8   :  { %v1695_v42 = vpop.f32.mrf.mxu1 }
  0xf9   :  { %v1697_v43 = vpop.f32.mrf.mxu0  ;;  %v776_v38 = vadd.f32 %v1224_v30, %v1184_v29 }
  0xfa   :  { %v1699_v44 = vpop.f32.mrf.mxu1  ;;  %v1187_v53 = vadd.f32 %v1697_v43, %v1693_v41 }
  0xfb   :  { %v1701_v45 = vpop.f32.mrf.mxu0 }
  0xfc   :  { %v1703_v46 = vpop.f32.mrf.mxu1 }
  0xfd   :  { %v1705_v47 = vpop.f32.mrf.mxu0 }
  0xfe   :  { %v1707_v48 = vpop.f32.mrf.mxu1 }
  0xff   :  { %v1709_v49 = vpop.f32.mrf.mxu0 }
 0x100   :  { %v1713_v51 = vpop.f32.mrf.mxu1 }
 0x101   :  { %v1711_v50 = vpop.f32.mrf.mxu0 }
 0x102   :  { %v1715_v55 = vpop.f32.mrf.mxu1 }
 0x103   :  { %v1250_v54 = vpop.f32.mrf.mxu0 }
 0x104   :  { %v1304_v62 = vpop.f32.mrf.mxu1 }
 0x105   :  { %v1251_v56 = vpop.f32.mrf.mxu0 }
 0x106   :  { %v1252_v60 = vadd.f32 %v1251_v56, %v1250_v54  ;;  %v889_v4 = vpop.f32.mrf.mxu1  ;;  %v1227_v54 = vadd.f32 %v1699_v44, %v1695_v42 }
 0x107   :  { %v1253_v61 = vpop.f32.mrf.mxu0 }
 0x108   :  { %v825_v63 = vadd.f32 %v1252_v60, %v760_v57  ;;  %v1305_v9 = vpop.f32.mrf.mxu1  ;;  %v779_v42 = vadd.f32 %v1227_v54, %v1187_v53  ;;  %v32_v60 = vld [vmem:[#allocation2 + $0x20] sm:$0xff] }
 0x109   :  { %v1254_v2 = vpop.f32.mrf.mxu0 }
 0x10a   :  { %v1255_v6 = vadd.f32 %v1254_v2, %v1253_v61  ;;  %v890_v7 = vadd.f32 %v889_v4, %v825_v63  ;;  %v892_v15 = vpop.f32.mrf.mxu1  ;;  %v1230_v63 = vadd.f32 %v1707_v48, %v1703_v46 }
 0x10b   :  { %v1256_v8 = vpop.f32.mrf.mxu0 }
 0x10c   :  { %v920_v10 = vadd.f32 %v890_v7, %v28_v3  ;;  %v828_v11 = vadd.f32 %v1255_v6, %v763_v5  ;;  %v1718_v25 = vpop.f32.mrf.mxu1  ;;  %v33_v5 = vld [vmem:[#allocation2 + $0x28] sm:$0xff] }
 0x10d   :  { %v1257_v13 = vpop.f32.mrf.mxu0 }
 0x10e   :  { %929 = vst.msk [vmem:[#allocation2] sm:$0xff] %vm19_vm0, %v920_v10  ;;  %v1258_v18 = vadd.f32 %v1257_v13, %v1256_v8  ;;  %v893_v19 = vadd.f32 %v892_v15, %v828_v11  ;;  %v905_v52 = vpop.f32.mrf.mxu1  ;;  %v1193_v8 = vadd.f32 %v1711_v50, %v1709_v49  ;;  %v34_v15 = vld [vmem:[#allocation2 + $0x30] sm:$0xff] }
 0x10f   :  { %v1259_v20 = vpop.f32.mrf.mxu0 }
 0x110   :  { %v833_v21 = vadd.f32 %v1258_v18, %v768_v12  ;;  %v921_v22 = vadd.f32 %v893_v19, %v29_v14  ;;  %v1309_v59 = vpop.f32.mrf.mxu1 }
 0x111   :  { %v1260_v24 = vpop.f32.mrf.mxu0 }
 0x112   :  { %v898_v27 = vadd.f32 %v1304_v62, %v833_v21  ;;  %930 = vst.msk [vmem:[#allocation2 + $0x8] sm:$0xff] %vm19_vm0, %v921_v22  ;;  %v1261_v28 = vadd.f32 %v1260_v24, %v1259_v20  ;;  %v1190_v62 = vadd.f32 %v1705_v47, %v1701_v45  ;;  %v908_v6 = vpop.f32.mrf.mxu1  ;;  %v1233_v45 = vadd.f32 %v1715_v55, %v1713_v51  ;;  %v35_v24 = vld [vmem:[#allocation2 + $0x38] sm:$0xff] }
 0x113   :  { %v1262_v31 = vpop.f32.mrf.mxu0 }
 0x114   :  { %v922_v32 = vadd.f32 %v898_v27, %v30_v23  ;;  %v836_v33 = vadd.f32 %v1261_v28, %v771_v26  ;;  %v784_v48 = vadd.f32 %v1230_v63, %v1190_v62  ;;  %v787_v50 = vadd.f32 %v1233_v45, %v1193_v8 }
 0x115   :  { %v1721_v34 = vld [vmem:[#allocation2] sm:$0xff]  ;;  %v1263_v36 = vpop.f32.mrf.mxu0 }
 0x116   :  { %v1146_v56 = vpack.c.bf16 %v1721_v34, %v1721_v34  ;;  %931 = vst.msk [vmem:[#allocation2 + $0x10] sm:$0xff] %vm19_vm0, %v922_v32  ;;  %v901_v37 = vadd.f32 %v1305_v9, %v836_v33  ;;  %v1264_v39 = vadd.f32 %v1263_v36, %v1262_v31  ;;  %v1012_v51 = vmul.f32 %v1721_v34, %v1721_v34 }
 0x117   :  { %v1265_v40 = vpop.f32.mrf.mxu0  ;;  %v989_v26 = vsel %vm19_vm0, %v1721_v34, 0.0 }
 0x118   :  { %981 = vst.msk [vmem:[%s1803_s2] sm:$0xf] %vm980_vm1, %v1146_v56  ;;  %v923_v57 = vadd.f32 %v901_v37, %v31_v35  ;;  %v841_v41 = vadd.f32 %v1264_v39, %v776_v38  ;;  %v1020_v27 = vsel %vm19_vm0, %v1012_v51, 0.0 }
 0x119   :  { %v941_v58 = vld [vmem:[#allocation2 + $0x8] sm:$0xff]  ;;  %v1266_v43 = vpop.f32.mrf.mxu0 }
 0x11a   :  { %v1147_v44 = vpack.c.bf16 %v941_v58, %v941_v58  ;;  %932 = vst.msk [vmem:[#allocation2 + $0x18] sm:$0xff] %vm19_vm0, %v923_v57  ;;  %v1267_v61 = vadd.f32 %v1266_v43, %v1265_v40  ;;  %v906_v0 = vadd.f32 %v905_v52, %v841_v41  ;;  %v1013_v12 = vmul.f32 %v941_v58, %v941_v58 }
 0x11b   :  { %v1268_v1 = vpop.f32.mrf.mxu0  ;;  %v990_v19 = vsel %vm19_vm0, %v941_v58, 0.0 }
 0x11c   :  { %982 = vst.msk [vmem:[%s1803_s2 + $0x4] sm:$0xf] %vm980_vm1, %v1147_v44  ;;  %v844_v2 = vadd.f32 %v1267_v61, %v779_v42  ;;  %v924_v4 = vadd.f32 %v906_v0, %v32_v60  ;;  %v1021_v21 = vsel %vm19_vm0, %v1013_v12, 0.0  ;;  %v991_v30 = vadd.f32 %v990_v19, %v989_v26 }
 0x11d   :  { %v942_v3 = vld [vmem:[#allocation2 + $0x10] sm:$0xff]  ;;  %v1269_v7 = vpop.f32.mrf.mxu0  ;;  %v1022_v35 = vadd.f32 %v1021_v21, %v1020_v27 }
 0x11e   :  { %v1148_v46 = vpack.c.bf16 %v942_v3, %v942_v3  ;;  %v909_v47 = vadd.f32 %v908_v6, %v844_v2  ;;  %933 = vst.msk [vmem:[#allocation2 + $0x20] sm:$0xff] %vm19_vm0, %v924_v4  ;;  %v1270_v9 = vadd.f32 %v1269_v7, %v1268_v1  ;;  %v1014_v17 = vmul.f32 %v942_v3, %v942_v3 }
 0x11f   :  { %v1271_v10 = vpop.f32.mrf.mxu0 }
 0x120   :  { %983 = vst.msk [vmem:[%s1803_s2 + $0x8] sm:$0xf] %vm980_vm1, %v1148_v46  ;;  %v925_v11 = vadd.f32 %v909_v47, %v33_v5  ;;  %v849_v14 = vadd.f32 %v1270_v9, %v784_v48  ;;  %v1023_v31 = vsel %vm19_vm0, %v1014_v17, 0.0 }
 0x121   :  { %v943_v13 = vld [vmem:[#allocation2 + $0x18] sm:$0xff]  ;;  %v1272_v49 = vpop.f32.mrf.mxu0  ;;  %v1024_v56 = vadd.f32 %v1023_v31, %v1022_v35 }
 0x122   :  { %v1149_v55 = vpack.c.bf16 %v943_v13, %v943_v13  ;;  %934 = vst.msk [vmem:[#allocation2 + $0x28] sm:$0xff] %vm19_vm0, %v925_v11  ;;  %v1273_v16 = vadd.f32 %v1272_v49, %v1271_v10  ;;  %v914_v18 = vadd.f32 %v1718_v25, %v849_v14  ;;  %v1015_v22 = vmul.f32 %v943_v13, %v943_v13 }
 0x123   :  { %v992_v25 = vsel %vm19_vm0, %v942_v3, 0.0  ;;  %v994_v36 = vsel %vm19_vm0, %v943_v13, 0.0 }
 0x124   :  { %984 = vst.msk [vmem:[%s1803_s2 + $0xc] sm:$0xf] %vm980_vm1, %v1149_v55  ;;  %v852_v20 = vadd.f32 %v1273_v16, %v787_v50  ;;  %v926_v23 = vadd.f32 %v914_v18, %v34_v15  ;;  %v993_v53 = vadd.f32 %v992_v25, %v991_v30  ;;  %v1025_v34 = vsel %vm19_vm0, %v1015_v22, 0.0 }
 0x125   :  { %v944_v28 = vld [vmem:[#allocation2 + $0x20] sm:$0xff]  ;;  %v1026_v58 = vadd.f32 %v1025_v34, %v1024_v56 }
 0x126   :  { %v917_v29 = vadd.f32 %v1309_v59, %v852_v20  ;;  %v1150_v32 = vpack.c.bf16 %v944_v28, %v944_v28  ;;  %v1016_v33 = vmul.f32 %v944_v28, %v944_v28  ;;  %935 = vst.msk [vmem:[#allocation2 + $0x30] sm:$0xff] %vm19_vm0, %v926_v23  ;;  %v996_v37 = vsel %vm19_vm0, %v944_v28, 0.0 }
 0x127   :  { %v995_v40 = vadd.f32 %v994_v36, %v993_v53 }
 0x128   :  { %v927_v52 = vadd.f32 %v917_v29, %v35_v24  ;;  %985 = vst.msk [vmem:[%s1803_s2 + $0x10] sm:$0xf] %vm980_vm1, %v1150_v32  ;;  %v1027_v57 = vsel %vm19_vm0, %v1016_v33, 0.0 }
 0x129   :  { %v945_v54 = vld [vmem:[#allocation2 + $0x28] sm:$0xff]  ;;  %v997_v43 = vadd.f32 %v996_v37, %v995_v40  ;;  %v1028_v59 = vadd.f32 %v1027_v57, %v1026_v58 }
 0x12a   :  { %v1151_v38 = vpack.c.bf16 %v945_v54, %v945_v54  ;;  %v1017_v39 = vmul.f32 %v945_v54, %v945_v54  ;;  %936 = vst.msk [vmem:[#allocation2 + $0x38] sm:$0xff] %vm19_vm0, %v927_v52  ;;  %v998_v41 = vsel %vm19_vm0, %v945_v54, 0.0 }
 0x12b   :  { %v999_v60 = vadd.f32 %v998_v41, %v997_v43 }
 0x12c   :  { %986 = vst.msk [vmem:[%s1803_s2 + $0x14] sm:$0xf] %vm980_vm1, %v1151_v38  ;;  %v1029_v42 = vsel %vm19_vm0, %v1017_v39, 0.0 }
 0x12d   :  { %v946_v44 = vld [vmem:[#allocation2 + $0x30] sm:$0xff]  ;;  %v1030_v0 = vadd.f32 %v1029_v42, %v1028_v59 }
 0x12e   :  { %v1152_v61 = vpack.c.bf16 %v946_v44, %v946_v44  ;;  %v1000_v62 = vsel %vm19_vm0, %v946_v44, 0.0  ;;  %v1018_v63 = vmul.f32 %v946_v44, %v946_v44 }
 0x12f   :  { %v1001_v1 = vadd.f32 %v1000_v62, %v999_v60 }
 0x130   :  { %987 = vst.msk [vmem:[%s1803_s2 + $0x18] sm:$0xf] %vm980_vm1, %v1152_v61  ;;  %v1031_v2 = vsel %vm19_vm0, %v1018_v63, 0.0 }
 0x131   :  { %v947_v3 = vld [vmem:[#allocation2 + $0x38] sm:$0xff]  ;;  %v1032_v7 = vadd.f32 %v1031_v2, %v1030_v0 }
 0x132   :  { %v1153_v4 = vpack.c.bf16 %v947_v3, %v947_v3  ;;  %v1002_v5 = vsel %vm19_vm0, %v947_v3, 0.0  ;;  %v1019_v6 = vmul.f32 %v947_v3, %v947_v3 }
 0x133   :  { %v1003_v8 = vadd.f32 %v1002_v5, %v1001_v1 }
 0x134   :  { %988 = vst.msk [vmem:[%s1803_s2 + $0x1c] sm:$0xf] %vm980_vm1, %v1153_v4  ;;  %v1033_v45 = vsel %vm19_vm0, %v1019_v6, 0.0 }
 0x135   :  { %v1004_v46 = vrot.slane %v1003_v8, 4  ;;  %v1034_v47 = vadd.f32 %v1033_v45, %v1032_v7 }
 0x137   :  { %v1005_v48 = vadd.f32 %v1004_v46, %v1003_v8  ;;  %v1035_v9 = vrot.slane %v1034_v47, 4 }
 0x139   :  { %v1006_v10 = vrot.slane %v1005_v48, 2  ;;  %v1036_v11 = vadd.f32 %v1035_v9, %v1034_v47 }
 0x13b   :  { %v1007_v12 = vadd.f32 %v1006_v10, %v1005_v48  ;;  %v1037_v13 = vrot.slane %v1036_v11, 2 }
 0x13d   :  { %v1008_v14 = vrot.slane %v1007_v12, 1  ;;  %v1038_v49 = vadd.f32 %v1037_v13, %v1036_v11 }
 0x13f   :  { %v1009_v50 = vadd.f32 %v1008_v14, %v1007_v12  ;;  %v1039_v51 = vrot.slane %v1038_v49, 1 }
 0x141   :  { %1011 = vst.msk [vmem:[%s1804_s3] sm:$0x1] %vm1010_vm2, %v1009_v50  ;;  %v1040_v55 = vadd.f32 %v1039_v51, %v1038_v49 }
 0x143   :  { %1041 = vst.msk [vmem:[%s1805_s4] sm:$0x1] %vm1010_vm2, %v1040_v55 }

// kernel: turbnetd_forward.9
= control target key start
LH: loop header
LB: loop body
LE: loop exit
PB: predicated region body
PF: predicated region fallthrough
CT: control target
= control target key end

     0   :  { %s3187_s1 = inlined_call_operand.vmem [shape: bf16[1792,128], index: 1, kind: input, shape index: {}]   ;;  %s3188_s0 = inlined_call_operand.vmem [shape: bf16[64,1792], index: 0, kind: input, shape index: {}]   ;;  %s3189_s2 = inlined_call_operand.vmem [shape: f32[1,128], index: 2, kind: input, shape index: {}]   ;;  %s3190_s3 = inlined_call_operand.vmem [shape: f32[64,128], index: 3, kind: output, shape index: {}]  }
   0x1   :  { %v2281_v0 = vld [vmem:[%s3187_s1 + $0x78] sm:$0xff]   ;;  %v2285_v4 = vld [vmem:[%s3187_s1 + $0x70] sm:$0xff]   ;;  %v2289_v8 = vld [vmem:[%s3187_s1 + $0x68] sm:$0xff]  }
   0x2   :  { %v2282_v1 = vld [vmem:[%s3187_s1 + $0xf8] sm:$0xff]   ;;  %1985 = vmatprep.subr.bf16.mxu0 %v2281_v0  ;;  %v2286_v5 = vld [vmem:[%s3187_s1 + $0xf0] sm:$0xff]   ;;  %v2290_v9 = vld [vmem:[%s3187_s1 + $0xe8] sm:$0xff]  }
   0x3   :  { %v2283_v2 = vld [vmem:[%s3187_s1 + $0x38] sm:$0xff]   ;;  %2025 = vmatprep.subr.bf16.mxu1 %v2282_v1  ;;  %v2287_v6 = vld [vmem:[%s3187_s1 + $0x30] sm:$0xff]   ;;  %v2291_v10 = vld [vmem:[%s3187_s1 + $0x28] sm:$0xff]  }
   0x4   :  { %v2284_v3 = vld [vmem:[%s3187_s1 + $0xb8] sm:$0xff]   ;;  %1986 = vmatpush3.bf16.msra.mxu0 %v2283_v2  ;;  %v2288_v7 = vld [vmem:[%s3187_s1 + $0xb0] sm:$0xff]   ;;  %v2292_v11 = vld [vmem:[%s3187_s1 + $0xa8] sm:$0xff]  }
   0x5   :  { %2026 = vmatpush3.bf16.msra.mxu1 %v2284_v3  ;;  %1987 = vmatprep.subr.bf16.mxu0 %v2285_v4  ;;  %v2293_v12 = vld [vmem:[%s3187_s1 + $0x60] sm:$0xff]   ;;  %v2297_v16 = vld [vmem:[%s3187_s1 + $0x58] sm:$0xff]   ;;  %v2301_v20 = vld [vmem:[%s3187_s1 + $0x50] sm:$0xff]  }
   0x6   :  { %2027 = vmatprep.subr.bf16.mxu1 %v2286_v5  ;;  %v2294_v13 = vld [vmem:[%s3187_s1 + $0xe0] sm:$0xff]   ;;  %v2298_v17 = vld [vmem:[%s3187_s1 + $0xd8] sm:$0xff]   ;;  %v2302_v21 = vld [vmem:[%s3187_s1 + $0xd0] sm:$0xff]  }
   0x7   :  { %v2295_v14 = vld [vmem:[%s3187_s1 + $0x20] sm:$0xff]   ;;  %v2299_v18 = vld [vmem:[%s3187_s1 + $0x18] sm:$0xff]   ;;  %v2303_v22 = vld [vmem:[%s3187_s1 + $0x10] sm:$0xff]  }
   0x8   :  { %1988 = vmatpush3.bf16.msra.mxu0 %v2287_v6  ;;  %v2296_v15 = vld [vmem:[%s3187_s1 + $0xa0] sm:$0xff]   ;;  %v2300_v19 = vld [vmem:[%s3187_s1 + $0x98] sm:$0xff]   ;;  %v2304_v23 = vld [vmem:[%s3187_s1 + $0x90] sm:$0xff]  }
   0x9   :  { %2028 = vmatpush3.bf16.msra.mxu1 %v2288_v7  ;;  %1989 = vmatprep.subr.bf16.mxu0 %v2289_v8  ;;  %v2305_v24 = vld [vmem:[%s3187_s1 + $0x48] sm:$0xff]   ;;  %v2309_v28 = vld [vmem:[%s3187_s1 + $0x40] sm:$0xff]   ;;  %v2319_v36 = vld [vmem:[%s3187_s1 + $0x178] sm:$0xff]  }
   0xa   :  { %2029 = vmatprep.subr.bf16.mxu1 %v2290_v9  ;;  %v2306_v25 = vld [vmem:[%s3187_s1 + $0xc8] sm:$0xff]   ;;  %v2310_v29 = vld [vmem:[%s3187_s1 + $0xc0] sm:$0xff]   ;;  %v2320_v37 = vld [vmem:[%s3187_s1 + $0x1f8] sm:$0xff]  }
   0xb   :  { %v2307_v26 = vld [vmem:[%s3187_s1 + $0x8] sm:$0xff]   ;;  %v2311_v30 = vld [vmem:[%s3187_s1] sm:$0xff]   ;;  %v2321_v38 = vld [vmem:[%s3187_s1 + $0x138] sm:$0xff]  }
   0xc   :  { %1990 = vmatpush3.bf16.msra.mxu0 %v2291_v10  ;;  %v2308_v27 = vld [vmem:[%s3187_s1 + $0x88] sm:$0xff]   ;;  %v2312_v31 = vld [vmem:[%s3187_s1 + $0x80] sm:$0xff]   ;;  %v2322_v39 = vld [vmem:[%s3187_s1 + $0x1b8] sm:$0xff]  }
   0xd   :  { %2030 = vmatpush3.bf16.msra.mxu1 %v2292_v11  ;;  %1991 = vmatprep.subr.bf16.mxu0 %v2293_v12  ;;  %v2313_v32 = vld [vmem:[%s3188_s0] ss:$56 sps:$4 sm:$0xff]   ;;  %v2315_v33 = vld [vmem:[%s3188_s0 + $0x4] ss:$56 sps:$4 sm:$0xff]   ;;  %v2323_v40 = vld [vmem:[%s3187_s1 + $0x170] sm:$0xff]  }
   0xe   :  { %2031 = vmatprep.subr.bf16.mxu1 %v2294_v13  ;;  %v2316_v34 = vld [vmem:[%s3188_s0 + $0x8] ss:$56 sps:$4 sm:$0xff]   ;;  %v2318_v35 = vld [vmem:[%s3188_s0 + $0xc] ss:$56 sps:$4 sm:$0xff]   ;;  %1299 = vmatprep.mubr.bf16.mxu0 %v2315_v33  ;;  %v2324_v41 = vld [vmem:[%s3187_s1 + $0x1f0] sm:$0xff]  }
   0xf   :  { %1364 = vmatprep.mubr.bf16.mxu1 %v2318_v35  ;;  %v2325_v42 = vld [vmem:[%s3187_s1 + $0x130] sm:$0xff]   ;;  %v2333_v48 = vld [vmem:[%s3187_s1 + $0x168] sm:$0xff]   ;;  %v2337_v52 = vld [vmem:[%s3187_s1 + $0x160] sm:$0xff]  }
  0x10   :  { %1992 = vmatpush3.bf16.msra.mxu0 %v2295_v14  ;;  %v2326_v43 = vld [vmem:[%s3187_s1 + $0x1b0] sm:$0xff]   ;;  %v2334_v49 = vld [vmem:[%s3187_s1 + $0x1e8] sm:$0xff]   ;;  %v2338_v53 = vld [vmem:[%s3187_s1 + $0x1e0] sm:$0xff]  }
  0x11   :  { %2032 = vmatpush3.bf16.msra.mxu1 %v2296_v15  ;;  %1993 = vmatprep.subr.bf16.mxu0 %v2297_v16  ;;  %v2327_v44 = vld [vmem:[%s3188_s0 + $0x74] ss:$56 sps:$4 sm:$0xff]   ;;  %v2331_v46 = vld [vmem:[%s3188_s0 + $0x70] ss:$56 sps:$4 sm:$0xff]   ;;  %v2339_v54 = vld [vmem:[%s3187_s1 + $0x120] sm:$0xff]  }
  0x12   :  { %2033 = vmatprep.subr.bf16.mxu1 %v2298_v17  ;;  %v2329_v45 = vld [vmem:[%s3188_s0 + $0x7c] ss:$56 sps:$4 sm:$0xff]   ;;  %v2332_v47 = vld [vmem:[%s3188_s0 + $0x78] ss:$56 sps:$4 sm:$0xff]   ;;  %v2335_v50 = vld [vmem:[%s3187_s1 + $0x128] sm:$0xff]  }
  0x13   :  { %v2336_v51 = vld [vmem:[%s3187_s1 + $0x1a8] sm:$0xff]   ;;  %v2340_v55 = vld [vmem:[%s3187_s1 + $0x1a0] sm:$0xff]   ;;  %v2347_v60 = vld [vmem:[%s3187_s1 + $0x158] sm:$0xff]  }
  0x14   :  { %1994 = vmatpush3.bf16.msra.mxu0 %v2299_v18  ;;  %v2341_v56 = vld [vmem:[%s3188_s0 + $0xe4] ss:$56 sps:$4 sm:$0xff]   ;;  %v2345_v58 = vld [vmem:[%s3188_s0 + $0xe0] ss:$56 sps:$4 sm:$0xff]   ;;  %v2351_v0 = vld [vmem:[%s3187_s1 + $0x150] sm:$0xff]  }
  0x15   :  { %2034 = vmatpush3.bf16.msra.mxu1 %v2300_v19  ;;  %1995 = vmatprep.subr.bf16.mxu0 %v2301_v20  ;;  %v2343_v57 = vld [vmem:[%s3188_s0 + $0xec] ss:$56 sps:$4 sm:$0xff]   ;;  %v2346_v59 = vld [vmem:[%s3188_s0 + $0xe8] ss:$56 sps:$4 sm:$0xff]   ;;  %v2348_v61 = vld [vmem:[%s3187_s1 + $0x1d8] sm:$0xff]  }
  0x16   :  { %2035 = vmatprep.subr.bf16.mxu1 %v2302_v21  ;;  %v2349_v62 = vld [vmem:[%s3187_s1 + $0x118] sm:$0xff]   ;;  %v2352_v1 = vld [vmem:[%s3187_s1 + $0x1d0] sm:$0xff]   ;;  %v2361_v8 = vld [vmem:[%s3187_s1 + $0x148] sm:$0xff]  }
  0x17   :  { %v2350_v63 = vld [vmem:[%s3187_s1 + $0x198] sm:$0xff]   ;;  %v2353_v2 = vld [vmem:[%s3187_s1 + $0x110] sm:$0xff]   ;;  %v2362_v9 = vld [vmem:[%s3187_s1 + $0x1c8] sm:$0xff]  }
  0x18   :  { %1996 = vmatpush3.bf16.msra.mxu0 %v2303_v22  ;;  %v2354_v3 = vld [vmem:[%s3187_s1 + $0x190] sm:$0xff]   ;;  %v2363_v10 = vld [vmem:[%s3187_s1 + $0x108] sm:$0xff]   ;;  %v2365_v12 = vld [vmem:[%s3187_s1 + $0x140] sm:$0xff]  }
  0x19   :  { %2036 = vmatpush3.bf16.msra.mxu1 %v2304_v23  ;;  %1997 = vmatprep.subr.bf16.mxu0 %v2305_v24  ;;  %v2355_v4 = vld [vmem:[%s3188_s0 + $0x154] ss:$56 sps:$4 sm:$0xff]   ;;  %v2359_v6 = vld [vmem:[%s3188_s0 + $0x150] ss:$56 sps:$4 sm:$0xff]   ;;  %v2366_v13 = vld [vmem:[%s3187_s1 + $0x1c0] sm:$0xff]  }
  0x1a   :  { %2037 = vmatprep.subr.bf16.mxu1 %v2306_v25  ;;  %v2357_v5 = vld [vmem:[%s3188_s0 + $0x15c] ss:$56 sps:$4 sm:$0xff]   ;;  %v2360_v7 = vld [vmem:[%s3188_s0 + $0x158] ss:$56 sps:$4 sm:$0xff]   ;;  %v2364_v11 = vld [vmem:[%s3187_s1 + $0x188] sm:$0xff]  }
  0x1b   :  { %v2367_v14 = vld [vmem:[%s3187_s1 + $0x100] sm:$0xff]   ;;  %v2369_v16 = vld [vmem:[%s3188_s0 + $0x10] ss:$56 sps:$4 sm:$0xff]   ;;  %v2371_v17 = vld [vmem:[%s3188_s0 + $0x14] ss:$56 sps:$4 sm:$0xff]  }
  0x1c   :  { %1998 = vmatpush3.bf16.msra.mxu0 %v2307_v26  ;;  %v2368_v15 = vld [vmem:[%s3187_s1 + $0x180] sm:$0xff]   ;;  %v2372_v18 = vld [vmem:[%s3188_s0 + $0x18] ss:$56 sps:$4 sm:$0xff]   ;;  %v2374_v19 = vld [vmem:[%s3188_s0 + $0x1c] ss:$56 sps:$4 sm:$0xff]  }
  0x1d   :  { %2038 = vmatpush3.bf16.msra.mxu1 %v2308_v27  ;;  %1999 = vmatprep.subr.bf16.mxu0 %v2309_v28  ;;  %v2375_v20 = vld [vmem:[%s3187_s1 + $0x278] sm:$0xff]   ;;  %v2379_v24 = vld [vmem:[%s3187_s1 + $0x270] sm:$0xff]   ;;  %v2390_v33 = vld [vmem:[%s3187_s1 + $0x2e8] sm:$0xff]  }
  0x1e   :  { %2039 = vmatprep.subr.bf16.mxu1 %v2310_v29  ;;  %v2376_v21 = vld [vmem:[%s3187_s1 + $0x2f8] sm:$0xff]   ;;  %v2380_v25 = vld [vmem:[%s3187_s1 + $0x2f0] sm:$0xff]   ;;  %v2385_v29 = vld [vmem:[%s3188_s0 + $0x8c] ss:$56 sps:$4 sm:$0xff]  }
  0x1f   :  { %v2377_v22 = vld [vmem:[%s3187_s1 + $0x238] sm:$0xff]   ;;  %v2381_v26 = vld [vmem:[%s3187_s1 + $0x230] sm:$0xff]   ;;  %v2392_v35 = vld [vmem:[%s3187_s1 + $0x2a8] sm:$0xff]  }
  0x20   :  { %2000 = vmatpush3.bf16.msra.mxu0 %v2311_v30  ;;  %v2378_v23 = vld [vmem:[%s3187_s1 + $0x2b8] sm:$0xff]   ;;  %v2382_v27 = vld [vmem:[%s3187_s1 + $0x2b0] sm:$0xff]  }
  0x21   :  { %2040 = vmatpush3.bf16.msra.mxu1 %v2312_v31  ;;  %2065 = vmatprep.subr.bf16.mxu0 %v2319_v36  ;;  %v2383_v28 = vld [vmem:[%s3188_s0 + $0x84] ss:$56 sps:$4 sm:$0xff]   ;;  %v2387_v30 = vld [vmem:[%s3188_s0 + $0x80] ss:$56 sps:$4 sm:$0xff]  }
  0x22   :  { %2105 = vmatprep.subr.bf16.mxu1 %v2320_v37  ;;  %v2388_v31 = vld [vmem:[%s3188_s0 + $0x88] ss:$56 sps:$4 sm:$0xff]  }
  0x23   :  { %1300 = vmatmul.mubr.bf16.vlgmr.msra.gmra.mxu0 %v2313_v32  ;;  %v2389_v32 = vld [vmem:[%s3187_s1 + $0x268] sm:$0xff]   ;;  %v2393_v36 = vld [vmem:[%s3187_s1 + $0x260] sm:$0xff]  }
  0x24   :  { %1365 = vmatmul.mubr.bf16.vlgmr.msra.gmra.mxu1 %v2316_v34  ;;  %2066 = vmatpush3.bf16.msra.mxu0 %v2321_v38  ;;  %v2391_v34 = vld [vmem:[%s3187_s1 + $0x228] sm:$0xff]   ;;  %v2394_v37 = vld [vmem:[%s3187_s1 + $0x2e0] sm:$0xff]  }
  0x25   :  { %2106 = vmatpush3.bf16.msra.mxu1 %v2322_v39  ;;  %2067 = vmatprep.subr.bf16.mxu0 %v2323_v40  ;;  %v2395_v38 = vld [vmem:[%s3187_s1 + $0x220] sm:$0xff]   ;;  %v2397_v40 = vld [vmem:[%s3188_s0 + $0xf4] ss:$56 sps:$4 sm:$0xff]  }
  0x26   :  { %2107 = vmatprep.subr.bf16.mxu1 %v2324_v41  ;;  %1307 = vmatprep.mubr.bf16.mxu0 %v2327_v44  ;;  %v2396_v39 = vld [vmem:[%s3187_s1 + $0x2a0] sm:$0xff]   ;;  %v2399_v41 = vld [vmem:[%s3188_s0 + $0xfc] ss:$56 sps:$4 sm:$0xff]  }
  0x27   :  { %1372 = vmatprep.mubr.bf16.mxu1 %v2329_v45  ;;  %v2403_v44 = vld [vmem:[%s3187_s1 + $0x258] sm:$0xff]  }
  0x28   :  { %2068 = vmatpush3.bf16.msra.mxu0 %v2325_v42  ;;  %v2401_v42 = vld [vmem:[%s3188_s0 + $0xf0] ss:$56 sps:$4 sm:$0xff]   ;;  %v2404_v45 = vld [vmem:[%s3187_s1 + $0x2d8] sm:$0xff]  }
  0x29   :  { %2108 = vmatpush3.bf16.msra.mxu1 %v2326_v43  ;;  %2069 = vmatprep.subr.bf16.mxu0 %v2333_v48  ;;  %v2402_v43 = vld [vmem:[%s3188_s0 + $0xf8] ss:$56 sps:$4 sm:$0xff]  }
  0x2a   :  { %2109 = vmatprep.subr.bf16.mxu1 %v2334_v49  ;;  %v2407_v48 = vld [vmem:[%s3187_s1 + $0x250] sm:$0xff]  }
  0x2b   :  { %1308 = vmatmul.mubr.bf16.gmra.mxu0 %v2331_v46  ;;  %v2405_v46 = vld [vmem:[%s3187_s1 + $0x218] sm:$0xff]   ;;  %v2408_v49 = vld [vmem:[%s3187_s1 + $0x2d0] sm:$0xff]  }
  0x2c   :  { %1373 = vmatmul.mubr.bf16.gmra.mxu1 %v2332_v47  ;;  %2070 = vmatpush3.bf16.msra.mxu0 %v2335_v50  ;;  %v2406_v47 = vld [vmem:[%s3187_s1 + $0x298] sm:$0xff]   ;;  %v2409_v50 = vld [vmem:[%s3187_s1 + $0x210] sm:$0xff]  }
  0x2d   :  { %2110 = vmatpush3.bf16.msra.mxu1 %v2336_v51  ;;  %2071 = vmatprep.subr.bf16.mxu0 %v2337_v52  ;;  %v2410_v51 = vld [vmem:[%s3187_s1 + $0x290] sm:$0xff]   ;;  %v2411_v52 = vld [vmem:[%s3188_s0 + $0x164] ss:$56 sps:$4 sm:$0xff]  }
  0x2e   :  { %2111 = vmatprep.subr.bf16.mxu1 %v2338_v53  ;;  %1315 = vmatprep.mubr.bf16.mxu0 %v2341_v56  ;;  %v2413_v53 = vld [vmem:[%s3188_s0 + $0x16c] ss:$56 sps:$4 sm:$0xff]  }
  0x2f   :  { %1380 = vmatprep.mubr.bf16.mxu1 %v2343_v57  ;;  %v2417_v56 = vld [vmem:[%s3187_s1 + $0x248] sm:$0xff]  }
  0x30   :  { %2072 = vmatpush3.bf16.msra.mxu0 %v2339_v54  ;;  %v2415_v54 = vld [vmem:[%s3188_s0 + $0x160] ss:$56 sps:$4 sm:$0xff]   ;;  %v2418_v57 = vld [vmem:[%s3187_s1 + $0x2c8] sm:$0xff]  }
  0x31   :  { %2112 = vmatpush3.bf16.msra.mxu1 %v2340_v55  ;;  %2073 = vmatprep.subr.bf16.mxu0 %v2347_v60  ;;  %v2416_v55 = vld [vmem:[%s3188_s0 + $0x168] ss:$56 sps:$4 sm:$0xff]  }
  0x32   :  { %2113 = vmatprep.subr.bf16.mxu1 %v2348_v61  ;;  %v2421_v60 = vld [vmem:[%s3187_s1 + $0x240] sm:$0xff]  }
  0x33   :  { %1316 = vmatmul.mubr.bf16.gmra.mxu0 %v2345_v58  ;;  %v2419_v58 = vld [vmem:[%s3187_s1 + $0x208] sm:$0xff]   ;;  %v2422_v61 = vld [vmem:[%s3187_s1 + $0x2c0] sm:$0xff]  }
  0x34   :  { %1381 = vmatmul.mubr.bf16.gmra.mxu1 %v2346_v59  ;;  %2074 = vmatpush3.bf16.msra.mxu0 %v2349_v62  ;;  %v2420_v59 = vld [vmem:[%s3187_s1 + $0x288] sm:$0xff]   ;;  %v2423_v62 = vld [vmem:[%s3187_s1 + $0x200] sm:$0xff]  }
  0x35   :  { %2114 = vmatpush3.bf16.msra.mxu1 %v2350_v63  ;;  %2075 = vmatprep.subr.bf16.mxu0 %v2351_v0  ;;  %v2424_v63 = vld [vmem:[%s3187_s1 + $0x280] sm:$0xff]  }
  0x36   :  { %2115 = vmatprep.subr.bf16.mxu1 %v2352_v1  ;;  %1323 = vmatprep.mubr.bf16.mxu0 %v2355_v4  ;;  %v2425_v0 = vld [vmem:[%s3188_s0 + $0x20] ss:$56 sps:$4 sm:$0xff]   ;;  %v2427_v1 = vld [vmem:[%s3188_s0 + $0x24] ss:$56 sps:$4 sm:$0xff]  }
  0x37   :  { %1388 = vmatprep.mubr.bf16.mxu1 %v2357_v5  ;;  %v2431_v4 = vld [vmem:[%s3187_s1 + $0x378] sm:$0xff]  }
  0x38   :  { %2076 = vmatpush3.bf16.msra.mxu0 %v2353_v2  ;;  %v2428_v2 = vld [vmem:[%s3188_s0 + $0x28] ss:$56 sps:$4 sm:$0xff]   ;;  %v2432_v5 = vld [vmem:[%s3187_s1 + $0x338] sm:$0xff]  }
  0x39   :  { %2116 = vmatpush3.bf16.msra.mxu1 %v2354_v3  ;;  %2077 = vmatprep.subr.bf16.mxu0 %v2361_v8  ;;  %v2430_v3 = vld [vmem:[%s3188_s0 + $0x2c] ss:$56 sps:$4 sm:$0xff]  }
  0x3a   :  { %2117 = vmatprep.subr.bf16.mxu1 %v2362_v9  ;;  %v2435_v8 = vld [vmem:[%s3188_s0 + $0x94] ss:$56 sps:$4 sm:$0xff]  }
  0x3b   :  { %1324 = vmatmul.mubr.bf16.gmra.mxu0 %v2359_v6  ;;  %v2433_v6 = vld [vmem:[%s3187_s1 + $0x370] sm:$0xff]  }
  0x3c   :  { %1389 = vmatmul.mubr.bf16.gmra.mxu1 %v2360_v7  ;;  %2078 = vmatpush3.bf16.msra.mxu0 %v2363_v10  ;;  %v2434_v7 = vld [vmem:[%s3187_s1 + $0x330] sm:$0xff]  }
  0x3d   :  { %2118 = vmatpush3.bf16.msra.mxu1 %v2364_v11  ;;  %2079 = vmatprep.subr.bf16.mxu0 %v2365_v12  ;;  %v2437_v9 = vld [vmem:[%s3188_s0 + $0x9c] ss:$56 sps:$4 sm:$0xff]   ;;  %v2439_v10 = vld [vmem:[%s3188_s0 + $0x90] ss:$56 sps:$4 sm:$0xff]  }
  0x3e   :  { %2119 = vmatprep.subr.bf16.mxu1 %v2366_v13  ;;  %1429 = vmatprep.mubr.bf16.mxu0 %v2371_v17  ;;  %v2440_v11 = vld [vmem:[%s3188_s0 + $0x98] ss:$56 sps:$4 sm:$0xff]   ;;  %v2441_v12 = vld [vmem:[%s3187_s1 + $0x368] sm:$0xff]  }
  0x3f   :  { %1494 = vmatprep.mubr.bf16.mxu1 %v2374_v19  ;;  %v2442_v13 = vld [vmem:[%s3187_s1 + $0x328] sm:$0xff]  }
  0x40   :  { %2080 = vmatpush3.bf16.msra.mxu0 %v2367_v14  ;;  %v2443_v14 = vld [vmem:[%s3187_s1 + $0x360] sm:$0xff]  }
  0x41   :  { %2120 = vmatpush3.bf16.msra.mxu1 %v2368_v15  ;;  %2145 = vmatprep.subr.bf16.mxu0 %v2375_v20  ;;  %v2444_v15 = vld [vmem:[%s3187_s1 + $0x320] sm:$0xff]   ;;  %v2451_v20 = vld [vmem:[%s3187_s1 + $0x358] sm:$0xff]  }
  0x42   :  { %2185 = vmatprep.subr.bf16.mxu1 %v2376_v21  ;;  %v2447_v17 = vld [vmem:[%s3188_s0 + $0x10c] ss:$56 sps:$4 sm:$0xff]   ;;  %v2450_v19 = vld [vmem:[%s3188_s0 + $0x108] ss:$56 sps:$4 sm:$0xff]   ;;  %v2452_v21 = vld [vmem:[%s3187_s1 + $0x318] sm:$0xff]  }
  0x43   :  { %1430 = vmatmul.mubr.bf16.vlgmr.msra.gmra.mxu0 %v2369_v16  ;;  %v2445_v16 = vld [vmem:[%s3188_s0 + $0x104] ss:$56 sps:$4 sm:$0xff]  }
  0x44   :  { %1495 = vmatmul.mubr.bf16.vlgmr.msra.gmra.mxu1 %v2372_v18  ;;  %2146 = vmatpush3.bf16.msra.mxu0 %v2377_v22  ;;  %v2449_v18 = vld [vmem:[%s3188_s0 + $0x100] ss:$56 sps:$4 sm:$0xff]   ;;  %v2453_v22 = vld [vmem:[%s3187_s1 + $0x350] sm:$0xff]  }
  0x45   :  { %2186 = vmatpush3.bf16.msra.mxu1 %v2378_v23  ;;  %2147 = vmatprep.subr.bf16.mxu0 %v2379_v24  ;;  %v2455_v23 = vld [vmem:[%s3188_s0 + $0x174] ss:$56 sps:$4 sm:$0xff]  }
  0x46   :  { %2187 = vmatprep.subr.bf16.mxu1 %v2380_v25  ;;  %1437 = vmatprep.mubr.bf16.mxu0 %v2383_v28  ;;  %v2454_v24 = vld [vmem:[%s3187_s1 + $0x310] sm:$0xff]  }
  0x47   :  { %1502 = vmatprep.mubr.bf16.mxu1 %v2385_v29  ;;  %v2457_v25 = vld [vmem:[%s3188_s0 + $0x17c] ss:$56 sps:$4 sm:$0xff]   ;;  %v2460_v28 = vld [vmem:[%s3188_s0 + $0x178] ss:$56 sps:$4 sm:$0xff]   ;;  %v2462_v29 = vld [vmem:[%s3187_s1 + $0x308] sm:$0xff]  }
  0x48   :  { %2148 = vmatpush3.bf16.msra.mxu0 %v2381_v26  ;;  %v2461_v26 = vld [vmem:[%s3187_s1 + $0x348] sm:$0xff]  }
  0x49   :  { %2188 = vmatpush3.bf16.msra.mxu1 %v2382_v27  ;;  %2149 = vmatprep.subr.bf16.mxu0 %v2389_v32  ;;  %v2459_v27 = vld [vmem:[%s3188_s0 + $0x170] ss:$56 sps:$4 sm:$0xff]   ;;  %v2470_v32 = vld [vmem:[%s3188_s0 + $0x114] ss:$56 sps:$4 sm:$0xff]  }
  0x4a   :  { %2189 = vmatprep.subr.bf16.mxu1 %v2390_v33  ;;  %v2464_v33 = vld [vmem:[%s3187_s1 + $0x300] sm:$0xff]  }
  0x4b   :  { %1438 = vmatmul.mubr.bf16.gmra.mxu0 %v2387_v30  ;;  %v2463_v30 = vld [vmem:[%s3187_s1 + $0x340] sm:$0xff]  }
  0x4c   :  { %1503 = vmatmul.mubr.bf16.gmra.mxu1 %v2388_v31  ;;  %2150 = vmatpush3.bf16.msra.mxu0 %v2391_v34  ;;  %v2467_v31 = vld [vmem:[%s3188_s0 + $0x34] ss:$56 sps:$4 sm:$0xff]   ;;  %v2465_v34 = vld [vmem:[%s3188_s0 + $0x30] ss:$56 sps:$4 sm:$0xff]  }
  0x4d   :  { %2190 = vmatpush3.bf16.msra.mxu1 %v2392_v35  ;;  %2151 = vmatprep.subr.bf16.mxu0 %v2393_v36  ;;  %v2468_v35 = vld [vmem:[%s3188_s0 + $0x110] ss:$56 sps:$4 sm:$0xff]   ;;  %v2471_v36 = vld [vmem:[%s3188_s0 + $0xa4] ss:$56 sps:$4 sm:$0xff]  }
  0x4e   :  { %2191 = vmatprep.subr.bf16.mxu1 %v2394_v37  ;;  %1445 = vmatprep.mubr.bf16.mxu0 %v2397_v40  ;;  %v2473_v37 = vld [vmem:[%s3188_s0 + $0x184] ss:$56 sps:$4 sm:$0xff]  }
  0x4f   :  { %1510 = vmatprep.mubr.bf16.mxu1 %v2399_v41 }
  0x50   :  { %2152 = vmatpush3.bf16.msra.mxu0 %v2395_v38  ;;  %v2475_v38 = vld [vmem:[%s3188_s0 + $0xa0] ss:$56 sps:$4 sm:$0xff]  }
  0x51   :  { %2192 = vmatpush3.bf16.msra.mxu1 %v2396_v39  ;;  %2153 = vmatprep.subr.bf16.mxu0 %v2403_v44  ;;  %v2476_v39 = vld [vmem:[%s3188_s0 + $0x180] ss:$56 sps:$4 sm:$0xff]  }
  0x52   :  { %2193 = vmatprep.subr.bf16.mxu1 %v2404_v45 }
  0x53   :  { %1446 = vmatmul.mubr.bf16.gmra.mxu0 %v2401_v42 }
  0x54   :  { %1511 = vmatmul.mubr.bf16.gmra.mxu1 %v2402_v43  ;;  %2154 = vmatpush3.bf16.msra.mxu0 %v2405_v46 }
  0x55   :  { %2194 = vmatpush3.bf16.msra.mxu1 %v2406_v47  ;;  %2155 = vmatprep.subr.bf16.mxu0 %v2407_v48 }
  0x56   :  { %2195 = vmatprep.subr.bf16.mxu1 %v2408_v49  ;;  %1453 = vmatprep.mubr.bf16.mxu0 %v2411_v52 }
  0x57   :  { %1518 = vmatprep.mubr.bf16.mxu1 %v2413_v53 }
  0x58   :  { %2156 = vmatpush3.bf16.msra.mxu0 %v2409_v50 }
  0x59   :  { %2196 = vmatpush3.bf16.msra.mxu1 %v2410_v51  ;;  %2157 = vmatprep.subr.bf16.mxu0 %v2417_v56 }
  0x5a   :  { %2197 = vmatprep.subr.bf16.mxu1 %v2418_v57 }
  0x5b   :  { %1454 = vmatmul.mubr.bf16.gmra.mxu0 %v2415_v54 }
  0x5c   :  { %1519 = vmatmul.mubr.bf16.gmra.mxu1 %v2416_v55  ;;  %2158 = vmatpush3.bf16.msra.mxu0 %v2419_v58 }
  0x5d   :  { %2198 = vmatpush3.bf16.msra.mxu1 %v2420_v59  ;;  %2159 = vmatprep.subr.bf16.mxu0 %v2421_v60 }
  0x5e   :  { %2199 = vmatprep.subr.bf16.mxu1 %v2422_v61  ;;  %1559 = vmatprep.mubr.bf16.mxu0 %v2427_v1 }
  0x5f   :  { %1624 = vmatprep.mubr.bf16.mxu1 %v2430_v3 }
  0x60   :  { %2160 = vmatpush3.bf16.msra.mxu0 %v2423_v62 }
  0x61   :  { %2200 = vmatpush3.bf16.msra.mxu1 %v2424_v63  ;;  %2225 = vmatprep.subr.bf16.mxu0 %v2431_v4 }
  0x62   :  { %2265 = vmatprep.subr.bf16.mxu1 %v2431_v4 }
  0x63   :  { %1560 = vmatmul.mubr.bf16.vlgmr.msra.gmra.mxu0 %v2425_v0 }
  0x64   :  { %1625 = vmatmul.mubr.bf16.vlgmr.msra.gmra.mxu1 %v2428_v2  ;;  %2226 = vmatpush3.bf16.msra.mxu0 %v2432_v5 }
  0x65   :  { %2273 = vmatpush3.bf16.msra.mxu1 %v2432_v5  ;;  %2227 = vmatprep.subr.bf16.mxu0 %v2433_v6 }
  0x66   :  { %2266 = vmatprep.subr.bf16.mxu1 %v2433_v6  ;;  %1567 = vmatprep.mubr.bf16.mxu0 %v2435_v8 }
  0x67   :  { %1632 = vmatprep.mubr.bf16.mxu1 %v2437_v9 }
  0x68   :  { %2228 = vmatpush3.bf16.msra.mxu0 %v2434_v7 }
  0x69   :  { %2274 = vmatpush3.bf16.msra.mxu1 %v2434_v7  ;;  %2229 = vmatprep.subr.bf16.mxu0 %v2441_v12 }
  0x6a   :  { %2267 = vmatprep.subr.bf16.mxu1 %v2441_v12 }
  0x6b   :  { %1568 = vmatmul.mubr.bf16.gmra.mxu0 %v2439_v10 }
  0x6c   :  { %1633 = vmatmul.mubr.bf16.gmra.mxu1 %v2440_v11  ;;  %2230 = vmatpush3.bf16.msra.mxu0 %v2442_v13 }
  0x6d   :  { %2275 = vmatpush3.bf16.msra.mxu1 %v2442_v13  ;;  %2231 = vmatprep.subr.bf16.mxu0 %v2443_v14 }
  0x6e   :  { %2268 = vmatprep.subr.bf16.mxu1 %v2443_v14  ;;  %1575 = vmatprep.mubr.bf16.mxu0 %v2445_v16 }
  0x6f   :  { %1640 = vmatprep.mubr.bf16.mxu1 %v2447_v17 }
  0x70   :  { %2232 = vmatpush3.bf16.msra.mxu0 %v2444_v15 }
  0x71   :  { %2276 = vmatpush3.bf16.msra.mxu1 %v2444_v15  ;;  %2233 = vmatprep.subr.bf16.mxu0 %v2451_v20 }
  0x72   :  { %2269 = vmatprep.subr.bf16.mxu1 %v2451_v20 }
  0x73   :  { %1576 = vmatmul.mubr.bf16.gmra.mxu0 %v2449_v18 }
  0x74   :  { %1641 = vmatmul.mubr.bf16.gmra.mxu1 %v2450_v19  ;;  %2234 = vmatpush3.bf16.msra.mxu0 %v2452_v21 }
  0x75   :  { %2277 = vmatpush3.bf16.msra.mxu1 %v2452_v21  ;;  %2235 = vmatprep.subr.bf16.mxu0 %v2453_v22 }
  0x76   :  { %2270 = vmatprep.subr.bf16.mxu1 %v2453_v22  ;;  %1583 = vmatprep.mubr.bf16.mxu0 %v2455_v23 }
  0x77   :  { %1648 = vmatprep.mubr.bf16.mxu1 %v2457_v25 }
  0x78   :  { %2236 = vmatpush3.bf16.msra.mxu0 %v2454_v24 }
  0x79   :  { %2278 = vmatpush3.bf16.msra.mxu1 %v2454_v24  ;;  %2237 = vmatprep.subr.bf16.mxu0 %v2461_v26 }
  0x7a   :  { %2271 = vmatprep.subr.bf16.mxu1 %v2461_v26 }
  0x7b   :  { %1584 = vmatmul.mubr.bf16.gmra.mxu0 %v2459_v27 }
  0x7c   :  { %1649 = vmatmul.mubr.bf16.gmra.mxu1 %v2460_v28  ;;  %2238 = vmatpush3.bf16.msra.mxu0 %v2462_v29 }
  0x7d   :  { %1689 = vmatprep.mubr.bf16.mxu0 %v2467_v31  ;;  %2279 = vmatpush3.bf16.msra.mxu1 %v2462_v29 }
  0x7e   :  { %2239 = vmatprep.subr.bf16.mxu0 %v2463_v30  ;;  %2272 = vmatprep.subr.bf16.mxu1 %v2463_v30 }
  0x7f   :  { %1705 = vmatprep.mubr.bf16.mxu1 %v2470_v32 }
  0x80   :  { %2240 = vmatpush3.bf16.msra.mxu0 %v2464_v33 }
  0x81   :  { %2280 = vmatpush3.bf16.msra.mxu1 %v2464_v33 }
  0x83   :  { %1690 = vmatmul.mubr.bf16.vlgmr.msra.gmra.mxu0 %v2465_v34 }
  0x84   :  { %1706 = vmatmul.mubr.bf16.vlgmr.msra.gmra.mxu1 %v2468_v35  ;;  %1697 = vmatprep.mubr.bf16.mxu0 %v2471_v36 }
  0x85   :  { %1713 = vmatprep.mubr.bf16.mxu1 %v2473_v37 }
  0x8b   :  { %1698 = vmatmul.mubr.bf16.gmra.mxu0 %v2475_v38 }
  0x8c   :  { %1714 = vmatmul.mubr.bf16.gmra.mxu1 %v2476_v39 }
  0xe3   :  { %v2001_v40 = vpop.f32.mrf.mxu0 }
  0xe4   :  { %v2041_v41 = vpop.f32.mrf.mxu1 }
  0xe5   :  { %v2002_v42 = vpop.f32.mrf.mxu0 }
  0xe6   :  { %v2003_v43 = vadd.f32 %v2002_v42, %v2001_v40  ;;  %v2042_v44 = vpop.f32.mrf.mxu1 }
  0xe7   :  { %v2043_v45 = vadd.f32 %v2042_v44, %v2041_v41  ;;  %v2004_v46 = vpop.f32.mrf.mxu0 }
  0xe8   :  { %v2044_v47 = vpop.f32.mrf.mxu1 }
  0xe9   :  { %v3033_v48 = vadd.f32 %v2043_v45, %v2003_v43  ;;  %v2005_v49 = vpop.f32.mrf.mxu0 }
  0xea   :  { %v2006_v50 = vadd.f32 %v2005_v49, %v2004_v46  ;;  %v2045_v51 = vpop.f32.mrf.mxu1 }
  0xeb   :  { %v2046_v52 = vadd.f32 %v2045_v51, %v2044_v47  ;;  %v2007_v54 = vpop.f32.mrf.mxu0 }
  0xec   :  { %v2047_v55 = vpop.f32.mrf.mxu1 }
  0xed   :  { %v3035_v53 = vadd.f32 %v2046_v52, %v2006_v50  ;;  %v2008_v56 = vpop.f32.mrf.mxu0 }
  0xee   :  { %v2009_v57 = vadd.f32 %v2008_v56, %v2007_v54  ;;  %v2048_v58 = vpop.f32.mrf.mxu1 }
  0xef   :  { %v2049_v59 = vadd.f32 %v2048_v58, %v2047_v55  ;;  %v2010_v60 = vpop.f32.mrf.mxu0 }
  0xf0   :  { %v2050_v61 = vpop.f32.mrf.mxu1 }
  0xf1   :  { %v3037_v62 = vadd.f32 %v2049_v59, %v2009_v57  ;;  %v2011_v63 = vpop.f32.mrf.mxu0 }
  0xf2   :  { %v2012_v0 = vadd.f32 %v2011_v63, %v2010_v60  ;;  %v2051_v1 = vpop.f32.mrf.mxu1 }
  0xf3   :  { %v2052_v2 = vadd.f32 %v2051_v1, %v2050_v61  ;;  %v2013_v4 = vpop.f32.mrf.mxu0 }
  0xf4   :  { %v2053_v5 = vpop.f32.mrf.mxu1 }
  0xf5   :  { %v3039_v3 = vadd.f32 %v2052_v2, %v2012_v0  ;;  %v2014_v6 = vpop.f32.mrf.mxu0 }
  0xf6   :  { %v2015_v7 = vadd.f32 %v2014_v6, %v2013_v4  ;;  %v2054_v8 = vpop.f32.mrf.mxu1 }
  0xf7   :  { %v2055_v9 = vadd.f32 %v2054_v8, %v2053_v5  ;;  %v2016_v10 = vpop.f32.mrf.mxu0 }
  0xf8   :  { %v2056_v11 = vpop.f32.mrf.mxu1 }
  0xf9   :  { %v3041_v12 = vadd.f32 %v2055_v9, %v2015_v7  ;;  %v2017_v13 = vpop.f32.mrf.mxu0 }
  0xfa   :  { %v2018_v14 = vadd.f32 %v2017_v13, %v2016_v10  ;;  %v2057_v15 = vpop.f32.mrf.mxu1 }
  0xfb   :  { %v2058_v16 = vadd.f32 %v2057_v15, %v2056_v11  ;;  %v2019_v18 = vpop.f32.mrf.mxu0 }
  0xfc   :  { %v2059_v19 = vpop.f32.mrf.mxu1 }
  0xfd   :  { %v3043_v17 = vadd.f32 %v2058_v16, %v2018_v14  ;;  %v2020_v20 = vpop.f32.mrf.mxu0 }
  0xfe   :  { %v2060_v21 = vpop.f32.mrf.mxu1  ;;  %v2021_v22 = vadd.f32 %v2020_v20, %v2019_v18 }
  0xff   :  { %v2061_v23 = vadd.f32 %v2060_v21, %v2059_v19  ;;  %v2022_v24 = vpop.f32.mrf.mxu0 }
 0x100   :  { %v2062_v25 = vpop.f32.mrf.mxu1 }
 0x101   :  { %v3045_v26 = vadd.f32 %v2061_v23, %v2021_v22  ;;  %v2023_v27 = vpop.f32.mrf.mxu0 }
 0x102   :  { %v2063_v28 = vpop.f32.mrf.mxu1  ;;  %v2024_v29 = vadd.f32 %v2023_v27, %v2022_v24 }
 0x103   :  { %v2064_v30 = vadd.f32 %v2063_v28, %v2062_v25  ;;  %v2081_v32 = vpop.f32.mrf.mxu0 }
 0x104   :  { %v3049_v33 = vpop.f32.mrf.mxu1 }
 0x105   :  { %v3047_v31 = vadd.f32 %v2064_v30, %v2024_v29  ;;  %v2082_v34 = vpop.f32.mrf.mxu0 }
 0x106   :  { %v2122_v35 = vpop.f32.mrf.mxu1  ;;  %v2083_v28 = vadd.f32 %v2082_v34, %v2081_v32 }
 0x107   :  { %3191 = vst [vmem:[#allocation3_spill] sm:$0xff] %v3047_v31  ;;  %v2084_v36 = vpop.f32.mrf.mxu0 }
 0x108   :  { %v3051_v37 = vpop.f32.mrf.mxu1 }
 0x109   :  { %v2085_v38 = vpop.f32.mrf.mxu0 }
 0x10a   :  { %v3053_v39 = vpop.f32.mrf.mxu1 }
 0x10b   :  { %v2087_v40 = vpop.f32.mrf.mxu0 }
 0x10c   :  { %v3055_v41 = vpop.f32.mrf.mxu1 }
 0x10d   :  { %v2088_v42 = vpop.f32.mrf.mxu0 }
 0x10e   :  { %v3057_v43 = vpop.f32.mrf.mxu1 }
 0x10f   :  { %v2090_v44 = vpop.f32.mrf.mxu0 }
 0x110   :  { %v3059_v45 = vpop.f32.mrf.mxu1 }
 0x111   :  { %v2091_v46 = vpop.f32.mrf.mxu0 }
 0x112   :  { %v3061_v47 = vpop.f32.mrf.mxu1 }
 0x113   :  { %v2093_v49 = vpop.f32.mrf.mxu0 }
 0x114   :  { %v2133_v50 = vpop.f32.mrf.mxu1 }
 0x115   :  { %v2094_v51 = vpop.f32.mrf.mxu0 }
 0x116   :  { %v2134_v52 = vpop.f32.mrf.mxu1 }
 0x117   :  { %v2096_v54 = vpop.f32.mrf.mxu0 }
 0x118   :  { %v3063_v55 = vpop.f32.mrf.mxu1 }
 0x119   :  { %v2097_v56 = vpop.f32.mrf.mxu0 }
 0x11a   :  { %v3065_v57 = vpop.f32.mrf.mxu1  ;;  %v2098_v32 = vadd.f32 %v2097_v56, %v2096_v54  ;;  %v2132_v56 = vadd.f32 %v3061_v47, %v3059_v45 }
 0x11b   :  { %v2099_v58 = vpop.f32.mrf.mxu0 }
 0x11c   :  { %v3067_v59 = vpop.f32.mrf.mxu1 }
 0x11d   :  { %v2100_v60 = vpop.f32.mrf.mxu0 }
 0x11e   :  { %v3069_v61 = vpop.f32.mrf.mxu1 }
 0x11f   :  { %v3071_v63 = vpop.f32.mrf.mxu0  ;;  %v2141_v45 = vadd.f32 %v3069_v61, %v3067_v59 }
 0x120   :  { %v3073_v0 = vpop.f32.mrf.mxu1 }
 0x121   :  { %3192 = vst [vmem:[#allocation4_spill] sm:$0xff] %v3073_v0  ;;  %v3075_v1 = vpop.f32.mrf.mxu0 }
 0x122   :  { %v3077_v2 = vpop.f32.mrf.mxu1 }
 0x123   :  { %3193 = vst [vmem:[#allocation5_spill] sm:$0xff] %v3077_v2  ;;  %v2161_v4 = vpop.f32.mrf.mxu0 }
 0x124   :  { %v3079_v5 = vpop.f32.mrf.mxu1 }
 0x125   :  { %v2162_v6 = vpop.f32.mrf.mxu0 }
 0x126   :  { %v2202_v7 = vpop.f32.mrf.mxu1 }
 0x127   :  { %v2164_v8 = vpop.f32.mrf.mxu0 }
 0x128   :  { %v3081_v9 = vpop.f32.mrf.mxu1 }
 0x129   :  { %3194 = vst [vmem:[#allocation6_spill] sm:$0xff] %v3081_v9  ;;  %v2165_v10 = vpop.f32.mrf.mxu0 }
 0x12a   :  { %v3083_v11 = vpop.f32.mrf.mxu1 }
 0x12b   :  { %3195 = vst [vmem:[#allocation7_spill] sm:$0xff] %v3083_v11  ;;  %v3085_v13 = vpop.f32.mrf.mxu0  ;;  %v2123_v11 = vadd.f32 %v2122_v35, %v3049_v33  ;;  %v2126_v33 = vadd.f32 %v3053_v39, %v3051_v37  ;;  %v2138_v37 = vadd.f32 %v3065_v57, %v3063_v55 }
 0x12c   :  { %v3087_v14 = vpop.f32.mrf.mxu1 }
 0x12d   :  { %3196 = vst [vmem:[#allocation8_spill] sm:$0xff] %v3087_v14  ;;  %v2168_v15 = vpop.f32.mrf.mxu0  ;;  %v2095_v14 = vadd.f32 %v2094_v51, %v2093_v49 }
 0x12e   :  { %v3089_v16 = vpop.f32.mrf.mxu1  ;;  %v2169_v47 = vadd.f32 %v2168_v15, %v3085_v13  ;;  %v3205_v13 = vld [vmem:[#allocation3_spill] sm:$0xff] }
 0x12f   :  { %3197 = vst [vmem:[#allocation9_spill] sm:$0xff] %v3089_v16  ;;  %v3091_v18 = vpop.f32.mrf.mxu0  ;;  %v2086_v16 = vadd.f32 %v2085_v38, %v2084_v36  ;;  %v1448_v9 = vadd.f32 %v2095_v14, %v3041_v12  ;;  %v2163_v36 = vadd.f32 %v2162_v6, %v2161_v4  ;;  %v2129_v12 = vadd.f32 %v3057_v43, %v3055_v41 }
 0x130   :  { %3198 = vst [vmem:[#allocation10_spill] sm:$0xff] %v3091_v18  ;;  %v3093_v19 = vpop.f32.mrf.mxu1  ;;  %v2089_v18 = vadd.f32 %v2088_v42, %v2087_v40  ;;  %v2135_v42 = vadd.f32 %v2134_v52, %v2133_v50  ;;  %v2203_v4 = vadd.f32 %v2202_v7, %v3079_v5  ;;  %v3138_v7 = vld [vmem:[%s3189_s2] ss:$0 sm:$0xff] }
 0x131   :  { %3199 = vst [vmem:[#allocation11_spill] sm:$0xff] %v3093_v19  ;;  %v3095_v20 = vpop.f32.mrf.mxu0  ;;  %v1432_v19 = vadd.f32 %v2083_v28, %v3033_v48  ;;  %v1435_v49 = vadd.f32 %v2086_v16, %v3035_v53  ;;  %v2101_v48 = vadd.f32 %v2100_v60, %v2099_v58 }
 0x132   :  { %3200 = vst [vmem:[#allocation12_spill] sm:$0xff] %v3095_v20  ;;  %v3097_v21 = vpop.f32.mrf.mxu1  ;;  %v1440_v51 = vadd.f32 %v2089_v18, %v3037_v62  ;;  %v1451_v62 = vadd.f32 %v2098_v32, %v3043_v17  ;;  %v2104_v17 = vadd.f32 %v3075_v1, %v3071_v63 }
 0x133   :  { %3201 = vst [vmem:[#allocation13_spill] sm:$0xff] %v3097_v21  ;;  %v2173_v22 = vpop.f32.mrf.mxu0  ;;  %v2092_v21 = vadd.f32 %v2091_v46, %v2090_v44  ;;  %v1497_v40 = vadd.f32 %v2123_v11, %v1432_v19  ;;  %v2166_v44 = vadd.f32 %v2165_v10, %v2164_v8  ;;  %v1513_v46 = vadd.f32 %v2135_v42, %v1448_v9  ;;  %v3203_v10 = vld [vmem:[#allocation6_spill] sm:$0xff]  ;;  %v3204_v11 = vld [vmem:[#allocation7_spill] sm:$0xff] }
 0x134   :  { %v2213_v23 = vpop.f32.mrf.mxu1  ;;  %v1500_v50 = vadd.f32 %v2126_v33, %v1435_v49  ;;  %v1505_v52 = vadd.f32 %v2129_v12, %v1440_v51  ;;  %v1456_v39 = vadd.f32 %v2101_v48, %v3045_v26  ;;  %v1516_v9 = vadd.f32 %v2138_v37, %v1451_v62 }
 0x135   :  { %v2174_v24 = vpop.f32.mrf.mxu0  ;;  %v1443_v35 = vadd.f32 %v2092_v21, %v3039_v3  ;;  %v1562_v58 = vadd.f32 %v2163_v36, %v1497_v40  ;;  %v2206_v14 = vadd.f32 %v3204_v11, %v3203_v10  ;;  %v1459_v15 = vadd.f32 %v2104_v17, %v3205_v13  ;;  %v3206_v21 = vld [vmem:[#allocation4_spill] sm:$0xff] }
 0x136   :  { %v2214_v25 = vpop.f32.mrf.mxu1  ;;  %v2175_v28 = vadd.f32 %v2174_v24, %v2173_v22  ;;  %v1565_v6 = vadd.f32 %v2166_v44, %v1500_v50  ;;  %v1521_v63 = vadd.f32 %v2141_v45, %v1456_v39  ;;  %v3207_v22 = vld [vmem:[#allocation5_spill] sm:$0xff]  ;;  %v3210_v40 = vld [vmem:[#allocation8_spill] sm:$0xff] }
 0x137   :  { %v2176_v27 = vpop.f32.mrf.mxu0  ;;  %v1508_v60 = vadd.f32 %v2132_v56, %v1443_v35  ;;  %v2215_v55 = vadd.f32 %v2214_v25, %v2213_v23  ;;  %v1627_v26 = vadd.f32 %v2203_v4, %v1562_v58  ;;  %v2144_v23 = vadd.f32 %v3207_v22, %v3206_v21  ;;  %v3211_v42 = vld [vmem:[#allocation9_spill] sm:$0xff] }
 0x138   :  { %v3099_v29 = vpop.f32.mrf.mxu1  ;;  %v1578_v41 = vadd.f32 %v2175_v28, %v1513_v46  ;;  %v1630_v24 = vadd.f32 %v2206_v14, %v1565_v6  ;;  %v2209_v48 = vadd.f32 %v3211_v42, %v3210_v40 }
 0x139   :  { %v2177_v30 = vpop.f32.mrf.mxu0  ;;  %v1524_v56 = vadd.f32 %v2144_v23, %v1459_v15 }
 0x13a   :  { %v3101_v2 = vpop.f32.mrf.mxu1  ;;  %v2178_v3 = vadd.f32 %v2177_v30, %v2176_v27  ;;  %v1643_v1 = vadd.f32 %v2215_v55, %v1578_v41  ;;  %v3208_v27 = vld [vmem:[#allocation10_spill] sm:$0xff]  ;;  %v3209_v30 = vld [vmem:[#allocation12_spill] sm:$0xff]  ;;  %v3214_v10 = vld [vmem:[#allocation13_spill] sm:$0xff] }
 0x13b   :  { %v2179_v0 = vpop.f32.mrf.mxu0  ;;  %v2172_v32 = vadd.f32 %v3209_v30, %v3208_v27  ;;  %v2218_v49 = vadd.f32 %v3101_v2, %v3099_v29 }
 0x13c   :  { %v3104_v20 = vpop.f32.mrf.mxu1  ;;  %v1581_v5 = vadd.f32 %v2178_v3, %v1516_v9 }
 0x13d   :  { %3202 = vst [vmem:[#allocation14_spill] sm:$0xff] %v3104_v20  ;;  %v2180_v31 = vpop.f32.mrf.mxu0  ;;  %v1573_v3 = vadd.f32 %v2172_v32, %v1508_v60 }
 0x13e   :  { %v3108_v34 = vpop.f32.mrf.mxu1  ;;  %v2181_v16 = vadd.f32 %v2180_v31, %v2179_v0  ;;  %v1570_v0 = vadd.f32 %v2169_v47, %v1505_v52  ;;  %v1646_v44 = vadd.f32 %v2218_v49, %v1581_v5 }
 0x13f   :  { %v2182_v38 = vpop.f32.mrf.mxu0 }
 0x140   :  { %v3112_v20 = vpop.f32.mrf.mxu1  ;;  %v1586_v28 = vadd.f32 %v2181_v16, %v1521_v63  ;;  %v1635_v41 = vadd.f32 %v2209_v48, %v1570_v0 }
 0x141   :  { %v2183_v53 = vpop.f32.mrf.mxu0 }
 0x142   :  { %v3120_v54 = vpop.f32.mrf.mxu1  ;;  %v2184_v46 = vadd.f32 %v2183_v53, %v2182_v38 }
 0x143   :  { %v2241_v43 = vpop.f32.mrf.mxu0 }
 0x144   :  { %v2253_v8 = vpop.f32.mrf.mxu1  ;;  %v3212_v58 = vld [vmem:[#allocation14_spill] sm:$0xff]  ;;  %v1589_v45 = vadd.f32 %v2184_v46, %v1524_v56 }
 0x145   :  { %v2242_v57 = vpop.f32.mrf.mxu0  ;;  %v2221_v2 = vadd.f32 %v3108_v34, %v3212_v58 }
 0x146   :  { %v2243_v18 = vadd.f32 %v2242_v57, %v2241_v43  ;;  %v2254_v19 = vpop.f32.mrf.mxu1 }
 0x147   :  { %v2255_v59 = vadd.f32 %v2254_v19, %v2253_v8  ;;  %v2244_v61 = vpop.f32.mrf.mxu0  ;;  %v1651_v6 = vadd.f32 %v2221_v2, %v1586_v28 }
 0x148   :  { %v1692_v25 = vadd.f32 %v2243_v18, %v1627_v26  ;;  %v2256_v31 = vpop.f32.mrf.mxu1  ;;  %v3213_v26 = vld [vmem:[#allocation11_spill] sm:$0xff]  ;;  %v2224_v18 = vadd.f32 %v3120_v54, %v3112_v20 }
 0x149   :  { %v1708_v51 = vadd.f32 %v2255_v59, %v1643_v1  ;;  %v2245_v36 = vpop.f32.mrf.mxu0  ;;  %v2212_v11 = vadd.f32 %v3214_v10, %v3213_v26 }
 0x14a   :  { %v1756_v33 = vadd.f32 %v3138_v7, %v1692_v25  ;;  %v2246_v12 = vadd.f32 %v2245_v36, %v2244_v61  ;;  %v2257_v35 = vpop.f32.mrf.mxu1  ;;  %v1654_v21 = vadd.f32 %v2224_v18, %v1589_v45 }
 0x14b   :  { %v1760_v62 = vadd.f32 %v3138_v7, %v1708_v51  ;;  %v2258_v50 = vadd.f32 %v2257_v35, %v2256_v31  ;;  %v2247_v52 = vpop.f32.mrf.mxu0  ;;  %v1638_v5 = vadd.f32 %v2212_v11, %v1573_v3 }
 0x14c   :  { %v1764_v29 = vsub.f32 0.0, %v1756_v33  ;;  %v1695_v37 = vadd.f32 %v2246_v12, %v1630_v24  ;;  %v2259_v39 = vpop.f32.mrf.mxu1 }
 0x14d   :  { %v1768_v43 = vsub.f32 0.0, %v1760_v62  ;;  %v1711_v17 = vadd.f32 %v2258_v50, %v1646_v44  ;;  %v2248_v4 = vpop.f32.mrf.mxu0 }
 0x14e   :  { %v1772_v8 = vmul.f32 1.442695, %v1764_v29  ;;  %v1757_v38 = vadd.f32 %v3138_v7, %v1695_v37  ;;  %v2249_v53 = vadd.f32 %v2248_v4, %v2247_v52  ;;  %v2260_v9 = vpop.f32.mrf.mxu1 }
 0x14f   :  { %v1780_v47 = vmul.f32 1.442695, %v1768_v43  ;;  %v1761_v55 = vadd.f32 %v3138_v7, %v1711_v17  ;;  %v2261_v57 = vadd.f32 %v2260_v9, %v2259_v39  ;;  %v2250_v34 = vpop.f32.mrf.mxu0 }
 0x150   :  { %2477 = vpow2.f32 %v1772_v8  ;;  %v1765_v60 = vsub.f32 0.0, %v1757_v38  ;;  %v1700_v14 = vadd.f32 %v2249_v53, %v1635_v41  ;;  %v2262_v16 = vpop.f32.mrf.mxu1 }
 0x151   :  { %2479 = vpow2.f32 %v1780_v47  ;;  %v1769_v19 = vsub.f32 0.0, %v1761_v55  ;;  %v1716_v63 = vadd.f32 %v2261_v57, %v1651_v6  ;;  %v2251_v1 = vpop.f32.mrf.mxu0 }
 0x152   :  { %v1774_v59 = vmul.f32 1.442695, %v1765_v60  ;;  %v1758_v61 = vadd.f32 %v3138_v7, %v1700_v14  ;;  %v2252_v13 = vadd.f32 %v2251_v1, %v2250_v34  ;;  %v2263_v15 = vpop.f32.mrf.mxu1 }
 0x153   :  { %v1782_v22 = vmul.f32 1.442695, %v1769_v19  ;;  %v1762_v23 = vadd.f32 %v3138_v7, %v1716_v63  ;;  %v2264_v24 = vadd.f32 %v2263_v15, %v2262_v16 }
 0x154   :  { %2481 = vpow2.f32 %v1774_v59  ;;  %v1766_v25 = vsub.f32 0.0, %v1758_v61  ;;  %v1703_v31 = vadd.f32 %v2252_v13, %v1638_v5 }
 0x155   :  { %2483 = vpow2.f32 %v1782_v22  ;;  %v1770_v20 = vsub.f32 0.0, %v1762_v23  ;;  %v1719_v54 = vadd.f32 %v2264_v24, %v1654_v21 }
 0x156   :  { %v1776_v0 = vmul.f32 1.442695, %v1766_v25  ;;  %v1759_v27 = vadd.f32 %v3138_v7, %v1703_v31 }
 0x157   :  { %v1784_v30 = vmul.f32 1.442695, %v1770_v20  ;;  %v1763_v32 = vadd.f32 %v3138_v7, %v1719_v54 }
 0x158   :  { %2485 = vpow2.f32 %v1776_v0  ;;  %v1767_v49 = vsub.f32 0.0, %v1759_v27 }
 0x159   :  { %2487 = vpow2.f32 %v1784_v30  ;;  %v1771_v51 = vsub.f32 0.0, %v1763_v32 }
 0x15a   :  { %v1778_v36 = vmul.f32 1.442695, %v1767_v49 }
 0x15b   :  { %v1786_v40 = vmul.f32 1.442695, %v1771_v51 }
 0x15c   :  { %2489 = vpow2.f32 %v1778_v36 }
 0x15d   :  { %v2478_v42 = vpop.eup %2477  ;;  %2491 = vpow2.f32 %v1786_v40 }
 0x15e   :  { %v2480_v48 = vpop.eup %2479  ;;  %v1788_v28 = vadd.f32 1.0, %v2478_v42 }
 0x15f   :  { %v1792_v33 = vadd.f32 1.0, %v2480_v48 }
 0x160   :  { %2493 = vrcp.f32 %v1788_v28 }
 0x161   :  { %v2482_v12 = vpop.eup %2481  ;;  %2495 = vrcp.f32 %v1792_v33 }
 0x162   :  { %v2484_v35 = vpop.eup %2483  ;;  %v1789_v44 = vadd.f32 1.0, %v2482_v12 }
 0x163   :  { %v1793_v46 = vadd.f32 1.0, %v2484_v35 }
 0x164   :  { %2497 = vrcp.f32 %v1789_v44 }
 0x165   :  { %v2486_v7 = vpop.eup %2485  ;;  %2499 = vrcp.f32 %v1793_v46 }
 0x166   :  { %v2488_v62 = vpop.eup %2487  ;;  %v1790_v50 = vadd.f32 1.0, %v2486_v7 }
 0x167   :  { %v1794_v52 = vadd.f32 1.0, %v2488_v62 }
 0x168   :  { %2501 = vrcp.f32 %v1790_v50 }
 0x169   :  { %v2490_v56 = vpop.eup %2489  ;;  %2503 = vrcp.f32 %v1794_v52 }
 0x16a   :  { %v2492_v58 = vpop.eup %2491  ;;  %v1791_v2 = vadd.f32 1.0, %v2490_v56 }
 0x16b   :  { %v1795_v29 = vadd.f32 1.0, %v2492_v58 }
 0x16c   :  { %2505 = vrcp.f32 %v1791_v2 }
 0x16d   :  { %v2494_v37 = vpop.eup %2493  ;;  %2507 = vrcp.f32 %v1795_v29 }
 0x16e   :  { %v2496_v39 = vpop.eup %2495  ;;  %1804 = vst [vmem:[%s3190_s3] sm:$0xff] %v2494_v37 }
 0x16f   :  { %1808 = vst [vmem:[%s3190_s3 + $0x20] sm:$0xff] %v2496_v39 }
 0x171   :  { %v2498_v41 = vpop.eup %2497 }
 0x172   :  { %v2500_v3 = vpop.eup %2499  ;;  %1805 = vst [vmem:[%s3190_s3 + $0x8] sm:$0xff] %v2498_v41 }
 0x173   :  { %1809 = vst [vmem:[%s3190_s3 + $0x28] sm:$0xff] %v2500_v3 }
 0x175   :  { %v2502_v43 = vpop.eup %2501 }
 0x176   :  { %v2504_v17 = vpop.eup %2503  ;;  %1806 = vst [vmem:[%s3190_s3 + $0x10] sm:$0xff] %v2502_v43 }
 0x177   :  { %1810 = vst [vmem:[%s3190_s3 + $0x30] sm:$0xff] %v2504_v17 }
 0x179   :  { %v2506_v4 = vpop.eup %2505 }
 0x17a   :  { %v2508_v6 = vpop.eup %2507  ;;  %1807 = vst [vmem:[%s3190_s3 + $0x18] sm:$0xff] %v2506_v4 }
 0x17b   :  { %1811 = vst [vmem:[%s3190_s3 + $0x38] sm:$0xff] %v2508_v6 }

</bundles_post_ra>
